<compile_context>
chip_gen: v6e
topology: v6e:2x2x1
jax: 0.10.0
libtpu: 0.0.40
codegen_flags: <defaults>
</compile_context>

<pallas_src>
import functools

import jax
import jax.numpy as jnp
from jax import lax
from jax.experimental import pallas as pl
from jax.experimental.pallas import tpu as pltpu
import numpy as np


# ----------------------------------------------------------------------------
# Kernel A: pointwise (1x1x1) conv == tiled matmul + fused BN (+ residual)(+ReLU)
# ----------------------------------------------------------------------------
def _mm_bn_act_kernel(x_ref, w_ref, scale_ref, bias_ref, o_ref, *, apply_relu):
    y = jnp.dot(x_ref[...], w_ref[...], preferred_element_type=jnp.float32)
    y = y * scale_ref[...] + bias_ref[...]
    if apply_relu:
        y = jnp.maximum(y, 0.0)
    o_ref[...] = y.astype(o_ref.dtype)


def _mm_bn_add_relu_kernel(x_ref, w_ref, scale_ref, bias_ref, r_ref, o_ref):
    y = jnp.dot(x_ref[...], w_ref[...], preferred_element_type=jnp.float32)
    y = y * scale_ref[...] + bias_ref[...]
    y = y + r_ref[...].astype(jnp.float32)
    y = jnp.maximum(y, 0.0)
    o_ref[...] = y.astype(o_ref.dtype)


def _pick_tile(m):
    for t in (1024, 512, 256, 128, 64, 32, 16, 8):
        if m % t == 0:
            return t
    return m


def pointwise_conv_bn_act(x2d, w, scale, bias, *, residual=None,
                          apply_relu=True, out_dtype=jnp.bfloat16):
    """x2d: (M, Cin), w: (Cin, Cout) -> relu(bn(x @ w) [+ residual])  (M, Cout)."""
    M, Cin = x2d.shape
    Cout = w.shape[-1]
    tm = _pick_tile(M)

    sc2 = scale.reshape(1, Cout).astype(jnp.float32)
    bi2 = bias.reshape(1, Cout).astype(jnp.float32)

    in_specs = [
        pl.BlockSpec((tm, Cin), lambda i: (i, 0)),        # activations stream
        pl.BlockSpec((Cin, Cout), lambda i: (0, 0)),      # weights resident
        pl.BlockSpec((1, Cout), lambda i: (0, 0)),        # BN scale resident
        pl.BlockSpec((1, Cout), lambda i: (0, 0)),        # BN bias resident
    ]
    args = [x2d.astype(jnp.bfloat16), w.astype(jnp.bfloat16), sc2, bi2]

    if residual is not None:
        in_specs.append(pl.BlockSpec((tm, Cout), lambda i: (i, 0)))
        args.append(residual.astype(jnp.bfloat16))        # residual kept bf16
        kernel = _mm_bn_add_relu_kernel
    else:
        kernel = functools.partial(_mm_bn_act_kernel, apply_relu=apply_relu)

    bytes_accessed = 2 * (M * Cin + Cin * Cout + M * Cout)
    return pl.pallas_call(
        kernel,
        out_shape=jax.ShapeDtypeStruct((M, Cout), out_dtype),
        grid_spec=pltpu.PrefetchScalarGridSpec(
            num_scalar_prefetch=0,
            grid=(M // tm,),
            in_specs=in_specs,
            out_specs=pl.BlockSpec((tm, Cout), lambda i: (i, 0)),
        ),
        compiler_params=pltpu.CompilerParams(
            dimension_semantics=("parallel",),
            vmem_limit_bytes=32 * 1024 * 1024),
        cost_estimate=pl.CostEstimate(
            flops=2 * M * Cin * Cout, transcendentals=0,
            bytes_accessed=int(bytes_accessed)),
    )(*args)


# ----------------------------------------------------------------------------
# Kernel B: 3x3x3 strided conv + BN + ReLU.
#   grid = (N, To, kt):   temporal tap folded into the index_map (no im2col in
#   HBM); the 9 spatial taps are contiguous slices of a polyphase-reorganized
#   padded plane, reduced on the MXU into an f32 scratch accumulator.
# ----------------------------------------------------------------------------
def _conv3x3x3_bn_relu_kernel(x_ref, w_ref, scale_ref, bias_ref, o_ref, acc_ref,
                              *, stride, Ho, Wo, Hpp):
    kt = pl.program_id(2)

    @pl.when(kt == 0)
    def _():
        acc_ref[...] = jnp.zeros_like(acc_ref)

    acc = acc_ref[...]
    for kh in range(3):
        ph, oh = kh % stride, kh // stride
        for kw in range(3):
            pw, ow = kw % stride, kw // stride
            base = (ph * stride + pw) * Hpp
            tap = x_ref[0, 0, base + oh:base + oh + Ho, ow:ow + Wo, :]
            tap = tap.reshape(Ho * Wo, tap.shape[-1])
            acc = acc + jnp.dot(tap, w_ref[0, kh * 3 + kw],
                                preferred_element_type=jnp.float32)
    acc_ref[...] = acc

    @pl.when(kt == pl.num_programs(2) - 1)
    def _():
        y = acc * scale_ref[...] + bias_ref[...]
        y = jnp.maximum(y, 0.0)
        o_ref[0, 0] = y.astype(o_ref.dtype)


def conv3x3x3_bn_relu(x_ndhwc, w, scale, bias, *, stride,
                      out_dtype=jnp.bfloat16):
    """x: (N,T,H,W,Cin); w: (Cout,Cin,3,3,3); stride on T,H,W; padding 1.
    Returns relu(bn(conv(x))) with shape (N, To, Ho, Wo, Cout)."""
    N, T, H, W, Cin = x_ndhwc.shape
    Cout = w.shape[0]
    st = stride
    To = (T + 2 - 3) // st + 1
    Ho = (H + 2 - 3) // st + 1
    Wo = (W + 2 - 3) // st + 1
    Tp, Hp, Wp = T + 2, H + 2, W + 2
    Hpp = -(-Hp // st)
    Wpp = -(-Wp // st)

    # conv padding (=1) plus pad H/W up to a stride multiple for the phase split.
    xp = jnp.pad(x_ndhwc, ((0, 0), (1, 1), (1, 1), (1, 1), (0, 0)))
    xp = jnp.pad(xp, ((0, 0), (0, 0), (0, Hpp * st - Hp),
                      (0, Wpp * st - Wp), (0, 0)))
    # Polyphase reorg so every (kh,kw) tap becomes a CONTIGUOUS in-kernel slice.
    xps = xp.reshape(N, Tp, Hpp, st, Wpp, st, Cin)
    xps = jnp.transpose(xps, (0, 1, 3, 5, 2, 4, 6))       # (N,Tp,st,st,Hpp,Wpp,C)
    xps = xps.reshape(N, Tp, st * st * Hpp, Wpp, Cin).astype(jnp.bfloat16)

    # (Cout,Cin,3,3,3) -> (3, 9, Cin, Cout)  [kt, kh*3+kw, Cin, Cout]
    wr = jnp.transpose(w, (2, 3, 4, 1, 0)).reshape(3, 9, Cin, Cout)
    wr = wr.astype(jnp.bfloat16)

    sc2 = scale.reshape(1, Cout).astype(jnp.float32)
    bi2 = bias.reshape(1, Cout).astype(jnp.float32)

    kernel = functools.partial(_conv3x3x3_bn_relu_kernel,
                               stride=st, Ho=Ho, Wo=Wo, Hpp=Hpp)

    bytes_accessed = 2 * (N * To * 3 * st * st * Hpp * Wpp * Cin
                          + 27 * Cin * Cout + N * To * Ho * Wo * Cout)
    out = pl.pallas_call(
        kernel,
        out_shape=jax.ShapeDtypeStruct((N, To, Ho * Wo, Cout), out_dtype),
        grid_spec=pltpu.PrefetchScalarGridSpec(
            num_scalar_prefetch=0,
            grid=(N, To, 3),
            in_specs=[
                # one padded (phase-split) time plane; temporal tap via index_map
                pl.BlockSpec((1, 1, st * st * Hpp, Wpp, Cin),
                             lambda n, to, kt: (n, to * st + kt, 0, 0, 0)),
                # all 9 spatial tap weights for the current temporal tap
                pl.BlockSpec((1, 9, Cin, Cout),
                             lambda n, to, kt: (kt, 0, 0, 0)),
                pl.BlockSpec((1, Cout), lambda n, to, kt: (0, 0)),
                pl.BlockSpec((1, Cout), lambda n, to, kt: (0, 0)),
            ],
            out_specs=pl.BlockSpec((1, 1, Ho * Wo, Cout),
                                   lambda n, to, kt: (n, to, 0, 0)),
            scratch_shapes=[pltpu.VMEM((Ho * Wo, Cout), jnp.float32)],
        ),
        compiler_params=pltpu.CompilerParams(
            dimension_semantics=("parallel", "parallel", "arbitrary"),
            vmem_limit_bytes=32 * 1024 * 1024),
        cost_estimate=pl.CostEstimate(
            flops=2 * N * To * Ho * Wo * 27 * Cin * Cout, transcendentals=0,
            bytes_accessed=int(bytes_accessed)),
    )(xps, wr, sc2, bi2)
    return out.reshape(N, To, Ho, Wo, Cout)


# ----------------------------------------------------------------------------
# Bottleneck3d forward (inference-mode BN folded into scale/bias)
# ----------------------------------------------------------------------------
def _fold_bn(gamma, beta, mean, var, eps=1e-5):
    scale = gamma / jnp.sqrt(var + eps)
    return scale, beta - mean * scale


def bottleneck3d_forward(x_ncdhw, p, stride):
    x = jnp.transpose(x_ncdhw, (0, 2, 3, 4, 1)).astype(jnp.bfloat16)  # NDHWC
    N, T, H, W, Cin = x.shape
    planes = p["w1"].shape[0]
    outplanes = p["w3"].shape[0]
    s = stride

    s1, b1 = _fold_bn(*p["bn1"])
    s2, b2 = _fold_bn(*p["bn2"])
    s3, b3 = _fold_bn(*p["bn3"])

    # conv1 (1x1x1) + bn1 + relu  -- single M-tiled matmul, bf16 in / bf16 out
    w1 = p["w1"].reshape(planes, Cin).T                     # (Cin, planes)
    out = pointwise_conv_bn_act(x.reshape(N * T * H * W, Cin), w1, s1, b1,
                                apply_relu=True, out_dtype=jnp.bfloat16)
    out = out.reshape(N, T, H, W, planes)

    # conv2 (3x3x3, stride s, pad 1) + bn2 + relu -- taps folded via index_map
    out = conv3x3x3_bn_relu(out, p["w2"], s2, b2, stride=s,
                            out_dtype=jnp.bfloat16)
    _, To, Ho, Wo, _ = out.shape
    M2 = N * To * Ho * Wo

    # residual branch
    if p.get("wd") is not None:
        sd, bd = _fold_bn(*p["bnd"])
        wd = p["wd"].reshape(outplanes, Cin).T
        xs = x[:, ::s, ::s, ::s, :].reshape(M2, Cin)
        res = pointwise_conv_bn_act(xs, wd, sd, bd, apply_relu=False,
                                    out_dtype=jnp.bfloat16)
    else:
        assert s == 1 and Cin == outplanes, \
            "identity residual needs stride==1 and inplanes==outplanes"
        res = x.reshape(M2, Cin)

    # conv3 (1x1x1) + bn3 + residual add + relu, fused into one kernel
    w3 = p["w3"].reshape(outplanes, planes).T
    out = pointwise_conv_bn_act(out.reshape(M2, planes), w3, s3, b3,
                                residual=res, out_dtype=jnp.float32)
    out = out.reshape(N, To, Ho, Wo, outplanes)
    return jnp.transpose(out, (0, 4, 1, 2, 3))              # back to NCDHW


bottleneck3d_forward_jit = jax.jit(bottleneck3d_forward, static_argnums=(2,))


# ----------------------------------------------------------------------------
# Pure-JAX reference.  Conv operands are cast to bf16 (f32 accumulation) to
# mirror the kernels' bf16 MXU feed; BN / ReLU / residual math stays f32.
# ----------------------------------------------------------------------------
def _ref_forward(x, p, stride):
    dn = ("NCDHW", "OIDHW", "NCDHW")
    bf = jnp.bfloat16

    def conv(a, w, s, pad):
        return lax.conv_general_dilated(
            a.astype(bf), w.astype(bf), window_strides=(s, s, s),
            padding=[(pad, pad)] * 3, dimension_numbers=dn,
            preferred_element_type=jnp.float32)

    def bn(a, params):
        gamma, beta, mean, var = params
        sc = gamma / jnp.sqrt(var + 1e-5)
        bi = beta - mean * sc
        return a * sc[None, :, None, None, None] + bi[None, :, None, None, None]

    xb = x.astype(bf)
    out = jax.nn.relu(bn(conv(xb, p["w1"], 1, 0), p["bn1"])).astype(bf)
    out = jax.nn.relu(bn(conv(out, p["w2"], stride, 1), p["bn2"])).astype(bf)
    out = bn(conv(out, p["w3"], 1, 0), p["bn3"])
    if p.get("wd") is not None:
        res = bn(conv(xb, p["wd"], stride, 0), p["bnd"]).astype(bf)
    else:
        res = xb
    return jax.nn.relu(out + res.astype(jnp.float32))


# ----------------------------------------------------------------------------
# Main
# ----------------------------------------------------------------------------
if __name__ == "__main__":
    key = jax.random.PRNGKey(0)

    def bn_params(k, c):
        k1, k2, k3, k4 = jax.random.split(k, 4)
        gamma = jax.random.uniform(k1, (c,), jnp.float32, 0.5, 1.5)
        beta = 0.1 * jax.random.normal(k2, (c,), jnp.float32)
        mean = 0.1 * jax.random.normal(k3, (c,), jnp.float32)
        var = jax.random.uniform(k4, (c,), jnp.float32, 0.5, 1.5)
        return (gamma, beta, mean, var)

    def conv_w(k, cout, cin, kt, kh, kw):
        fan_in = cin * kt * kh * kw
        return ((2.0 / fan_in) ** 0.5) * jax.random.normal(
            k, (cout, cin, kt, kh, kw), jnp.float32)

    def make_params(k, inplanes, planes, expansion, with_downsample):
        ks = jax.random.split(k, 8)
        outplanes = planes * expansion
        return {
            "w1": conv_w(ks[0], planes, inplanes, 1, 1, 1),
            "bn1": bn_params(ks[1], planes),
            "w2": conv_w(ks[2], planes, planes, 3, 3, 3),
            "bn2": bn_params(ks[3], planes),
            "w3": conv_w(ks[4], outplanes, planes, 1, 1, 1),
            "bn3": bn_params(ks[5], outplanes),
            "wd": (conv_w(ks[6], outplanes, inplanes, 1, 1, 1)
                   if with_downsample else None),
            "bnd": bn_params(ks[7], outplanes) if with_downsample else None,
        }

    k1, k2, k3, k4 = jax.random.split(key, 4)

    # Case 1: strided bottleneck with conv downsample (stride 2).
    pA = make_params(k1, inplanes=64, planes=32, expansion=4,
                     with_downsample=True)
    xA = jax.random.normal(k2, (2, 64, 6, 16, 16), jnp.float32)
    outA = jax.block_until_ready(bottleneck3d_forward_jit(xA, pA, 2))
    refA = jax.block_until_ready(_ref_forward(xA, pA, 2))
    np.testing.assert_allclose(np.asarray(outA), np.asarray(refA),
                               rtol=1e-2, atol=1e-2)

    # Case 2: identity-residual bottleneck (stride 1, no downsample).
    pB = make_params(k3, inplanes=128, planes=32, expansion=4,
                     with_downsample=False)
    xB = jax.random.normal(k4, (1, 128, 4, 8, 8), jnp.float32)
    outB = jax.block_until_ready(bottleneck3d_forward_jit(xB, pB, 1))
    refB = jax.block_until_ready(_ref_forward(xB, pB, 1))
    np.testing.assert_allclose(np.asarray(outB), np.asarray(refB),
                               rtol=1e-2, atol=1e-2)

    print("KERNEL_OK")
</pallas_src>

<mosaic_0001>
module attributes {stable_mosaic.version = 11 : i64} {
  func.func @_mm_bn_act_kernel(%arg0: i32, %arg1: memref<1024x64xbf16, #tpu.memory_space<vmem>>, %arg2: memref<64x32xbf16, #tpu.memory_space<vmem>>, %arg3: memref<1x32xf32, #tpu.memory_space<vmem>>, %arg4: memref<1x32xf32, #tpu.memory_space<vmem>>, %arg5: memref<1024x32xbf16, #tpu.memory_space<vmem>>) attributes {dimension_semantics = [#tpu.dimension_semantics<parallel>], iteration_bounds = array<i64: 3>, scalar_prefetch = 0 : i64, scratch_operands = 0 : i64, tpu.core_type = #tpu.core_type<tc>, window_params = [{transform_indices = @transform_0, window_bounds = array<i64: 1024, 64>}, {pipeline_mode = #tpu.pipeline_mode<synchronous>, transform_indices = @transform_1, window_bounds = array<i64: 64, 32>}, {pipeline_mode = #tpu.pipeline_mode<synchronous>, transform_indices = @transform_2, window_bounds = array<i64: 1, 32>}, {pipeline_mode = #tpu.pipeline_mode<synchronous>, transform_indices = @transform_3, window_bounds = array<i64: 1, 32>}, {transform_indices = @transform_4, window_bounds = array<i64: 1024, 32>}]} {
    %c0 = arith.constant 0 : index
    %c0_0 = arith.constant 0 : index
    %0 = vector.load %arg1[%c0, %c0_0] : memref<1024x64xbf16, #tpu.memory_space<vmem>>, vector<1024x64xbf16>
    %c0_1 = arith.constant 0 : index
    %c0_2 = arith.constant 0 : index
    %1 = vector.load %arg2[%c0_1, %c0_2] : memref<64x32xbf16, #tpu.memory_space<vmem>>, vector<64x32xbf16>
    %cst = arith.constant dense<0.000000e+00> : vector<1024x32xf32>
    %2 = tpu.matmul %0, %1, %cst {dimension_numbers = #tpu.dot_dimension_numbers<[1], [0], [0], [1], [0, 0, 1, 1], [], []>} : vector<1024x64xbf16>, vector<64x32xbf16>, vector<1024x32xf32> -> vector<1024x32xf32>
    %c0_3 = arith.constant 0 : index
    %c0_4 = arith.constant 0 : index
    %3 = vector.load %arg3[%c0_3, %c0_4] : memref<1x32xf32, #tpu.memory_space<vmem>>, vector<1x32xf32>
    %4 = vector.broadcast %3 : vector<1x32xf32> to vector<1024x32xf32>
    %5 = arith.mulf %2, %4 : vector<1024x32xf32>
    %c0_5 = arith.constant 0 : index
    %c0_6 = arith.constant 0 : index
    %6 = vector.load %arg4[%c0_5, %c0_6] : memref<1x32xf32, #tpu.memory_space<vmem>>, vector<1x32xf32>
    %7 = vector.broadcast %6 : vector<1x32xf32> to vector<1024x32xf32>
    %8 = arith.addf %5, %7 : vector<1024x32xf32>
    %cst_7 = arith.constant 0.000000e+00 : f32
    %9 = vector.broadcast %cst_7 : f32 to vector<1024x32xf32>
    %10 = arith.maximumf %8, %9 : vector<1024x32xf32>
    %11 = arith.truncf %10 : vector<1024x32xf32> to vector<1024x32xbf16>
    %c0_8 = arith.constant 0 : index
    %c0_9 = arith.constant 0 : index
    %12 = vector.load %arg5[%c0_8, %c0_9] : memref<1024x32xbf16, #tpu.memory_space<vmem>>, vector<1024x32xbf16>
    tpu.vector_store %arg5[%c0_8, %c0_9], %11 {strides = array<i32>} : memref<1024x32xbf16, #tpu.memory_space<vmem>>, vector<1024x32xbf16>,
    return
  }
  func.func @transform_0(%arg0: i32) -> (i32, i32) {
    %c0_i32 = arith.constant 0 : i32
    %c0_i32_0 = arith.constant 0 : i32
    return %arg0, %c0_i32 : i32, i32
  }
  func.func @transform_1(%arg0: i32) -> (i32, i32) {
    %c0_i32 = arith.constant 0 : i32
    %c0_i32_0 = arith.constant 0 : i32
    %c0_i32_1 = arith.constant 0 : i32
    return %c0_i32, %c0_i32_0 : i32, i32
  }
  func.func @transform_2(%arg0: i32) -> (i32, i32) {
    %c0_i32 = arith.constant 0 : i32
    %c0_i32_0 = arith.constant 0 : i32
    %c0_i32_1 = arith.constant 0 : i32
    return %c0_i32, %c0_i32_0 : i32, i32
  }
  func.func @transform_3(%arg0: i32) -> (i32, i32) {
    %c0_i32 = arith.constant 0 : i32
    %c0_i32_0 = arith.constant 0 : i32
    %c0_i32_1 = arith.constant 0 : i32
    return %c0_i32, %c0_i32_0 : i32, i32
  }
  func.func @transform_4(%arg0: i32) -> (i32, i32) {
    %c0_i32 = arith.constant 0 : i32
    %c0_i32_0 = arith.constant 0 : i32
    return %arg0, %c0_i32 : i32, i32
  }
}

module attributes {stable_mosaic.version = 11 : i64} {
  func.func @_conv3x3x3_bn_relu_kernel(%arg0: i32, %arg1: i32, %arg2: i32, %arg3: memref<1x1x36x9x32xbf16, #tpu.memory_space<vmem>>, %arg4: memref<1x9x32x32xbf16, #tpu.memory_space<vmem>>, %arg5: memref<1x32xf32, #tpu.memory_space<vmem>>, %arg6: memref<1x32xf32, #tpu.memory_space<vmem>>, %arg7: memref<1x1x64x32xbf16, #tpu.memory_space<vmem>>, %arg8: memref<64x32xf32, #tpu.memory_space<vmem>>) attributes {dimension_semantics = [#tpu.dimension_semantics<parallel>, #tpu.dimension_semantics<parallel>, #tpu.dimension_semantics<arbitrary>], iteration_bounds = array<i64: 2, 3, 3>, scalar_prefetch = 0 : i64, scratch_operands = 1 : i64, tpu.core_type = #tpu.core_type<tc>, window_params = [{transform_indices = @transform_0, window_bounds = array<i64: 1, 1, 36, 9, 32>}, {transform_indices = @transform_1, window_bounds = array<i64: 1, 9, 32, 32>}, {pipeline_mode = #tpu.pipeline_mode<synchronous>, transform_indices = @transform_2, window_bounds = array<i64: 1, 32>}, {pipeline_mode = #tpu.pipeline_mode<synchronous>, transform_indices = @transform_3, window_bounds = array<i64: 1, 32>}, {transform_indices = @transform_4, window_bounds = array<i64: 1, 1, 64, 32>}]} {
    %c0_i32 = arith.constant 0 : i32
    %0 = arith.cmpi eq, %arg2, %c0_i32 : i32
    %1 = arith.extui %0 : i1 to i32
    %c0_i32_0 = arith.constant 0 : i32
    %2 = arith.cmpi ne, %1, %c0_i32_0 : i32
    scf.if %2 {
      %cst_82 = arith.constant 0.000000e+00 : f32
      %71 = vector.broadcast %cst_82 : f32 to vector<64x32xf32>
      %c0_83 = arith.constant 0 : index
      %c0_84 = arith.constant 0 : index
      %72 = vector.load %arg8[%c0_83, %c0_84] : memref<64x32xf32, #tpu.memory_space<vmem>>, vector<64x32xf32>
      tpu.vector_store %arg8[%c0_83, %c0_84], %71 {strides = array<i32>} : memref<64x32xf32, #tpu.memory_space<vmem>>, vector<64x32xf32>,
    } else {
    }
    %c0 = arith.constant 0 : index
    %c0_1 = arith.constant 0 : index
    %3 = vector.load %arg8[%c0, %c0_1] : memref<64x32xf32, #tpu.memory_space<vmem>>, vector<64x32xf32>
    %c0_2 = arith.constant 0 : index
    %c0_3 = arith.constant 0 : index
    %c0_4 = arith.constant 0 : index
    %c0_5 = arith.constant 0 : index
    %c0_6 = arith.constant 0 : index
    %4 = vector.load %arg3[%c0_2, %c0_3, %c0_4, %c0_5, %c0_6] : memref<1x1x36x9x32xbf16, #tpu.memory_space<vmem>>, vector<1x1x8x8x32xbf16>
    %5 = vector.shape_cast %4 : vector<1x1x8x8x32xbf16> to vector<8x8x32xbf16>
    %6 = vector.shape_cast %5 : vector<8x8x32xbf16> to vector<64x32xbf16>
    %c0_7 = arith.constant 0 : index
    %c0_8 = arith.constant 0 : index
    %c0_9 = arith.constant 0 : index
    %c0_10 = arith.constant 0 : index
    %7 = vector.load %arg4[%c0_7, %c0_8, %c0_9, %c0_10] : memref<1x9x32x32xbf16, #tpu.memory_space<vmem>>, vector<1x1x32x32xbf16>
    %8 = vector.shape_cast %7 : vector<1x1x32x32xbf16> to vector<32x32xbf16>
    %cst = arith.constant dense<0.000000e+00> : vector<64x32xf32>
    %9 = tpu.matmul %6, %8, %cst {dimension_numbers = #tpu.dot_dimension_numbers<[1], [0], [0], [1], [0, 0, 1, 1], [], []>} : vector<64x32xbf16>, vector<32x32xbf16>, vector<64x32xf32> -> vector<64x32xf32>
    %10 = arith.addf %3, %9 : vector<64x32xf32>
    %c0_11 = arith.constant 0 : index
    %c0_12 = arith.constant 0 : index
    %c9 = arith.constant 9 : index
    %c0_13 = arith.constant 0 : index
    %c0_14 = arith.constant 0 : index
    %11 = vector.load %arg3[%c0_11, %c0_12, %c9, %c0_13, %c0_14] : memref<1x1x36x9x32xbf16, #tpu.memory_space<vmem>>, vector<1x1x8x8x32xbf16>
    %12 = vector.shape_cast %11 : vector<1x1x8x8x32xbf16> to vector<8x8x32xbf16>
    %13 = vector.shape_cast %12 : vector<8x8x32xbf16> to vector<64x32xbf16>
    %c0_15 = arith.constant 0 : index
    %c1 = arith.constant 1 : index
    %c0_16 = arith.constant 0 : index
    %c0_17 = arith.constant 0 : index
    %14 = vector.load %arg4[%c0_15, %c1, %c0_16, %c0_17] : memref<1x9x32x32xbf16, #tpu.memory_space<vmem>>, vector<1x1x32x32xbf16>
    %15 = vector.shape_cast %14 : vector<1x1x32x32xbf16> to vector<32x32xbf16>
    %cst_18 = arith.constant dense<0.000000e+00> : vector<64x32xf32>
    %16 = tpu.matmul %13, %15, %cst_18 {dimension_numbers = #tpu.dot_dimension_numbers<[1], [0], [0], [1], [0, 0, 1, 1], [], []>} : vector<64x32xbf16>, vector<32x32xbf16>, vector<64x32xf32> -> vector<64x32xf32>
    %17 = arith.addf %10, %16 : vector<64x32xf32>
    %c0_19 = arith.constant 0 : index
    %c0_20 = arith.constant 0 : index
    %c0_21 = arith.constant 0 : index
    %c1_22 = arith.constant 1 : index
    %c0_23 = arith.constant 0 : index
    %18 = vector.load %arg3[%c0_19, %c0_20, %c0_21, %c1_22, %c0_23] : memref<1x1x36x9x32xbf16, #tpu.memory_space<vmem>>, vector<1x1x8x8x32xbf16>
    %19 = vector.shape_cast %18 : vector<1x1x8x8x32xbf16> to vector<8x8x32xbf16>
    %20 = vector.shape_cast %19 : vector<8x8x32xbf16> to vector<64x32xbf16>
    %c0_24 = arith.constant 0 : index
    %c2 = arith.constant 2 : index
    %c0_25 = arith.constant 0 : index
    %c0_26 = arith.constant 0 : index
    %21 = vector.load %arg4[%c0_24, %c2, %c0_25, %c0_26] : memref<1x9x32x32xbf16, #tpu.memory_space<vmem>>, vector<1x1x32x32xbf16>
    %22 = vector.shape_cast %21 : vector<1x1x32x32xbf16> to vector<32x32xbf16>
    %cst_27 = arith.constant dense<0.000000e+00> : vector<64x32xf32>
    %23 = tpu.matmul %20, %22, %cst_27 {dimension_numbers = #tpu.dot_dimension_numbers<[1], [0], [0], [1], [0, 0, 1, 1], [], []>} : vector<64x32xbf16>, vector<32x32xbf16>, vector<64x32xf32> -> vector<64x32xf32>
    %24 = arith.addf %17, %23 : vector<64x32xf32>
    %c0_28 = arith.constant 0 : index
    %c0_29 = arith.constant 0 : index
    %c18 = arith.constant 18 : index
    %c0_30 = arith.constant 0 : index
    %c0_31 = arith.constant 0 : index
    %25 = vector.load %arg3[%c0_28, %c0_29, %c18, %c0_30, %c0_31] : memref<1x1x36x9x32xbf16, #tpu.memory_space<vmem>>, vector<1x1x8x8x32xbf16>
    %26 = vector.shape_cast %25 : vector<1x1x8x8x32xbf16> to vector<8x8x32xbf16>
    %27 = vector.shape_cast %26 : vector<8x8x32xbf16> to vector<64x32xbf16>
    %c0_32 = arith.constant 0 : index
    %c3 = arith.constant 3 : index
    %c0_33 = arith.constant 0 : index
    %c0_34 = arith.constant 0 : index
    %28 = vector.load %arg4[%c0_32, %c3, %c0_33, %c0_34] : memref<1x9x32x32xbf16, #tpu.memory_space<vmem>>, vector<1x1x32x32xbf16>
    %29 = vector.shape_cast %28 : vector<1x1x32x32xbf16> to vector<32x32xbf16>
    %cst_35 = arith.constant dense<0.000000e+00> : vector<64x32xf32>
    %30 = tpu.matmul %27, %29, %cst_35 {dimension_numbers = #tpu.dot_dimension_numbers<[1], [0], [0], [1], [0, 0, 1, 1], [], []>} : vector<64x32xbf16>, vector<32x32xbf16>, vector<64x32xf32> -> vector<64x32xf32>
    %31 = arith.addf %24, %30 : vector<64x32xf32>
    %c0_36 = arith.constant 0 : index
    %c0_37 = arith.constant 0 : index
    %c27 = arith.constant 27 : index
    %c0_38 = arith.constant 0 : index
    %c0_39 = arith.constant 0 : index
    %32 = vector.load %arg3[%c0_36, %c0_37, %c27, %c0_38, %c0_39] : memref<1x1x36x9x32xbf16, #tpu.memory_space<vmem>>, vector<1x1x8x8x32xbf16>
    %33 = vector.shape_cast %32 : vector<1x1x8x8x32xbf16> to vector<8x8x32xbf16>
    %34 = vector.shape_cast %33 : vector<8x8x32xbf16> to vector<64x32xbf16>
    %c0_40 = arith.constant 0 : index
    %c4 = arith.constant 4 : index
    %c0_41 = arith.constant 0 : index
    %c0_42 = arith.constant 0 : index
    %35 = vector.load %arg4[%c0_40, %c4, %c0_41, %c0_42] : memref<1x9x32x32xbf16, #tpu.memory_space<vmem>>, vector<1x1x32x32xbf16>
    %36 = vector.shape_cast %35 : vector<1x1x32x32xbf16> to vector<32x32xbf16>
    %cst_43 = arith.constant dense<0.000000e+00> : vector<64x32xf32>
    %37 = tpu.matmul %34, %36, %cst_43 {dimension_numbers = #tpu.dot_dimension_numbers<[1], [0], [0], [1], [0, 0, 1, 1], [], []>} : vector<64x32xbf16>, vector<32x32xbf16>, vector<64x32xf32> -> vector<64x32xf32>
    %38 = arith.addf %31, %37 : vector<64x32xf32>
    %c0_44 = arith.constant 0 : index
    %c0_45 = arith.constant 0 : index
    %c18_46 = arith.constant 18 : index
    %c1_47 = arith.constant 1 : index
    %c0_48 = arith.constant 0 : index
    %39 = vector.load %arg3[%c0_44, %c0_45, %c18_46, %c1_47, %c0_48] : memref<1x1x36x9x32xbf16, #tpu.memory_space<vmem>>, vector<1x1x8x8x32xbf16>
    %40 = vector.shape_cast %39 : vector<1x1x8x8x32xbf16> to vector<8x8x32xbf16>
    %41 = vector.shape_cast %40 : vector<8x8x32xbf16> to vector<64x32xbf16>
    %c0_49 = arith.constant 0 : index
    %c5 = arith.constant 5 : index
    %c0_50 = arith.constant 0 : index
    %c0_51 = arith.constant 0 : index
    %42 = vector.load %arg4[%c0_49, %c5, %c0_50, %c0_51] : memref<1x9x32x32xbf16, #tpu.memory_space<vmem>>, vector<1x1x32x32xbf16>
    %43 = vector.shape_cast %42 : vector<1x1x32x32xbf16> to vector<32x32xbf16>
    %cst_52 = arith.constant dense<0.000000e+00> : vector<64x32xf32>
    %44 = tpu.matmul %41, %43, %cst_52 {dimension_numbers = #tpu.dot_dimension_numbers<[1], [0], [0], [1], [0, 0, 1, 1], [], []>} : vector<64x32xbf16>, vector<32x32xbf16>, vector<64x32xf32> -> vector<64x32xf32>
    %45 = arith.addf %38, %44 : vector<64x32xf32>
    %c0_53 = arith.constant 0 : index
    %c0_54 = arith.constant 0 : index
    %c1_55 = arith.constant 1 : index
    %c0_56 = arith.constant 0 : index
    %c0_57 = arith.constant 0 : index
    %46 = vector.load %arg3[%c0_53, %c0_54, %c1_55, %c0_56, %c0_57] : memref<1x1x36x9x32xbf16, #tpu.memory_space<vmem>>, vector<1x1x8x8x32xbf16>
    %47 = vector.shape_cast %46 : vector<1x1x8x8x32xbf16> to vector<8x8x32xbf16>
    %48 = vector.shape_cast %47 : vector<8x8x32xbf16> to vector<64x32xbf16>
    %c0_58 = arith.constant 0 : index
    %c6 = arith.constant 6 : index
    %c0_59 = arith.constant 0 : index
    %c0_60 = arith.constant 0 : index
    %49 = vector.load %arg4[%c0_58, %c6, %c0_59, %c0_60] : memref<1x9x32x32xbf16, #tpu.memory_space<vmem>>, vector<1x1x32x32xbf16>
    %50 = vector.shape_cast %49 : vector<1x1x32x32xbf16> to vector<32x32xbf16>
    %cst_61 = arith.constant dense<0.000000e+00> : vector<64x32xf32>
    %51 = tpu.matmul %48, %50, %cst_61 {dimension_numbers = #tpu.dot_dimension_numbers<[1], [0], [0], [1], [0, 0, 1, 1], [], []>} : vector<64x32xbf16>, vector<32x32xbf16>, vector<64x32xf32> -> vector<64x32xf32>
    %52 = arith.addf %45, %51 : vector<64x32xf32>
    %c0_62 = arith.constant 0 : index
    %c0_63 = arith.constant 0 : index
    %c10 = arith.constant 10 : index
    %c0_64 = arith.constant 0 : index
    %c0_65 = arith.constant 0 : index
    %53 = vector.load %arg3[%c0_62, %c0_63, %c10, %c0_64, %c0_65] : memref<1x1x36x9x32xbf16, #tpu.memory_space<vmem>>, vector<1x1x8x8x32xbf16>
    %54 = vector.shape_cast %53 : vector<1x1x8x8x32xbf16> to vector<8x8x32xbf16>
    %55 = vector.shape_cast %54 : vector<8x8x32xbf16> to vector<64x32xbf16>
    %c0_66 = arith.constant 0 : index
    %c7 = arith.constant 7 : index
    %c0_67 = arith.constant 0 : index
    %c0_68 = arith.constant 0 : index
    %56 = vector.load %arg4[%c0_66, %c7, %c0_67, %c0_68] : memref<1x9x32x32xbf16, #tpu.memory_space<vmem>>, vector<1x1x32x32xbf16>
    %57 = vector.shape_cast %56 : vector<1x1x32x32xbf16> to vector<32x32xbf16>
    %cst_69 = arith.constant dense<0.000000e+00> : vector<64x32xf32>
    %58 = tpu.matmul %55, %57, %cst_69 {dimension_numbers = #tpu.dot_dimension_numbers<[1], [0], [0], [1], [0, 0, 1, 1], [], []>} : vector<64x32xbf16>, vector<32x32xbf16>, vector<64x32xf32> -> vector<64x32xf32>
    %59 = arith.addf %52, %58 : vector<64x32xf32>
    %c0_70 = arith.constant 0 : index
    %c0_71 = arith.constant 0 : index
    %c1_72 = arith.constant 1 : index
    %c1_73 = arith.constant 1 : index
    %c0_74 = arith.constant 0 : index
    %60 = vector.load %arg3[%c0_70, %c0_71, %c1_72, %c1_73, %c0_74] : memref<1x1x36x9x32xbf16, #tpu.memory_space<vmem>>, vector<1x1x8x8x32xbf16>
    %61 = vector.shape_cast %60 : vector<1x1x8x8x32xbf16> to vector<8x8x32xbf16>
    %62 = vector.shape_cast %61 : vector<8x8x32xbf16> to vector<64x32xbf16>
    %c0_75 = arith.constant 0 : index
    %c8 = arith.constant 8 : index
    %c0_76 = arith.constant 0 : index
    %c0_77 = arith.constant 0 : index
    %63 = vector.load %arg4[%c0_75, %c8, %c0_76, %c0_77] : memref<1x9x32x32xbf16, #tpu.memory_space<vmem>>, vector<1x1x32x32xbf16>
    %64 = vector.shape_cast %63 : vector<1x1x32x32xbf16> to vector<32x32xbf16>
    %cst_78 = arith.constant dense<0.000000e+00> : vector<64x32xf32>
    %65 = tpu.matmul %62, %64, %cst_78 {dimension_numbers = #tpu.dot_dimension_numbers<[1], [0], [0], [1], [0, 0, 1, 1], [], []>} : vector<64x32xbf16>, vector<32x32xbf16>, vector<64x32xf32> -> vector<64x32xf32>
    %66 = arith.addf %59, %65 : vector<64x32xf32>
    %c0_79 = arith.constant 0 : index
    %c0_80 = arith.constant 0 : index
    %67 = vector.load %arg8[%c0_79, %c0_80] : memref<64x32xf32, #tpu.memory_space<vmem>>, vector<64x32xf32>
    tpu.vector_store %arg8[%c0_79, %c0_80], %66 {strides = array<i32>} : memref<64x32xf32, #tpu.memory_space<vmem>>, vector<64x32xf32>,
    %c2_i32 = arith.constant 2 : i32
    %68 = arith.cmpi eq, %arg2, %c2_i32 : i32
    %69 = arith.extui %68 : i1 to i32
    %c0_i32_81 = arith.constant 0 : i32
    %70 = arith.cmpi ne, %69, %c0_i32_81 : i32
    scf.if %70 {
      %c0_82 = arith.constant 0 : index
      %c0_83 = arith.constant 0 : index
      %71 = vector.load %arg5[%c0_82, %c0_83] : memref<1x32xf32, #tpu.memory_space<vmem>>, vector<1x32xf32>
      %72 = vector.broadcast %71 : vector<1x32xf32> to vector<64x32xf32>
      %73 = arith.mulf %66, %72 : vector<64x32xf32>
      %c0_84 = arith.constant 0 : index
      %c0_85 = arith.constant 0 : index
      %74 = vector.load %arg6[%c0_84, %c0_85] : memref<1x32xf32, #tpu.memory_space<vmem>>, vector<1x32xf32>
      %75 = vector.broadcast %74 : vector<1x32xf32> to vector<64x32xf32>
      %76 = arith.addf %73, %75 : vector<64x32xf32>
      %cst_86 = arith.constant 0.000000e+00 : f32
      %77 = vector.broadcast %cst_86 : f32 to vector<64x32xf32>
      %78 = arith.maximumf %76, %77 : vector<64x32xf32>
      %79 = arith.truncf %78 : vector<64x32xf32> to vector<64x32xbf16>
      %c0_87 = arith.constant 0 : index
      %c0_88 = arith.constant 0 : index
      %c0_89 = arith.constant 0 : index
      %c0_90 = arith.constant 0 : index
      %80 = vector.load %arg7[%c0_87, %c0_88, %c0_89, %c0_90] : memref<1x1x64x32xbf16, #tpu.memory_space<vmem>>, vector<1x1x64x32xbf16>
      %81 = vector.shape_cast %80 : vector<1x1x64x32xbf16> to vector<64x32xbf16>
      %82 = vector.shape_cast %79 : vector<64x32xbf16> to vector<1x1x64x32xbf16>
      tpu.vector_store %arg7[%c0_87, %c0_88, %c0_89, %c0_90], %82 {strides = array<i32>} : memref<1x1x64x32xbf16, #tpu.memory_space<vmem>>, vector<1x1x64x32xbf16>,
    } else {
    }
    return
  }
  func.func @transform_0(%arg0: i32, %arg1: i32, %arg2: i32) -> (i32, i32, i32, i32, i32) {
    %c2_i32 = arith.constant 2 : i32
    %0 = arith.muli %arg1, %c2_i32 : i32
    %1 = arith.addi %0, %arg2 : i32
    %c0_i32 = arith.constant 0 : i32
    %c0_i32_0 = arith.constant 0 : i32
    %c0_i32_1 = arith.constant 0 : i32
    %c0_i32_2 = arith.constant 0 : i32
    return %arg0, %1, %c0_i32, %c0_i32_0, %c0_i32_1 : i32, i32, i32, i32, i32
  }
  func.func @transform_1(%arg0: i32, %arg1: i32, %arg2: i32) -> (i32, i32, i32, i32) {
    %c0_i32 = arith.constant 0 : i32
    %c0_i32_0 = arith.constant 0 : i32
    %c0_i32_1 = arith.constant 0 : i32
    %c0_i32_2 = arith.constant 0 : i32
    return %arg2, %c0_i32, %c0_i32_0, %c0_i32_1 : i32, i32, i32, i32
  }
  func.func @transform_2(%arg0: i32, %arg1: i32, %arg2: i32) -> (i32, i32) {
    %c0_i32 = arith.constant 0 : i32
    %c0_i32_0 = arith.constant 0 : i32
    %c0_i32_1 = arith.constant 0 : i32
    return %c0_i32, %c0_i32_0 : i32, i32
  }
  func.func @transform_3(%arg0: i32, %arg1: i32, %arg2: i32) -> (i32, i32) {
    %c0_i32 = arith.constant 0 : i32
    %c0_i32_0 = arith.constant 0 : i32
    %c0_i32_1 = arith.constant 0 : i32
    return %c0_i32, %c0_i32_0 : i32, i32
  }
  func.func @transform_4(%arg0: i32, %arg1: i32, %arg2: i32) -> (i32, i32, i32, i32) {
    %c0_i32 = arith.constant 0 : i32
    %c0_i32_0 = arith.constant 0 : i32
    %c0_i32_1 = arith.constant 0 : i32
    return %arg0, %arg1, %c0_i32, %c0_i32_0 : i32, i32, i32, i32
  }
}

module attributes {stable_mosaic.version = 11 : i64} {
  func.func @_mm_bn_add_relu_kernel(%arg0: i32, %arg1: memref<128x32xbf16, #tpu.memory_space<vmem>>, %arg2: memref<32x128xbf16, #tpu.memory_space<vmem>>, %arg3: memref<1x128xf32, #tpu.memory_space<vmem>>, %arg4: memref<1x128xf32, #tpu.memory_space<vmem>>, %arg5: memref<128x128xbf16, #tpu.memory_space<vmem>>, %arg6: memref<128x128xf32, #tpu.memory_space<vmem>>) attributes {dimension_semantics = [#tpu.dimension_semantics<parallel>], iteration_bounds = array<i64: 3>, scalar_prefetch = 0 : i64, scratch_operands = 0 : i64, tpu.core_type = #tpu.core_type<tc>, window_params = [{transform_indices = @transform_0, window_bounds = array<i64: 128, 32>}, {pipeline_mode = #tpu.pipeline_mode<synchronous>, transform_indices = @transform_1, window_bounds = array<i64: 32, 128>}, {pipeline_mode = #tpu.pipeline_mode<synchronous>, transform_indices = @transform_2, window_bounds = array<i64: 1, 128>}, {pipeline_mode = #tpu.pipeline_mode<synchronous>, transform_indices = @transform_3, window_bounds = array<i64: 1, 128>}, {transform_indices = @transform_4, window_bounds = array<i64: 128, 128>}, {transform_indices = @transform_5, window_bounds = array<i64: 128, 128>}]} {
    %c0 = arith.constant 0 : index
    %c0_0 = arith.constant 0 : index
    %0 = vector.load %arg1[%c0, %c0_0] : memref<128x32xbf16, #tpu.memory_space<vmem>>, vector<128x32xbf16>
    %c0_1 = arith.constant 0 : index
    %c0_2 = arith.constant 0 : index
    %1 = vector.load %arg2[%c0_1, %c0_2] : memref<32x128xbf16, #tpu.memory_space<vmem>>, vector<32x128xbf16>
    %cst = arith.constant dense<0.000000e+00> : vector<128x128xf32>
    %2 = tpu.matmul %0, %1, %cst {dimension_numbers = #tpu.dot_dimension_numbers<[1], [0], [0], [1], [0, 0, 1, 1], [], []>} : vector<128x32xbf16>, vector<32x128xbf16>, vector<128x128xf32> -> vector<128x128xf32>
    %c0_3 = arith.constant 0 : index
    %c0_4 = arith.constant 0 : index
    %3 = vector.load %arg3[%c0_3, %c0_4] : memref<1x128xf32, #tpu.memory_space<vmem>>, vector<1x128xf32>
    %4 = vector.broadcast %3 : vector<1x128xf32> to vector<128x128xf32>
    %5 = arith.mulf %2, %4 : vector<128x128xf32>
    %c0_5 = arith.constant 0 : index
    %c0_6 = arith.constant 0 : index
    %6 = vector.load %arg4[%c0_5, %c0_6] : memref<1x128xf32, #tpu.memory_space<vmem>>, vector<1x128xf32>
    %7 = vector.broadcast %6 : vector<1x128xf32> to vector<128x128xf32>
    %8 = arith.addf %5, %7 : vector<128x128xf32>
    %c0_7 = arith.constant 0 : index
    %c0_8 = arith.constant 0 : index
    %9 = vector.load %arg5[%c0_7, %c0_8] : memref<128x128xbf16, #tpu.memory_space<vmem>>, vector<128x128xbf16>
    %10 = arith.extf %9 : vector<128x128xbf16> to vector<128x128xf32>
    %11 = arith.addf %8, %10 : vector<128x128xf32>
    %cst_9 = arith.constant 0.000000e+00 : f32
    %12 = vector.broadcast %cst_9 : f32 to vector<128x128xf32>
    %13 = arith.maximumf %11, %12 : vector<128x128xf32>
    %c0_10 = arith.constant 0 : index
    %c0_11 = arith.constant 0 : index
    %14 = vector.load %arg6[%c0_10, %c0_11] : memref<128x128xf32, #tpu.memory_space<vmem>>, vector<128x128xf32>
    tpu.vector_store %arg6[%c0_10, %c0_11], %13 {strides = array<i32>} : memref<128x128xf32, #tpu.memory_space<vmem>>, vector<128x128xf32>,
    return
  }
  func.func @transform_0(%arg0: i32) -> (i32, i32) {
    %c0_i32 = arith.constant 0 : i32
    %c0_i32_0 = arith.constant 0 : i32
    return %arg0, %c0_i32 : i32, i32
  }
  func.func @transform_1(%arg0: i32) -> (i32, i32) {
    %c0_i32 = arith.constant 0 : i32
    %c0_i32_0 = arith.constant 0 : i32
    %c0_i32_1 = arith.constant 0 : i32
    return %c0_i32, %c0_i32_0 : i32, i32
  }
  func.func @transform_2(%arg0: i32) -> (i32, i32) {
    %c0_i32 = arith.constant 0 : i32
    %c0_i32_0 = arith.constant 0 : i32
    %c0_i32_1 = arith.constant 0 : i32
    return %c0_i32, %c0_i32_0 : i32, i32
  }
  func.func @transform_3(%arg0: i32) -> (i32, i32) {
    %c0_i32 = arith.constant 0 : i32
    %c0_i32_0 = arith.constant 0 : i32
    %c0_i32_1 = arith.constant 0 : i32
    return %c0_i32, %c0_i32_0 : i32, i32
  }
  func.func @transform_4(%arg0: i32) -> (i32, i32) {
    %c0_i32 = arith.constant 0 : i32
    %c0_i32_0 = arith.constant 0 : i32
    return %arg0, %c0_i32 : i32, i32
  }
  func.func @transform_5(%arg0: i32) -> (i32, i32) {
    %c0_i32 = arith.constant 0 : i32
    %c0_i32_0 = arith.constant 0 : i32
    return %arg0, %c0_i32 : i32, i32
  }
}

module attributes {stable_mosaic.version = 11 : i64} {
  func.func @_mm_bn_act_kernel(%arg0: i32, %arg1: memref<128x64xbf16, #tpu.memory_space<vmem>>, %arg2: memref<64x128xbf16, #tpu.memory_space<vmem>>, %arg3: memref<1x128xf32, #tpu.memory_space<vmem>>, %arg4: memref<1x128xf32, #tpu.memory_space<vmem>>, %arg5: memref<128x128xbf16, #tpu.memory_space<vmem>>) attributes {dimension_semantics = [#tpu.dimension_semantics<parallel>], iteration_bounds = array<i64: 3>, scalar_prefetch = 0 : i64, scratch_operands = 0 : i64, tpu.core_type = #tpu.core_type<tc>, window_params = [{transform_indices = @transform_0, window_bounds = array<i64: 128, 64>}, {pipeline_mode = #tpu.pipeline_mode<synchronous>, transform_indices = @transform_1, window_bounds = array<i64: 64, 128>}, {pipeline_mode = #tpu.pipeline_mode<synchronous>, transform_indices = @transform_2, window_bounds = array<i64: 1, 128>}, {pipeline_mode = #tpu.pipeline_mode<synchronous>, transform_indices = @transform_3, window_bounds = array<i64: 1, 128>}, {transform_indices = @transform_4, window_bounds = array<i64: 128, 128>}]} {
    %c0 = arith.constant 0 : index
    %c0_0 = arith.constant 0 : index
    %0 = vector.load %arg1[%c0, %c0_0] : memref<128x64xbf16, #tpu.memory_space<vmem>>, vector<128x64xbf16>
    %c0_1 = arith.constant 0 : index
    %c0_2 = arith.constant 0 : index
    %1 = vector.load %arg2[%c0_1, %c0_2] : memref<64x128xbf16, #tpu.memory_space<vmem>>, vector<64x128xbf16>
    %cst = arith.constant dense<0.000000e+00> : vector<128x128xf32>
    %2 = tpu.matmul %0, %1, %cst {dimension_numbers = #tpu.dot_dimension_numbers<[1], [0], [0], [1], [0, 0, 1, 1], [], []>} : vector<128x64xbf16>, vector<64x128xbf16>, vector<128x128xf32> -> vector<128x128xf32>
    %c0_3 = arith.constant 0 : index
    %c0_4 = arith.constant 0 : index
    %3 = vector.load %arg3[%c0_3, %c0_4] : memref<1x128xf32, #tpu.memory_space<vmem>>, vector<1x128xf32>
    %4 = vector.broadcast %3 : vector<1x128xf32> to vector<128x128xf32>
    %5 = arith.mulf %2, %4 : vector<128x128xf32>
    %c0_5 = arith.constant 0 : index
    %c0_6 = arith.constant 0 : index
    %6 = vector.load %arg4[%c0_5, %c0_6] : memref<1x128xf32, #tpu.memory_space<vmem>>, vector<1x128xf32>
    %7 = vector.broadcast %6 : vector<1x128xf32> to vector<128x128xf32>
    %8 = arith.addf %5, %7 : vector<128x128xf32>
    %9 = arith.truncf %8 : vector<128x128xf32> to vector<128x128xbf16>
    %c0_7 = arith.constant 0 : index
    %c0_8 = arith.constant 0 : index
    %10 = vector.load %arg5[%c0_7, %c0_8] : memref<128x128xbf16, #tpu.memory_space<vmem>>, vector<128x128xbf16>
    tpu.vector_store %arg5[%c0_7, %c0_8], %9 {strides = array<i32>} : memref<128x128xbf16, #tpu.memory_space<vmem>>, vector<128x128xbf16>,
    return
  }
  func.func @transform_0(%arg0: i32) -> (i32, i32) {
    %c0_i32 = arith.constant 0 : i32
    %c0_i32_0 = arith.constant 0 : i32
    return %arg0, %c0_i32 : i32, i32
  }
  func.func @transform_1(%arg0: i32) -> (i32, i32) {
    %c0_i32 = arith.constant 0 : i32
    %c0_i32_0 = arith.constant 0 : i32
    %c0_i32_1 = arith.constant 0 : i32
    return %c0_i32, %c0_i32_0 : i32, i32
  }
  func.func @transform_2(%arg0: i32) -> (i32, i32) {
    %c0_i32 = arith.constant 0 : i32
    %c0_i32_0 = arith.constant 0 : i32
    %c0_i32_1 = arith.constant 0 : i32
    return %c0_i32, %c0_i32_0 : i32, i32
  }
  func.func @transform_3(%arg0: i32) -> (i32, i32) {
    %c0_i32 = arith.constant 0 : i32
    %c0_i32_0 = arith.constant 0 : i32
    %c0_i32_1 = arith.constant 0 : i32
    return %c0_i32, %c0_i32_0 : i32, i32
  }
  func.func @transform_4(%arg0: i32) -> (i32, i32) {
    %c0_i32 = arith.constant 0 : i32
    %c0_i32_0 = arith.constant 0 : i32
    return %arg0, %c0_i32 : i32, i32
  }
}

</mosaic_0001>

<bundles_post_ra>
// kernel: bottleneck3d_forward.4
= control target key start
LH: loop header
LB: loop body
LE: loop exit
PB: predicated region body
PF: predicated region fallthrough
CT: control target
= control target key end

     0   :  { %s3239_s15 = smov 0   ;;  %s3939_s0 = inlined_call_operand.vmem [shape: bf16[3072,64], index: 0, kind: input, shape index: {}]   ;;  %s3940_s1 = inlined_call_operand.vmem [shape: bf16[64,32], index: 1, kind: input, shape index: {}]   ;;  %s3941_s2 = inlined_call_operand.vmem [shape: f32[1,32], index: 2, kind: input, shape index: {}]   ;;  %s3942_s3 = inlined_call_operand.vmem [shape: f32[1,32], index: 3, kind: input, shape index: {}]   ;;  %s3943_s4 = inlined_call_operand.vmem [shape: bf16[3072,32], index: 4, kind: output, shape index: {}]  }
   0x1 LB: > { %s2515_s16 = sadd.s32 4294967295, %s3212_s15   ;;  %p2519_p0 = scmp.ge.s32.totalorder %s3212_s15, 1  ;;  %s3212_s15 = sphi %s3239_s15, %s14_s15  }
   0x2   : > { %p163_p1 = scmp.lt.s32.totalorder %s3212_s15, 4 }
   0x4   : > { %p164_p2 = pnand %p2519_p0, %p163_p1 }
   0x5   : > { %s2520_s19 = sshll.u32 (!%p164_p2), %s2515_s16, 7 }
   0x6   : > { %167 = sbr.rel (%p164_p2) target bundleno = 365 (0x16d), region = 36  ;;  %p190_p3 = scmp.lt.s32.totalorder (!%p164_p2), %s2520_s19, 383 }
   0xb   : > { %v3136_v0 = vld [vmem:[%s3940_s1 + $0x18] sm:$0xff]   ;;  %v3137_v1 = vld [vmem:[%s3940_s1 + $0x10] sm:$0xff]   ;;  %s3945_s19 = smov (!%p190_p3, %s2520_s19), 383  ;;  %v3138_v2 = vld [vmem:[%s3940_s1 + $0x8] sm:$0xff]   ;;  %vm682_vm0 = vcmask 523264   ;;  %vm2330_vm1 = vcmask 257024  }
   0xc   : > { %2984 = vmatprep.subr.bf16.mxu0 %v3136_v0  ;;  %3120 = vmatprep.subr.bf16.mxu1 %v3136_v0  ;;  %s2521_s24 = sshll.u32 %s3945_s19, 2  ;;  %v3139_v3 = vld [vmem:[%s3940_s1] sm:$0xff]  }
   0xd   : > { %2985 = vmatpush3.bf16.msra.mxu0 %v3136_v0  ;;  %3124 = vmatpush3.bf16.msra.mxu1 %v3136_v0  ;;  %s3267_s29 = scalar_lea.vmem %s3939_s0, %s2521_s24  ;;  %s3420_s10 = scalar_lea.vmem %s3943_s4, %s2521_s24 }
   0xe   : > { %2986 = vmatprep.subr.bf16.mxu0 %v3137_v1  ;;  %3121 = vmatprep.subr.bf16.mxu1 %v3137_v1  ;;  %v3140_v4 = vld [vmem:[%s3267_s29] sm:$0xff]   ;;  %v3142_v6 = vld [vmem:[%s3267_s29 + $0x8] sm:$0xff]   ;;  %v3144_v8 = vld [vmem:[%s3267_s29 + $0x10] sm:$0xff]  }
   0xf   : > { %v3141_v5 = vld [vmem:[%s3267_s29 + $0x100] sm:$0xff]   ;;  %2992 = vmatprep.mubr.msk.bf16.mxu0 %vm682_vm0, %v3140_v4  ;;  %v3143_v7 = vld [vmem:[%s3267_s29 + $0x108] sm:$0xff]   ;;  %v3145_v9 = vld [vmem:[%s3267_s29 + $0x110] sm:$0xff]  }
  0x10   : > { %3056 = vmatprep.mubr.msk.bf16.mxu1 %vm682_vm0, %v3141_v5  ;;  %v3146_v10 = vld [vmem:[%s3267_s29 + $0x18] sm:$0xff]   ;;  %v3148_v12 = vld [vmem:[%s3267_s29 + $0x20] sm:$0xff]   ;;  %v3150_v14 = vld [vmem:[%s3267_s29 + $0x28] sm:$0xff]  }
  0x11   : > { %2987 = vmatpush3.bf16.msra.mxu0 %v3137_v1  ;;  %3125 = vmatpush3.bf16.msra.mxu1 %v3137_v1  ;;  %v3147_v11 = vld [vmem:[%s3267_s29 + $0x118] sm:$0xff]   ;;  %v3149_v13 = vld [vmem:[%s3267_s29 + $0x120] sm:$0xff]   ;;  %v3151_v15 = vld [vmem:[%s3267_s29 + $0x128] sm:$0xff]  }
  0x12   : > { %2988 = vmatprep.subr.bf16.mxu0 %v3138_v2  ;;  %3122 = vmatprep.subr.bf16.mxu1 %v3138_v2  ;;  %v3152_v16 = vld [vmem:[%s3267_s29 + $0x30] sm:$0xff]   ;;  %v3154_v18 = vld [vmem:[%s3267_s29 + $0x38] sm:$0xff]   ;;  %v3156_v20 = vld [vmem:[%s3267_s29 + $0x40] sm:$0xff]  }
  0x13   : > { %v3153_v17 = vld [vmem:[%s3267_s29 + $0x130] sm:$0xff]   ;;  %v3155_v19 = vld [vmem:[%s3267_s29 + $0x138] sm:$0xff]   ;;  %v3157_v21 = vld [vmem:[%s3267_s29 + $0x140] sm:$0xff]  }
  0x14   : > { %v3158_v22 = vld [vmem:[%s3267_s29 + $0x48] sm:$0xff]   ;;  %v3160_v24 = vld [vmem:[%s3267_s29 + $0x50] sm:$0xff]   ;;  %v3162_v26 = vld [vmem:[%s3267_s29 + $0x58] sm:$0xff]  }
  0x15   : > { %2989 = vmatpush3.bf16.msra.mxu0 %v3138_v2  ;;  %3126 = vmatpush3.bf16.msra.mxu1 %v3138_v2  ;;  %v3159_v23 = vld [vmem:[%s3267_s29 + $0x148] sm:$0xff]   ;;  %v3161_v25 = vld [vmem:[%s3267_s29 + $0x150] sm:$0xff]   ;;  %v3163_v27 = vld [vmem:[%s3267_s29 + $0x158] sm:$0xff]  }
  0x16   : > { %2990 = vmatprep.subr.bf16.mxu0 %v3139_v3  ;;  %3123 = vmatprep.subr.bf16.mxu1 %v3139_v3  ;;  %v3164_v28 = vld [vmem:[%s3267_s29 + $0x60] sm:$0xff]   ;;  %v3166_v30 = vld [vmem:[%s3267_s29 + $0x68] sm:$0xff]   ;;  %v3168_v32 = vld [vmem:[%s3267_s29 + $0x70] sm:$0xff]  }
  0x17   : > { %v3165_v29 = vld [vmem:[%s3267_s29 + $0x160] sm:$0xff]   ;;  %v3167_v31 = vld [vmem:[%s3267_s29 + $0x168] sm:$0xff]   ;;  %v3169_v33 = vld [vmem:[%s3267_s29 + $0x170] sm:$0xff]  }
  0x18   : > { %v3170_v34 = vld [vmem:[%s3267_s29 + $0x78] sm:$0xff]   ;;  %v3172_v36 = vld [vmem:[%s3267_s29 + $0x80] sm:$0xff]   ;;  %v3174_v38 = vld [vmem:[%s3267_s29 + $0x88] sm:$0xff]  }
  0x19   : > { %2991 = vmatpush3.bf16.msra.mxu0 %v3139_v3  ;;  %3127 = vmatpush3.bf16.msra.mxu1 %v3139_v3  ;;  %v3171_v35 = vld [vmem:[%s3267_s29 + $0x178] sm:$0xff]   ;;  %v3173_v37 = vld [vmem:[%s3267_s29 + $0x180] sm:$0xff]   ;;  %v3175_v39 = vld [vmem:[%s3267_s29 + $0x188] sm:$0xff]  }
  0x1a   : > { %v3176_v40 = vld [vmem:[%s3267_s29 + $0x90] sm:$0xff]   ;;  %v3178_v42 = vld [vmem:[%s3267_s29 + $0x98] sm:$0xff]   ;;  %v3180_v44 = vld [vmem:[%s3267_s29 + $0xa0] sm:$0xff]  }
  0x1b   : > { %v3177_v41 = vld [vmem:[%s3267_s29 + $0x190] sm:$0xff]   ;;  %v3179_v43 = vld [vmem:[%s3267_s29 + $0x198] sm:$0xff]   ;;  %v3181_v45 = vld [vmem:[%s3267_s29 + $0x1a0] sm:$0xff]  }
  0x1c   : > { %2993 = vmatmul.mubr.msk.bf16.vlgmr.msra.gmra.mxu0 %vm682_vm0, %v3142_v6  ;;  %3057 = vmatmul.mubr.msk.bf16.vlgmr.msra.gmra.mxu1 %vm682_vm0, %v3143_v7  ;;  %v3182_v46 = vld [vmem:[%s3267_s29 + $0xa8] sm:$0xff]   ;;  %v3184_v48 = vld [vmem:[%s3267_s29 + $0xb0] sm:$0xff]   ;;  %v3186_v50 = vld [vmem:[%s3267_s29 + $0xb8] sm:$0xff]  }
  0x1d   : > { %2996 = vmatprep.mubr.msk.bf16.mxu0 %vm682_vm0, %v3144_v8  ;;  %3060 = vmatprep.mubr.msk.bf16.mxu1 %vm682_vm0, %v3145_v9  ;;  %v3183_v47 = vld [vmem:[%s3267_s29 + $0x1a8] sm:$0xff]   ;;  %v3185_v49 = vld [vmem:[%s3267_s29 + $0x1b0] sm:$0xff]   ;;  %v3187_v51 = vld [vmem:[%s3267_s29 + $0x1b8] sm:$0xff]  }
  0x1e   : > { %v3188_v52 = vld [vmem:[%s3267_s29 + $0xc0] sm:$0xff]   ;;  %v3190_v54 = vld [vmem:[%s3267_s29 + $0xc8] sm:$0xff]   ;;  %v3192_v56 = vld [vmem:[%s3267_s29 + $0xd0] sm:$0xff]  }
  0x1f   : > { %v3189_v53 = vld [vmem:[%s3267_s29 + $0x1c0] sm:$0xff]   ;;  %v3191_v55 = vld [vmem:[%s3267_s29 + $0x1c8] sm:$0xff]   ;;  %v3193_v57 = vld [vmem:[%s3267_s29 + $0x1d0] sm:$0xff]  }
  0x20   : > { %v3194_v58 = vld [vmem:[%s3267_s29 + $0xd8] sm:$0xff]   ;;  %v3196_v60 = vld [vmem:[%s3267_s29 + $0xe0] sm:$0xff]   ;;  %v3198_v62 = vld [vmem:[%s3267_s29 + $0xe8] sm:$0xff]  }
  0x21   : > { %v3195_v59 = vld [vmem:[%s3267_s29 + $0x1d8] sm:$0xff]   ;;  %v3197_v61 = vld [vmem:[%s3267_s29 + $0x1e0] sm:$0xff]   ;;  %v3199_v63 = vld [vmem:[%s3267_s29 + $0x1e8] sm:$0xff]  }
  0x22   : > { %v3200_v0 = vld [vmem:[%s3267_s29 + $0xf0] sm:$0xff]   ;;  %v3202_v2 = vld [vmem:[%s3267_s29 + $0xf8] sm:$0xff]   ;;  %v3400_v4 = vld [vmem:[%s3941_s2] ss:$0 sm:$0xff] }
  0x23   : > { %v3201_v1 = vld [vmem:[%s3267_s29 + $0x1f0] sm:$0xff]   ;;  %v3203_v3 = vld [vmem:[%s3267_s29 + $0x1f8] sm:$0xff]   ;;  %v3405_v6 = vld [vmem:[%s3942_s3] ss:$0 sm:$0xff] }
  0x24   : > { %2997 = vmatmul.mubr.msk.bf16.gmra.mxu0 %vm682_vm0, %v3146_v10  ;;  %3061 = vmatmul.mubr.msk.bf16.gmra.mxu1 %vm682_vm0, %v3147_v11 }
  0x25   : > { %3000 = vmatprep.mubr.msk.bf16.mxu0 %vm682_vm0, %v3148_v12  ;;  %3064 = vmatprep.mubr.msk.bf16.mxu1 %vm682_vm0, %v3149_v13 }
  0x2c   : > { %3001 = vmatmul.mubr.msk.bf16.gmra.mxu0 %vm682_vm0, %v3150_v14  ;;  %3065 = vmatmul.mubr.msk.bf16.gmra.mxu1 %vm682_vm0, %v3151_v15 }
  0x2d   : > { %3004 = vmatprep.mubr.msk.bf16.mxu0 %vm682_vm0, %v3152_v16  ;;  %3068 = vmatprep.mubr.msk.bf16.mxu1 %vm682_vm0, %v3153_v17 }
  0x34   : > { %3005 = vmatmul.mubr.msk.bf16.gmra.mxu0 %vm682_vm0, %v3154_v18  ;;  %3069 = vmatmul.mubr.msk.bf16.gmra.mxu1 %vm682_vm0, %v3155_v19 }
  0x35   : > { %3008 = vmatprep.mubr.msk.bf16.mxu0 %vm682_vm0, %v3156_v20  ;;  %3072 = vmatprep.mubr.msk.bf16.mxu1 %vm682_vm0, %v3157_v21 }
  0x3c   : > { %3009 = vmatmul.mubr.msk.bf16.gmra.mxu0 %vm682_vm0, %v3158_v22  ;;  %3073 = vmatmul.mubr.msk.bf16.gmra.mxu1 %vm682_vm0, %v3159_v23 }
  0x3d   : > { %3012 = vmatprep.mubr.msk.bf16.mxu0 %vm682_vm0, %v3160_v24  ;;  %3076 = vmatprep.mubr.msk.bf16.mxu1 %vm682_vm0, %v3161_v25 }
  0x44   : > { %3013 = vmatmul.mubr.msk.bf16.gmra.mxu0 %vm682_vm0, %v3162_v26  ;;  %3077 = vmatmul.mubr.msk.bf16.gmra.mxu1 %vm682_vm0, %v3163_v27 }
  0x45   : > { %3016 = vmatprep.mubr.msk.bf16.mxu0 %vm682_vm0, %v3164_v28  ;;  %3080 = vmatprep.mubr.msk.bf16.mxu1 %vm682_vm0, %v3165_v29 }
  0x4c   : > { %3017 = vmatmul.mubr.msk.bf16.gmra.mxu0 %vm682_vm0, %v3166_v30  ;;  %3081 = vmatmul.mubr.msk.bf16.gmra.mxu1 %vm682_vm0, %v3167_v31 }
  0x4d   : > { %3020 = vmatprep.mubr.msk.bf16.mxu0 %vm682_vm0, %v3168_v32  ;;  %3084 = vmatprep.mubr.msk.bf16.mxu1 %vm682_vm0, %v3169_v33 }
  0x54   : > { %3021 = vmatmul.mubr.msk.bf16.gmra.mxu0 %vm682_vm0, %v3170_v34  ;;  %3085 = vmatmul.mubr.msk.bf16.gmra.mxu1 %vm682_vm0, %v3171_v35 }
  0x55   : > { %3024 = vmatprep.mubr.msk.bf16.mxu0 %vm682_vm0, %v3172_v36  ;;  %3088 = vmatprep.mubr.msk.bf16.mxu1 %vm682_vm0, %v3173_v37 }
  0x5c   : > { %3025 = vmatmul.mubr.msk.bf16.gmra.mxu0 %vm682_vm0, %v3174_v38  ;;  %3089 = vmatmul.mubr.msk.bf16.gmra.mxu1 %vm682_vm0, %v3175_v39 }
  0x5d   : > { %3028 = vmatprep.mubr.msk.bf16.mxu0 %vm682_vm0, %v3176_v40  ;;  %3092 = vmatprep.mubr.msk.bf16.mxu1 %vm682_vm0, %v3177_v41 }
  0x64   : > { %3029 = vmatmul.mubr.msk.bf16.gmra.mxu0 %vm682_vm0, %v3178_v42  ;;  %3093 = vmatmul.mubr.msk.bf16.gmra.mxu1 %vm682_vm0, %v3179_v43 }
  0x65   : > { %3032 = vmatprep.mubr.msk.bf16.mxu0 %vm682_vm0, %v3180_v44  ;;  %3096 = vmatprep.mubr.msk.bf16.mxu1 %vm682_vm0, %v3181_v45 }
  0x6c   : > { %3033 = vmatmul.mubr.msk.bf16.gmra.mxu0 %vm682_vm0, %v3182_v46  ;;  %3097 = vmatmul.mubr.msk.bf16.gmra.mxu1 %vm682_vm0, %v3183_v47 }
  0x6d   : > { %3036 = vmatprep.mubr.msk.bf16.mxu0 %vm682_vm0, %v3184_v48  ;;  %3100 = vmatprep.mubr.msk.bf16.mxu1 %vm682_vm0, %v3185_v49 }
  0x74   : > { %3037 = vmatmul.mubr.msk.bf16.gmra.mxu0 %vm682_vm0, %v3186_v50  ;;  %3101 = vmatmul.mubr.msk.bf16.gmra.mxu1 %vm682_vm0, %v3187_v51 }
  0x75   : > { %3040 = vmatprep.mubr.msk.bf16.mxu0 %vm682_vm0, %v3188_v52  ;;  %3104 = vmatprep.mubr.msk.bf16.mxu1 %vm682_vm0, %v3189_v53 }
  0x7c   : > { %3041 = vmatmul.mubr.msk.bf16.gmra.mxu0 %vm682_vm0, %v3190_v54  ;;  %3105 = vmatmul.mubr.msk.bf16.gmra.mxu1 %vm682_vm0, %v3191_v55 }
  0x7d   : > { %3044 = vmatprep.mubr.msk.bf16.mxu0 %vm682_vm0, %v3192_v56  ;;  %3108 = vmatprep.mubr.msk.bf16.mxu1 %vm682_vm0, %v3193_v57 }
  0x84   : > { %3045 = vmatmul.mubr.msk.bf16.gmra.mxu0 %vm682_vm0, %v3194_v58  ;;  %3109 = vmatmul.mubr.msk.bf16.gmra.mxu1 %vm682_vm0, %v3195_v59 }
  0x85   : > { %3048 = vmatprep.mubr.msk.bf16.mxu0 %vm682_vm0, %v3196_v60  ;;  %3112 = vmatprep.mubr.msk.bf16.mxu1 %vm682_vm0, %v3197_v61 }
  0x8c   : > { %3049 = vmatmul.mubr.msk.bf16.gmra.mxu0 %vm682_vm0, %v3198_v62  ;;  %3113 = vmatmul.mubr.msk.bf16.gmra.mxu1 %vm682_vm0, %v3199_v63 }
  0x8d   : > { %3052 = vmatprep.mubr.msk.bf16.mxu0 %vm682_vm0, %v3200_v0  ;;  %3116 = vmatprep.mubr.msk.bf16.mxu1 %vm682_vm0, %v3201_v1 }
  0x94   : > { %3053 = vmatmul.mubr.msk.bf16.gmra.mxu0 %vm682_vm0, %v3202_v2  ;;  %3117 = vmatmul.mubr.msk.bf16.gmra.mxu1 %vm682_vm0, %v3203_v3 }
  0xdc   : > { %v2994_v5 = vpop.f32.mrf.mxu0  ;;  %v3058_v7 = vpop.f32.mrf.mxu1 }
  0xdd   : > { %v1429_v8 = vmul.f32 %v2994_v5, %v3400_v4  ;;  %v1493_v9 = vmul.f32 %v3058_v7, %v3400_v4 }
  0xde   : > { %v909_v10 = vpop.f32.mrf.mxu0  ;;  %v1165_v11 = vpop.f32.mrf.mxu1 }
  0xdf   : > { %v1564_v12 = vadd.f32 %v3405_v6, %v1429_v8  ;;  %v1628_v13 = vadd.f32 %v3405_v6, %v1493_v9  ;;  %v1427_v14 = vmul.f32 %v3400_v4, %v909_v10  ;;  %v1491_v15 = vmul.f32 %v3400_v4, %v1165_v11 }
  0xe0   : > { %v2995_v16 = vpop.f32.mrf.mxu0  ;;  %v3059_v17 = vpop.f32.mrf.mxu1 }
  0xe1   : > { %v1692_v18 = vmax.f32 %v1564_v12, 0.0  ;;  %v1756_v19 = vmax.f32 %v1628_v13, 0.0  ;;  %v1562_v20 = vadd.f32 %v3405_v6, %v1427_v14  ;;  %v1626_v21 = vadd.f32 %v3405_v6, %v1491_v15 }
  0xe2   : > { %v1430_v22 = vmul.f32 %v2995_v16, %v3400_v4  ;;  %v1494_v23 = vmul.f32 %v3059_v17, %v3400_v4  ;;  %v912_v24 = vpop.f32.mrf.mxu0  ;;  %v1168_v25 = vpop.f32.mrf.mxu1 }
  0xe3   : > { %v2790_v26 = vpack.c.bf16 %v1692_v18, %v1692_v18  ;;  %v2854_v27 = vpack.c.bf16 %v1756_v19, %v1756_v19  ;;  %v1690_v28 = vmax.f32 %v1562_v20, 0.0  ;;  %v1754_v29 = vmax.f32 %v1626_v21, 0.0 }
  0xe4   : > { %v1565_v30 = vadd.f32 %v3405_v6, %v1430_v22  ;;  %v1629_v31 = vadd.f32 %v3405_v6, %v1494_v23  ;;  %v1428_v32 = vmul.f32 %v3400_v4, %v912_v24  ;;  %v1492_v33 = vmul.f32 %v3400_v4, %v1168_v25  ;;  %v2998_v34 = vpop.f32.mrf.mxu0  ;;  %v3062_v35 = vpop.f32.mrf.mxu1 }
  0xe5   : > { %2333 = vst.msk [vmem:[%s3420_s10 + $0x8] sm:$0xf] %vm2330_vm1, %v2790_v26  ;;  %2397 = vst.msk [vmem:[%s3420_s10 + $0x108] sm:$0xf] %vm2330_vm1, %v2854_v27  ;;  %v2788_v36 = vpack.c.bf16 %v1690_v28, %v1690_v28  ;;  %v2852_v37 = vpack.c.bf16 %v1754_v29, %v1754_v29  ;;  %v1433_v38 = vmul.f32 %v2998_v34, %v3400_v4 }
  0xe6   : > { %v1497_v39 = vmul.f32 %v3062_v35, %v3400_v4  ;;  %v1693_v40 = vmax.f32 %v1565_v30, 0.0  ;;  %v1757_v41 = vmax.f32 %v1629_v31, 0.0  ;;  %v1563_v42 = vadd.f32 %v3405_v6, %v1428_v32  ;;  %v925_v44 = vpop.f32.mrf.mxu0  ;;  %v1181_v45 = vpop.f32.mrf.mxu1 }
  0xe7   : > { %v1627_v43 = vadd.f32 %v3405_v6, %v1492_v33  ;;  %2331 = vst.msk [vmem:[%s3420_s10] sm:$0xf] %vm2330_vm1, %v2788_v36  ;;  %2395 = vst.msk [vmem:[%s3420_s10 + $0x100] sm:$0xf] %vm2330_vm1, %v2852_v37  ;;  %v1568_v46 = vadd.f32 %v3405_v6, %v1433_v38  ;;  %v1431_v48 = vmul.f32 %v3400_v4, %v925_v44 }
  0xe8   : > { %v1632_v47 = vadd.f32 %v3405_v6, %v1497_v39  ;;  %v1495_v49 = vmul.f32 %v3400_v4, %v1181_v45  ;;  %v2791_v50 = vpack.c.bf16 %v1693_v40, %v1693_v40  ;;  %v2855_v51 = vpack.c.bf16 %v1757_v41, %v1757_v41  ;;  %v2999_v54 = vpop.f32.mrf.mxu0  ;;  %v3063_v55 = vpop.f32.mrf.mxu1 }
  0xe9   : > { %v1691_v52 = vmax.f32 %v1563_v42, 0.0  ;;  %v1755_v53 = vmax.f32 %v1627_v43, 0.0  ;;  %v1696_v56 = vmax.f32 %v1568_v46, 0.0  ;;  %v1566_v58 = vadd.f32 %v3405_v6, %v1431_v48 }
  0xea   : > { %v1760_v57 = vmax.f32 %v1632_v47, 0.0  ;;  %v1630_v59 = vadd.f32 %v3405_v6, %v1495_v49  ;;  %2334 = vst.msk [vmem:[%s3420_s10 + $0xc] sm:$0xf] %vm2330_vm1, %v2791_v50  ;;  %2398 = vst.msk [vmem:[%s3420_s10 + $0x10c] sm:$0xf] %vm2330_vm1, %v2855_v51  ;;  %v1434_v62 = vmul.f32 %v2999_v54, %v3400_v4  ;;  %v1498_v63 = vmul.f32 %v3063_v55, %v3400_v4  ;;  %v928_v0 = vpop.f32.mrf.mxu0  ;;  %v1184_v1 = vpop.f32.mrf.mxu1 }
  0xeb   : > { %v2789_v60 = vpack.c.bf16 %v1691_v52, %v1691_v52  ;;  %v2853_v61 = vpack.c.bf16 %v1755_v53, %v1755_v53  ;;  %v2794_v2 = vpack.c.bf16 %v1696_v56, %v1696_v56  ;;  %v1694_v5 = vmax.f32 %v1566_v58, 0.0 }
  0xec   : > { %v2858_v3 = vpack.c.bf16 %v1760_v57, %v1760_v57  ;;  %v1758_v7 = vmax.f32 %v1630_v59, 0.0  ;;  %v1569_v8 = vadd.f32 %v3405_v6, %v1434_v62  ;;  %v1633_v9 = vadd.f32 %v3405_v6, %v1498_v63  ;;  %v3002_v12 = vpop.f32.mrf.mxu0  ;;  %v3066_v13 = vpop.f32.mrf.mxu1 }
  0xed   : > { %2332 = vst.msk [vmem:[%s3420_s10 + $0x4] sm:$0xf] %vm2330_vm1, %v2789_v60  ;;  %2396 = vst.msk [vmem:[%s3420_s10 + $0x104] sm:$0xf] %vm2330_vm1, %v2853_v61  ;;  %v1432_v10 = vmul.f32 %v3400_v4, %v928_v0  ;;  %v1496_v11 = vmul.f32 %v3400_v4, %v1184_v1  ;;  %v2792_v14 = vpack.c.bf16 %v1694_v5, %v1694_v5 }
  0xee   : > { %2337 = vst.msk [vmem:[%s3420_s10 + $0x18] sm:$0xf] %vm2330_vm1, %v2794_v2  ;;  %2401 = vst.msk [vmem:[%s3420_s10 + $0x118] sm:$0xf] %vm2330_vm1, %v2858_v3  ;;  %v2856_v15 = vpack.c.bf16 %v1758_v7, %v1758_v7  ;;  %v1437_v16 = vmul.f32 %v3002_v12, %v3400_v4  ;;  %v1501_v17 = vmul.f32 %v3066_v13, %v3400_v4  ;;  %v1697_v18 = vmax.f32 %v1569_v8, 0.0  ;;  %v941_v22 = vpop.f32.mrf.mxu0  ;;  %v1197_v23 = vpop.f32.mrf.mxu1 }
  0xef   : > { %v1761_v19 = vmax.f32 %v1633_v9, 0.0  ;;  %v1567_v20 = vadd.f32 %v3405_v6, %v1432_v10  ;;  %v1631_v21 = vadd.f32 %v3405_v6, %v1496_v11  ;;  %2335 = vst.msk [vmem:[%s3420_s10 + $0x10] sm:$0xf] %vm2330_vm1, %v2792_v14  ;;  %v1435_v26 = vmul.f32 %v3400_v4, %v941_v22 }
  0xf0   : > { %2399 = vst.msk [vmem:[%s3420_s10 + $0x110] sm:$0xf] %vm2330_vm1, %v2856_v15  ;;  %v1572_v24 = vadd.f32 %v3405_v6, %v1437_v16  ;;  %v1636_v25 = vadd.f32 %v3405_v6, %v1501_v17  ;;  %v1499_v27 = vmul.f32 %v3400_v4, %v1197_v23  ;;  %v2795_v28 = vpack.c.bf16 %v1697_v18, %v1697_v18  ;;  %v3003_v32 = vpop.f32.mrf.mxu0  ;;  %v3067_v33 = vpop.f32.mrf.mxu1 }
  0xf1   : > { %v2859_v29 = vpack.c.bf16 %v1761_v19, %v1761_v19  ;;  %v1695_v30 = vmax.f32 %v1567_v20, 0.0  ;;  %v1759_v31 = vmax.f32 %v1631_v21, 0.0  ;;  %v1570_v36 = vadd.f32 %v3405_v6, %v1435_v26 }
  0xf2   : > { %v1700_v34 = vmax.f32 %v1572_v24, 0.0  ;;  %v1764_v35 = vmax.f32 %v1636_v25, 0.0  ;;  %v1634_v37 = vadd.f32 %v3405_v6, %v1499_v27  ;;  %2338 = vst.msk [vmem:[%s3420_s10 + $0x1c] sm:$0xf] %vm2330_vm1, %v2795_v28  ;;  %v1438_v40 = vmul.f32 %v3003_v32, %v3400_v4  ;;  %v944_v42 = vpop.f32.mrf.mxu0  ;;  %v1200_v43 = vpop.f32.mrf.mxu1 }
  0xf3   : > { %2402 = vst.msk [vmem:[%s3420_s10 + $0x11c] sm:$0xf] %vm2330_vm1, %v2859_v29  ;;  %v2793_v38 = vpack.c.bf16 %v1695_v30, %v1695_v30  ;;  %v2857_v39 = vpack.c.bf16 %v1759_v31, %v1759_v31  ;;  %v1502_v41 = vmul.f32 %v3067_v33, %v3400_v4  ;;  %v1698_v46 = vmax.f32 %v1570_v36, 0.0 }
  0xf4   : > { %v2798_v44 = vpack.c.bf16 %v1700_v34, %v1700_v34  ;;  %v2862_v45 = vpack.c.bf16 %v1764_v35, %v1764_v35  ;;  %v1762_v47 = vmax.f32 %v1634_v37, 0.0  ;;  %v1573_v48 = vadd.f32 %v3405_v6, %v1438_v40  ;;  %v3006_v52 = vpop.f32.mrf.mxu0  ;;  %v3070_v53 = vpop.f32.mrf.mxu1 }
  0xf5   : > { %2336 = vst.msk [vmem:[%s3420_s10 + $0x14] sm:$0xf] %vm2330_vm1, %v2793_v38  ;;  %2400 = vst.msk [vmem:[%s3420_s10 + $0x114] sm:$0xf] %vm2330_vm1, %v2857_v39  ;;  %v1637_v49 = vadd.f32 %v3405_v6, %v1502_v41  ;;  %v1436_v50 = vmul.f32 %v3400_v4, %v944_v42  ;;  %v1500_v51 = vmul.f32 %v3400_v4, %v1200_v43 }
  0xf6   : > { %2341 = vst.msk [vmem:[%s3420_s10 + $0x28] sm:$0xf] %vm2330_vm1, %v2798_v44  ;;  %2405 = vst.msk [vmem:[%s3420_s10 + $0x128] sm:$0xf] %vm2330_vm1, %v2862_v45  ;;  %v2796_v54 = vpack.c.bf16 %v1698_v46, %v1698_v46  ;;  %v2860_v55 = vpack.c.bf16 %v1762_v47, %v1762_v47  ;;  %v1441_v56 = vmul.f32 %v3006_v52, %v3400_v4  ;;  %v1701_v58 = vmax.f32 %v1573_v48, 0.0  ;;  %v957_v62 = vpop.f32.mrf.mxu0  ;;  %v1213_v63 = vpop.f32.mrf.mxu1 }
  0xf7   : > { %v1505_v57 = vmul.f32 %v3070_v53, %v3400_v4  ;;  %v1765_v59 = vmax.f32 %v1637_v49, 0.0  ;;  %v1571_v60 = vadd.f32 %v3405_v6, %v1436_v50  ;;  %v1635_v61 = vadd.f32 %v3405_v6, %v1500_v51 }
  0xf8   : > { %2339 = vst.msk [vmem:[%s3420_s10 + $0x20] sm:$0xf] %vm2330_vm1, %v2796_v54  ;;  %2403 = vst.msk [vmem:[%s3420_s10 + $0x120] sm:$0xf] %vm2330_vm1, %v2860_v55  ;;  %v1576_v0 = vadd.f32 %v3405_v6, %v1441_v56  ;;  %v1439_v2 = vmul.f32 %v3400_v4, %v957_v62  ;;  %v1503_v3 = vmul.f32 %v3400_v4, %v1213_v63  ;;  %v3007_v10 = vpop.f32.mrf.mxu0  ;;  %v3071_v11 = vpop.f32.mrf.mxu1 }
  0xf9   : > { %v1640_v1 = vadd.f32 %v3405_v6, %v1505_v57  ;;  %v2799_v5 = vpack.c.bf16 %v1701_v58, %v1701_v58  ;;  %v2863_v7 = vpack.c.bf16 %v1765_v59, %v1765_v59  ;;  %v1699_v8 = vmax.f32 %v1571_v60, 0.0 }
  0xfa   : > { %v1763_v9 = vmax.f32 %v1635_v61, 0.0  ;;  %v1704_v12 = vmax.f32 %v1576_v0, 0.0  ;;  %v1574_v14 = vadd.f32 %v3405_v6, %v1439_v2  ;;  %v1638_v15 = vadd.f32 %v3405_v6, %v1503_v3  ;;  %v960_v20 = vpop.f32.mrf.mxu0  ;;  %v1216_v21 = vpop.f32.mrf.mxu1 }
  0xfb   : > { %v1768_v13 = vmax.f32 %v1640_v1, 0.0  ;;  %2342 = vst.msk [vmem:[%s3420_s10 + $0x2c] sm:$0xf] %vm2330_vm1, %v2799_v5  ;;  %2406 = vst.msk [vmem:[%s3420_s10 + $0x12c] sm:$0xf] %vm2330_vm1, %v2863_v7  ;;  %v2797_v16 = vpack.c.bf16 %v1699_v8, %v1699_v8  ;;  %v1442_v18 = vmul.f32 %v3007_v10, %v3400_v4  ;;  %v1506_v19 = vmul.f32 %v3071_v11, %v3400_v4 }
  0xfc   : > { %v2861_v17 = vpack.c.bf16 %v1763_v9, %v1763_v9  ;;  %v2802_v22 = vpack.c.bf16 %v1704_v12, %v1704_v12  ;;  %v1702_v24 = vmax.f32 %v1574_v14, 0.0  ;;  %v1766_v25 = vmax.f32 %v1638_v15, 0.0  ;;  %v3010_v30 = vpop.f32.mrf.mxu0  ;;  %v3074_v31 = vpop.f32.mrf.mxu1 }
  0xfd   : > { %v2866_v23 = vpack.c.bf16 %v1768_v13, %v1768_v13  ;;  %2340 = vst.msk [vmem:[%s3420_s10 + $0x24] sm:$0xf] %vm2330_vm1, %v2797_v16  ;;  %v1577_v26 = vadd.f32 %v3405_v6, %v1442_v18  ;;  %v1641_v27 = vadd.f32 %v3405_v6, %v1506_v19  ;;  %v1440_v28 = vmul.f32 %v3400_v4, %v960_v20 }
  0xfe   : > { %2404 = vst.msk [vmem:[%s3420_s10 + $0x124] sm:$0xf] %vm2330_vm1, %v2861_v17  ;;  %v1504_v29 = vmul.f32 %v3400_v4, %v1216_v21  ;;  %2345 = vst.msk [vmem:[%s3420_s10 + $0x38] sm:$0xf] %vm2330_vm1, %v2802_v22  ;;  %v2800_v32 = vpack.c.bf16 %v1702_v24, %v1702_v24  ;;  %v2864_v33 = vpack.c.bf16 %v1766_v25, %v1766_v25  ;;  %v973_v40 = vpop.f32.mrf.mxu0  ;;  %v1229_v41 = vpop.f32.mrf.mxu1 }
  0xff   : > { %2409 = vst.msk [vmem:[%s3420_s10 + $0x138] sm:$0xf] %vm2330_vm1, %v2866_v23  ;;  %v1445_v34 = vmul.f32 %v3010_v30, %v3400_v4  ;;  %v1509_v35 = vmul.f32 %v3074_v31, %v3400_v4  ;;  %v1705_v36 = vmax.f32 %v1577_v26, 0.0  ;;  %v1769_v37 = vmax.f32 %v1641_v27, 0.0 }
 0x100   : > { %v1575_v38 = vadd.f32 %v3405_v6, %v1440_v28  ;;  %v1639_v39 = vadd.f32 %v3405_v6, %v1504_v29  ;;  %2343 = vst.msk [vmem:[%s3420_s10 + $0x30] sm:$0xf] %vm2330_vm1, %v2800_v32  ;;  %2407 = vst.msk [vmem:[%s3420_s10 + $0x130] sm:$0xf] %vm2330_vm1, %v2864_v33  ;;  %v1443_v44 = vmul.f32 %v3400_v4, %v973_v40  ;;  %v3011_v50 = vpop.f32.mrf.mxu0  ;;  %v3075_v51 = vpop.f32.mrf.mxu1 }
 0x101   : > { %v1580_v42 = vadd.f32 %v3405_v6, %v1445_v34  ;;  %v1644_v43 = vadd.f32 %v3405_v6, %v1509_v35  ;;  %v1507_v45 = vmul.f32 %v3400_v4, %v1229_v41  ;;  %v2803_v46 = vpack.c.bf16 %v1705_v36, %v1705_v36 }
 0x102   : > { %v2867_v47 = vpack.c.bf16 %v1769_v37, %v1769_v37  ;;  %v1703_v48 = vmax.f32 %v1575_v38, 0.0  ;;  %v1767_v49 = vmax.f32 %v1639_v39, 0.0  ;;  %v1578_v54 = vadd.f32 %v3405_v6, %v1443_v44  ;;  %v976_v60 = vpop.f32.mrf.mxu0  ;;  %v1232_v61 = vpop.f32.mrf.mxu1 }
 0x103   : > { %v1708_v52 = vmax.f32 %v1580_v42, 0.0  ;;  %v1772_v53 = vmax.f32 %v1644_v43, 0.0  ;;  %v1642_v55 = vadd.f32 %v3405_v6, %v1507_v45  ;;  %2346 = vst.msk [vmem:[%s3420_s10 + $0x3c] sm:$0xf] %vm2330_vm1, %v2803_v46  ;;  %v1446_v58 = vmul.f32 %v3011_v50, %v3400_v4 }
 0x104   : > { %2410 = vst.msk [vmem:[%s3420_s10 + $0x13c] sm:$0xf] %vm2330_vm1, %v2867_v47  ;;  %v2801_v56 = vpack.c.bf16 %v1703_v48, %v1703_v48  ;;  %v2865_v57 = vpack.c.bf16 %v1767_v49, %v1767_v49  ;;  %v1510_v59 = vmul.f32 %v3075_v51, %v3400_v4  ;;  %v1706_v0 = vmax.f32 %v1578_v54, 0.0  ;;  %v3014_v8 = vpop.f32.mrf.mxu0  ;;  %v3078_v9 = vpop.f32.mrf.mxu1 }
 0x105   : > { %v2806_v62 = vpack.c.bf16 %v1708_v52, %v1708_v52  ;;  %v2870_v63 = vpack.c.bf16 %v1772_v53, %v1772_v53  ;;  %v1770_v1 = vmax.f32 %v1642_v55, 0.0  ;;  %v1581_v2 = vadd.f32 %v3405_v6, %v1446_v58 }
 0x106   : > { %2344 = vst.msk [vmem:[%s3420_s10 + $0x34] sm:$0xf] %vm2330_vm1, %v2801_v56  ;;  %2408 = vst.msk [vmem:[%s3420_s10 + $0x134] sm:$0xf] %vm2330_vm1, %v2865_v57  ;;  %v1645_v3 = vadd.f32 %v3405_v6, %v1510_v59  ;;  %v1444_v5 = vmul.f32 %v3400_v4, %v976_v60  ;;  %v1508_v7 = vmul.f32 %v3400_v4, %v1232_v61  ;;  %v989_v18 = vpop.f32.mrf.mxu0  ;;  %v1245_v19 = vpop.f32.mrf.mxu1 }
 0x107   : > { %2349 = vst.msk [vmem:[%s3420_s10 + $0x48] sm:$0xf] %vm2330_vm1, %v2806_v62  ;;  %2413 = vst.msk [vmem:[%s3420_s10 + $0x148] sm:$0xf] %vm2330_vm1, %v2870_v63  ;;  %v2804_v10 = vpack.c.bf16 %v1706_v0, %v1706_v0  ;;  %v2868_v11 = vpack.c.bf16 %v1770_v1, %v1770_v1  ;;  %v1449_v12 = vmul.f32 %v3014_v8, %v3400_v4  ;;  %v1709_v14 = vmax.f32 %v1581_v2, 0.0 }
 0x108   : > { %v1513_v13 = vmul.f32 %v3078_v9, %v3400_v4  ;;  %v1773_v15 = vmax.f32 %v1645_v3, 0.0  ;;  %v1579_v16 = vadd.f32 %v3405_v6, %v1444_v5  ;;  %v1643_v17 = vadd.f32 %v3405_v6, %v1508_v7  ;;  %v3015_v28 = vpop.f32.mrf.mxu0  ;;  %v3079_v29 = vpop.f32.mrf.mxu1 }
 0x109   : > { %2347 = vst.msk [vmem:[%s3420_s10 + $0x40] sm:$0xf] %vm2330_vm1, %v2804_v10  ;;  %2411 = vst.msk [vmem:[%s3420_s10 + $0x140] sm:$0xf] %vm2330_vm1, %v2868_v11  ;;  %v1584_v20 = vadd.f32 %v3405_v6, %v1449_v12  ;;  %v1447_v22 = vmul.f32 %v3400_v4, %v989_v18  ;;  %v1511_v23 = vmul.f32 %v3400_v4, %v1245_v19 }
 0x10a   : > { %v1648_v21 = vadd.f32 %v3405_v6, %v1513_v13  ;;  %v2807_v24 = vpack.c.bf16 %v1709_v14, %v1709_v14  ;;  %v2871_v25 = vpack.c.bf16 %v1773_v15, %v1773_v15  ;;  %v1707_v26 = vmax.f32 %v1579_v16, 0.0  ;;  %v992_v38 = vpop.f32.mrf.mxu0  ;;  %v1248_v39 = vpop.f32.mrf.mxu1 }
 0x10b   : > { %v1771_v27 = vmax.f32 %v1643_v17, 0.0  ;;  %v1712_v30 = vmax.f32 %v1584_v20, 0.0  ;;  %v1582_v32 = vadd.f32 %v3405_v6, %v1447_v22  ;;  %v1646_v33 = vadd.f32 %v3405_v6, %v1511_v23 }
 0x10c   : > { %v1776_v31 = vmax.f32 %v1648_v21, 0.0  ;;  %2350 = vst.msk [vmem:[%s3420_s10 + $0x4c] sm:$0xf] %vm2330_vm1, %v2807_v24  ;;  %2414 = vst.msk [vmem:[%s3420_s10 + $0x14c] sm:$0xf] %vm2330_vm1, %v2871_v25  ;;  %v2805_v34 = vpack.c.bf16 %v1707_v26, %v1707_v26  ;;  %v1450_v36 = vmul.f32 %v3015_v28, %v3400_v4  ;;  %v1514_v37 = vmul.f32 %v3079_v29, %v3400_v4  ;;  %v3018_v48 = vpop.f32.mrf.mxu0  ;;  %v3082_v49 = vpop.f32.mrf.mxu1 }
 0x10d   : > { %v2869_v35 = vpack.c.bf16 %v1771_v27, %v1771_v27  ;;  %v2810_v40 = vpack.c.bf16 %v1712_v30, %v1712_v30  ;;  %v1710_v42 = vmax.f32 %v1582_v32, 0.0  ;;  %v1774_v43 = vmax.f32 %v1646_v33, 0.0 }
 0x10e   : > { %v2874_v41 = vpack.c.bf16 %v1776_v31, %v1776_v31  ;;  %2348 = vst.msk [vmem:[%s3420_s10 + $0x44] sm:$0xf] %vm2330_vm1, %v2805_v34  ;;  %v1585_v44 = vadd.f32 %v3405_v6, %v1450_v36  ;;  %v1649_v45 = vadd.f32 %v3405_v6, %v1514_v37  ;;  %v1448_v46 = vmul.f32 %v3400_v4, %v992_v38  ;;  %v1005_v58 = vpop.f32.mrf.mxu0  ;;  %v1261_v59 = vpop.f32.mrf.mxu1 }
 0x10f   : > { %2412 = vst.msk [vmem:[%s3420_s10 + $0x144] sm:$0xf] %vm2330_vm1, %v2869_v35  ;;  %v1512_v47 = vmul.f32 %v3400_v4, %v1248_v39  ;;  %2353 = vst.msk [vmem:[%s3420_s10 + $0x58] sm:$0xf] %vm2330_vm1, %v2810_v40  ;;  %v2808_v50 = vpack.c.bf16 %v1710_v42, %v1710_v42  ;;  %v2872_v51 = vpack.c.bf16 %v1774_v43, %v1774_v43 }
 0x110   : > { %2417 = vst.msk [vmem:[%s3420_s10 + $0x158] sm:$0xf] %vm2330_vm1, %v2874_v41  ;;  %v1453_v52 = vmul.f32 %v3018_v48, %v3400_v4  ;;  %v1517_v53 = vmul.f32 %v3082_v49, %v3400_v4  ;;  %v1713_v54 = vmax.f32 %v1585_v44, 0.0  ;;  %v1777_v55 = vmax.f32 %v1649_v45, 0.0  ;;  %v3019_v5 = vpop.f32.mrf.mxu0  ;;  %v3083_v7 = vpop.f32.mrf.mxu1 }
 0x111   : > { %v1583_v56 = vadd.f32 %v3405_v6, %v1448_v46  ;;  %v1647_v57 = vadd.f32 %v3405_v6, %v1512_v47  ;;  %2351 = vst.msk [vmem:[%s3420_s10 + $0x50] sm:$0xf] %vm2330_vm1, %v2808_v50  ;;  %2415 = vst.msk [vmem:[%s3420_s10 + $0x150] sm:$0xf] %vm2330_vm1, %v2872_v51  ;;  %v1451_v62 = vmul.f32 %v3400_v4, %v1005_v58 }
 0x112   : > { %v1588_v60 = vadd.f32 %v3405_v6, %v1453_v52  ;;  %v1652_v61 = vadd.f32 %v3405_v6, %v1517_v53  ;;  %v1515_v63 = vmul.f32 %v3400_v4, %v1261_v59  ;;  %v2811_v0 = vpack.c.bf16 %v1713_v54, %v1713_v54  ;;  %v1008_v16 = vpop.f32.mrf.mxu0  ;;  %v1264_v17 = vpop.f32.mrf.mxu1 }
 0x113   : > { %v2875_v1 = vpack.c.bf16 %v1777_v55, %v1777_v55  ;;  %v1711_v2 = vmax.f32 %v1583_v56, 0.0  ;;  %v1775_v3 = vmax.f32 %v1647_v57, 0.0  ;;  %v1586_v10 = vadd.f32 %v3405_v6, %v1451_v62 }
 0x114   : > { %v1716_v8 = vmax.f32 %v1588_v60, 0.0  ;;  %v1780_v9 = vmax.f32 %v1652_v61, 0.0  ;;  %v1650_v11 = vadd.f32 %v3405_v6, %v1515_v63  ;;  %2354 = vst.msk [vmem:[%s3420_s10 + $0x5c] sm:$0xf] %vm2330_vm1, %v2811_v0  ;;  %v1454_v14 = vmul.f32 %v3019_v5, %v3400_v4  ;;  %v3022_v26 = vpop.f32.mrf.mxu0  ;;  %v3086_v27 = vpop.f32.mrf.mxu1 }
 0x115   : > { %2418 = vst.msk [vmem:[%s3420_s10 + $0x15c] sm:$0xf] %vm2330_vm1, %v2875_v1  ;;  %v2809_v12 = vpack.c.bf16 %v1711_v2, %v1711_v2  ;;  %v2873_v13 = vpack.c.bf16 %v1775_v3, %v1775_v3  ;;  %v1518_v15 = vmul.f32 %v3083_v7, %v3400_v4  ;;  %v1714_v20 = vmax.f32 %v1586_v10, 0.0 }
 0x116   : > { %v2814_v18 = vpack.c.bf16 %v1716_v8, %v1716_v8  ;;  %v2878_v19 = vpack.c.bf16 %v1780_v9, %v1780_v9  ;;  %v1778_v21 = vmax.f32 %v1650_v11, 0.0  ;;  %v1589_v22 = vadd.f32 %v3405_v6, %v1454_v14  ;;  %v1021_v36 = vpop.f32.mrf.mxu0  ;;  %v1277_v37 = vpop.f32.mrf.mxu1 }
 0x117   : > { %2352 = vst.msk [vmem:[%s3420_s10 + $0x54] sm:$0xf] %vm2330_vm1, %v2809_v12  ;;  %2416 = vst.msk [vmem:[%s3420_s10 + $0x154] sm:$0xf] %vm2330_vm1, %v2873_v13  ;;  %v1653_v23 = vadd.f32 %v3405_v6, %v1518_v15  ;;  %v1452_v24 = vmul.f32 %v3400_v4, %v1008_v16  ;;  %v1516_v25 = vmul.f32 %v3400_v4, %v1264_v17 }
 0x118   : > { %2357 = vst.msk [vmem:[%s3420_s10 + $0x68] sm:$0xf] %vm2330_vm1, %v2814_v18  ;;  %2421 = vst.msk [vmem:[%s3420_s10 + $0x168] sm:$0xf] %vm2330_vm1, %v2878_v19  ;;  %v2812_v28 = vpack.c.bf16 %v1714_v20, %v1714_v20  ;;  %v2876_v29 = vpack.c.bf16 %v1778_v21, %v1778_v21  ;;  %v1457_v30 = vmul.f32 %v3022_v26, %v3400_v4  ;;  %v1717_v32 = vmax.f32 %v1589_v22, 0.0  ;;  %v3023_v46 = vpop.f32.mrf.mxu0  ;;  %v3087_v47 = vpop.f32.mrf.mxu1 }
 0x119   : > { %v1521_v31 = vmul.f32 %v3086_v27, %v3400_v4  ;;  %v1781_v33 = vmax.f32 %v1653_v23, 0.0  ;;  %v1587_v34 = vadd.f32 %v3405_v6, %v1452_v24  ;;  %v1651_v35 = vadd.f32 %v3405_v6, %v1516_v25 }
 0x11a   : > { %2355 = vst.msk [vmem:[%s3420_s10 + $0x60] sm:$0xf] %vm2330_vm1, %v2812_v28  ;;  %2419 = vst.msk [vmem:[%s3420_s10 + $0x160] sm:$0xf] %vm2330_vm1, %v2876_v29  ;;  %v1592_v38 = vadd.f32 %v3405_v6, %v1457_v30  ;;  %v1455_v40 = vmul.f32 %v3400_v4, %v1021_v36  ;;  %v1519_v41 = vmul.f32 %v3400_v4, %v1277_v37  ;;  %v1024_v56 = vpop.f32.mrf.mxu0  ;;  %v1280_v57 = vpop.f32.mrf.mxu1 }
 0x11b   : > { %v1656_v39 = vadd.f32 %v3405_v6, %v1521_v31  ;;  %v2815_v42 = vpack.c.bf16 %v1717_v32, %v1717_v32  ;;  %v2879_v43 = vpack.c.bf16 %v1781_v33, %v1781_v33  ;;  %v1715_v44 = vmax.f32 %v1587_v34, 0.0 }
 0x11c   : > { %v1779_v45 = vmax.f32 %v1651_v35, 0.0  ;;  %v1720_v48 = vmax.f32 %v1592_v38, 0.0  ;;  %v1590_v50 = vadd.f32 %v3405_v6, %v1455_v40  ;;  %v1654_v51 = vadd.f32 %v3405_v6, %v1519_v41  ;;  %v3026_v2 = vpop.f32.mrf.mxu0  ;;  %v3090_v3 = vpop.f32.mrf.mxu1 }
 0x11d   : > { %v1784_v49 = vmax.f32 %v1656_v39, 0.0  ;;  %2358 = vst.msk [vmem:[%s3420_s10 + $0x6c] sm:$0xf] %vm2330_vm1, %v2815_v42  ;;  %2422 = vst.msk [vmem:[%s3420_s10 + $0x16c] sm:$0xf] %vm2330_vm1, %v2879_v43  ;;  %v2813_v52 = vpack.c.bf16 %v1715_v44, %v1715_v44  ;;  %v1458_v54 = vmul.f32 %v3023_v46, %v3400_v4  ;;  %v1522_v55 = vmul.f32 %v3087_v47, %v3400_v4 }
 0x11e   : > { %v2877_v53 = vpack.c.bf16 %v1779_v45, %v1779_v45  ;;  %v2818_v58 = vpack.c.bf16 %v1720_v48, %v1720_v48  ;;  %v1718_v60 = vmax.f32 %v1590_v50, 0.0  ;;  %v1782_v61 = vmax.f32 %v1654_v51, 0.0  ;;  %v1037_v14 = vpop.f32.mrf.mxu0  ;;  %v1293_v15 = vpop.f32.mrf.mxu1 }
 0x11f   : > { %v2882_v59 = vpack.c.bf16 %v1784_v49, %v1784_v49  ;;  %2356 = vst.msk [vmem:[%s3420_s10 + $0x64] sm:$0xf] %vm2330_vm1, %v2813_v52  ;;  %v1593_v62 = vadd.f32 %v3405_v6, %v1458_v54  ;;  %v1657_v63 = vadd.f32 %v3405_v6, %v1522_v55  ;;  %v1456_v0 = vmul.f32 %v3400_v4, %v1024_v56 }
 0x120   : > { %2420 = vst.msk [vmem:[%s3420_s10 + $0x164] sm:$0xf] %vm2330_vm1, %v2877_v53  ;;  %v1520_v1 = vmul.f32 %v3400_v4, %v1280_v57  ;;  %2361 = vst.msk [vmem:[%s3420_s10 + $0x78] sm:$0xf] %vm2330_vm1, %v2818_v58  ;;  %v2816_v5 = vpack.c.bf16 %v1718_v60, %v1718_v60  ;;  %v2880_v7 = vpack.c.bf16 %v1782_v61, %v1782_v61  ;;  %v3027_v24 = vpop.f32.mrf.mxu0  ;;  %v3091_v25 = vpop.f32.mrf.mxu1 }
 0x121   : > { %2425 = vst.msk [vmem:[%s3420_s10 + $0x178] sm:$0xf] %vm2330_vm1, %v2882_v59  ;;  %v1461_v8 = vmul.f32 %v3026_v2, %v3400_v4  ;;  %v1525_v9 = vmul.f32 %v3090_v3, %v3400_v4  ;;  %v1721_v10 = vmax.f32 %v1593_v62, 0.0  ;;  %v1785_v11 = vmax.f32 %v1657_v63, 0.0 }
 0x122   : > { %v1591_v12 = vadd.f32 %v3405_v6, %v1456_v0  ;;  %v1655_v13 = vadd.f32 %v3405_v6, %v1520_v1  ;;  %2359 = vst.msk [vmem:[%s3420_s10 + $0x70] sm:$0xf] %vm2330_vm1, %v2816_v5  ;;  %2423 = vst.msk [vmem:[%s3420_s10 + $0x170] sm:$0xf] %vm2330_vm1, %v2880_v7  ;;  %v1459_v18 = vmul.f32 %v3400_v4, %v1037_v14  ;;  %v1040_v34 = vpop.f32.mrf.mxu0  ;;  %v1296_v35 = vpop.f32.mrf.mxu1 }
 0x123   : > { %v1596_v16 = vadd.f32 %v3405_v6, %v1461_v8  ;;  %v1660_v17 = vadd.f32 %v3405_v6, %v1525_v9  ;;  %v1523_v19 = vmul.f32 %v3400_v4, %v1293_v15  ;;  %v2819_v20 = vpack.c.bf16 %v1721_v10, %v1721_v10 }
 0x124   : > { %v2883_v21 = vpack.c.bf16 %v1785_v11, %v1785_v11  ;;  %v1719_v22 = vmax.f32 %v1591_v12, 0.0  ;;  %v1783_v23 = vmax.f32 %v1655_v13, 0.0  ;;  %v1594_v28 = vadd.f32 %v3405_v6, %v1459_v18  ;;  %v3030_v44 = vpop.f32.mrf.mxu0  ;;  %v3094_v45 = vpop.f32.mrf.mxu1 }
 0x125   : > { %v1724_v26 = vmax.f32 %v1596_v16, 0.0  ;;  %v1788_v27 = vmax.f32 %v1660_v17, 0.0  ;;  %v1658_v29 = vadd.f32 %v3405_v6, %v1523_v19  ;;  %2362 = vst.msk [vmem:[%s3420_s10 + $0x7c] sm:$0xf] %vm2330_vm1, %v2819_v20  ;;  %v1462_v32 = vmul.f32 %v3027_v24, %v3400_v4 }
 0x126   : > { %2426 = vst.msk [vmem:[%s3420_s10 + $0x17c] sm:$0xf] %vm2330_vm1, %v2883_v21  ;;  %v2817_v30 = vpack.c.bf16 %v1719_v22, %v1719_v22  ;;  %v2881_v31 = vpack.c.bf16 %v1783_v23, %v1783_v23  ;;  %v1526_v33 = vmul.f32 %v3091_v25, %v3400_v4  ;;  %v1722_v38 = vmax.f32 %v1594_v28, 0.0  ;;  %v1053_v54 = vpop.f32.mrf.mxu0  ;;  %v1309_v55 = vpop.f32.mrf.mxu1 }
 0x127   : > { %v2822_v36 = vpack.c.bf16 %v1724_v26, %v1724_v26  ;;  %v2886_v37 = vpack.c.bf16 %v1788_v27, %v1788_v27  ;;  %v1786_v39 = vmax.f32 %v1658_v29, 0.0  ;;  %v1597_v40 = vadd.f32 %v3405_v6, %v1462_v32 }
 0x128   : > { %2360 = vst.msk [vmem:[%s3420_s10 + $0x74] sm:$0xf] %vm2330_vm1, %v2817_v30  ;;  %2424 = vst.msk [vmem:[%s3420_s10 + $0x174] sm:$0xf] %vm2330_vm1, %v2881_v31  ;;  %v1661_v41 = vadd.f32 %v3405_v6, %v1526_v33  ;;  %v1460_v42 = vmul.f32 %v3400_v4, %v1040_v34  ;;  %v1524_v43 = vmul.f32 %v3400_v4, %v1296_v35  ;;  %v3031_v0 = vpop.f32.mrf.mxu0  ;;  %v3095_v1 = vpop.f32.mrf.mxu1 }
 0x129   : > { %2365 = vst.msk [vmem:[%s3420_s10 + $0x88] sm:$0xf] %vm2330_vm1, %v2822_v36  ;;  %2429 = vst.msk [vmem:[%s3420_s10 + $0x188] sm:$0xf] %vm2330_vm1, %v2886_v37  ;;  %v2820_v46 = vpack.c.bf16 %v1722_v38, %v1722_v38  ;;  %v2884_v47 = vpack.c.bf16 %v1786_v39, %v1786_v39  ;;  %v1465_v48 = vmul.f32 %v3030_v44, %v3400_v4  ;;  %v1725_v50 = vmax.f32 %v1597_v40, 0.0 }
 0x12a   : > { %v1529_v49 = vmul.f32 %v3094_v45, %v3400_v4  ;;  %v1789_v51 = vmax.f32 %v1661_v41, 0.0  ;;  %v1595_v52 = vadd.f32 %v3405_v6, %v1460_v42  ;;  %v1659_v53 = vadd.f32 %v3405_v6, %v1524_v43  ;;  %v1056_v12 = vpop.f32.mrf.mxu0  ;;  %v1312_v13 = vpop.f32.mrf.mxu1 }
 0x12b   : > { %2363 = vst.msk [vmem:[%s3420_s10 + $0x80] sm:$0xf] %vm2330_vm1, %v2820_v46  ;;  %2427 = vst.msk [vmem:[%s3420_s10 + $0x180] sm:$0xf] %vm2330_vm1, %v2884_v47  ;;  %v1600_v56 = vadd.f32 %v3405_v6, %v1465_v48  ;;  %v1463_v58 = vmul.f32 %v3400_v4, %v1053_v54  ;;  %v1527_v59 = vmul.f32 %v3400_v4, %v1309_v55 }
 0x12c   : > { %v1664_v57 = vadd.f32 %v3405_v6, %v1529_v49  ;;  %v2823_v60 = vpack.c.bf16 %v1725_v50, %v1725_v50  ;;  %v2887_v61 = vpack.c.bf16 %v1789_v51, %v1789_v51  ;;  %v1723_v62 = vmax.f32 %v1595_v52, 0.0  ;;  %v3034_v22 = vpop.f32.mrf.mxu0  ;;  %v3098_v23 = vpop.f32.mrf.mxu1 }
 0x12d   : > { %v1787_v63 = vmax.f32 %v1659_v53, 0.0  ;;  %v1728_v2 = vmax.f32 %v1600_v56, 0.0  ;;  %v1598_v5 = vadd.f32 %v3405_v6, %v1463_v58  ;;  %v1662_v7 = vadd.f32 %v3405_v6, %v1527_v59 }
 0x12e   : > { %v1792_v3 = vmax.f32 %v1664_v57, 0.0  ;;  %2366 = vst.msk [vmem:[%s3420_s10 + $0x8c] sm:$0xf] %vm2330_vm1, %v2823_v60  ;;  %2430 = vst.msk [vmem:[%s3420_s10 + $0x18c] sm:$0xf] %vm2330_vm1, %v2887_v61  ;;  %v2821_v8 = vpack.c.bf16 %v1723_v62, %v1723_v62  ;;  %v1466_v10 = vmul.f32 %v3031_v0, %v3400_v4  ;;  %v1530_v11 = vmul.f32 %v3095_v1, %v3400_v4  ;;  %v1069_v32 = vpop.f32.mrf.mxu0  ;;  %v1325_v33 = vpop.f32.mrf.mxu1 }
 0x12f   : > { %v2885_v9 = vpack.c.bf16 %v1787_v63, %v1787_v63  ;;  %v2826_v14 = vpack.c.bf16 %v1728_v2, %v1728_v2  ;;  %v1726_v16 = vmax.f32 %v1598_v5, 0.0  ;;  %v1790_v17 = vmax.f32 %v1662_v7, 0.0  ;;  %v3755_v2 = vld [vmem:[%s3941_s2] ss:$0 sm:$0xff] }
 0x130   : > { %v2890_v15 = vpack.c.bf16 %v1792_v3, %v1792_v3  ;;  %2364 = vst.msk [vmem:[%s3420_s10 + $0x84] sm:$0xf] %vm2330_vm1, %v2821_v8  ;;  %v1601_v18 = vadd.f32 %v3405_v6, %v1466_v10  ;;  %v1665_v19 = vadd.f32 %v3405_v6, %v1530_v11  ;;  %v1464_v20 = vmul.f32 %v3400_v4, %v1056_v12  ;;  %v3035_v42 = vpop.f32.mrf.mxu0  ;;  %v3099_v43 = vpop.f32.mrf.mxu1  ;;  %v3762_v7 = vld [vmem:[%s3942_s3] ss:$0 sm:$0xff] }
 0x131   : > { %2428 = vst.msk [vmem:[%s3420_s10 + $0x184] sm:$0xf] %vm2330_vm1, %v2885_v9  ;;  %v1528_v21 = vmul.f32 %v3400_v4, %v1312_v13  ;;  %2369 = vst.msk [vmem:[%s3420_s10 + $0x98] sm:$0xf] %vm2330_vm1, %v2826_v14  ;;  %v2824_v24 = vpack.c.bf16 %v1726_v16, %v1726_v16  ;;  %v2888_v25 = vpack.c.bf16 %v1790_v17, %v1790_v17 }
 0x132   : > { %2433 = vst.msk [vmem:[%s3420_s10 + $0x198] sm:$0xf] %vm2330_vm1, %v2890_v15  ;;  %v1469_v26 = vmul.f32 %v3034_v22, %v3400_v4  ;;  %v1533_v27 = vmul.f32 %v3098_v23, %v3400_v4  ;;  %v1729_v28 = vmax.f32 %v1601_v18, 0.0  ;;  %v1793_v29 = vmax.f32 %v1665_v19, 0.0  ;;  %v1072_v52 = vpop.f32.mrf.mxu0  ;;  %v1328_v53 = vpop.f32.mrf.mxu1 }
 0x133   : > { %v1599_v30 = vadd.f32 %v3405_v6, %v1464_v20  ;;  %v1663_v31 = vadd.f32 %v3405_v6, %v1528_v21  ;;  %2367 = vst.msk [vmem:[%s3420_s10 + $0x90] sm:$0xf] %vm2330_vm1, %v2824_v24  ;;  %2431 = vst.msk [vmem:[%s3420_s10 + $0x190] sm:$0xf] %vm2330_vm1, %v2888_v25  ;;  %v1467_v36 = vmul.f32 %v3400_v4, %v1069_v32 }
 0x134   : > { %v1604_v34 = vadd.f32 %v3405_v6, %v1469_v26  ;;  %v1668_v35 = vadd.f32 %v3405_v6, %v1533_v27  ;;  %v1531_v37 = vmul.f32 %v3400_v4, %v1325_v33  ;;  %v2827_v38 = vpack.c.bf16 %v1729_v28, %v1729_v28  ;;  %v3038_v62 = vpop.f32.mrf.mxu0  ;;  %v3102_v63 = vpop.f32.mrf.mxu1 }
 0x135   : > { %v2891_v39 = vpack.c.bf16 %v1793_v29, %v1793_v29  ;;  %v1727_v40 = vmax.f32 %v1599_v30, 0.0  ;;  %v1791_v41 = vmax.f32 %v1663_v31, 0.0  ;;  %v1602_v46 = vadd.f32 %v3405_v6, %v1467_v36 }
 0x136   : > { %v1732_v44 = vmax.f32 %v1604_v34, 0.0  ;;  %v1796_v45 = vmax.f32 %v1668_v35, 0.0  ;;  %v1666_v47 = vadd.f32 %v3405_v6, %v1531_v37  ;;  %2370 = vst.msk [vmem:[%s3420_s10 + $0x9c] sm:$0xf] %vm2330_vm1, %v2827_v38  ;;  %v1470_v50 = vmul.f32 %v3035_v42, %v3400_v4  ;;  %v1085_v10 = vpop.f32.mrf.mxu0  ;;  %v1341_v11 = vpop.f32.mrf.mxu1 }
 0x137   : > { %2434 = vst.msk [vmem:[%s3420_s10 + $0x19c] sm:$0xf] %vm2330_vm1, %v2891_v39  ;;  %v2825_v48 = vpack.c.bf16 %v1727_v40, %v1727_v40  ;;  %v2889_v49 = vpack.c.bf16 %v1791_v41, %v1791_v41  ;;  %v1534_v51 = vmul.f32 %v3099_v43, %v3400_v4  ;;  %v1730_v56 = vmax.f32 %v1602_v46, 0.0 }
 0x138   : > { %v2830_v54 = vpack.c.bf16 %v1732_v44, %v1732_v44  ;;  %v2894_v55 = vpack.c.bf16 %v1796_v45, %v1796_v45  ;;  %v1794_v57 = vmax.f32 %v1666_v47, 0.0  ;;  %v1605_v58 = vadd.f32 %v3405_v6, %v1470_v50  ;;  %v3039_v20 = vpop.f32.mrf.mxu0  ;;  %v3103_v21 = vpop.f32.mrf.mxu1 }
 0x139   : > { %2368 = vst.msk [vmem:[%s3420_s10 + $0x94] sm:$0xf] %vm2330_vm1, %v2825_v48  ;;  %2432 = vst.msk [vmem:[%s3420_s10 + $0x194] sm:$0xf] %vm2330_vm1, %v2889_v49  ;;  %v1669_v59 = vadd.f32 %v3405_v6, %v1534_v51  ;;  %v1468_v60 = vmul.f32 %v3400_v4, %v1072_v52  ;;  %v1532_v61 = vmul.f32 %v3400_v4, %v1328_v53 }
 0x13a   : > { %2373 = vst.msk [vmem:[%s3420_s10 + $0xa8] sm:$0xf] %vm2330_vm1, %v2830_v54  ;;  %2437 = vst.msk [vmem:[%s3420_s10 + $0x1a8] sm:$0xf] %vm2330_vm1, %v2894_v55  ;;  %v2828_v0 = vpack.c.bf16 %v1730_v56, %v1730_v56  ;;  %v2892_v1 = vpack.c.bf16 %v1794_v57, %v1794_v57  ;;  %v1473_v6 = vmul.f32 %v3755_v2, %v3038_v62  ;;  %v1733_v4 = vmax.f32 %v1605_v58, 0.0  ;;  %v1088_v30 = vpop.f32.mrf.mxu0  ;;  %v1344_v31 = vpop.f32.mrf.mxu1 }
 0x13b   : > { %v1537_v3 = vmul.f32 %v3755_v2, %v3102_v63  ;;  %v1797_v5 = vmax.f32 %v1669_v59, 0.0  ;;  %v1603_v8 = vadd.f32 %v3762_v7, %v1468_v60  ;;  %v1667_v9 = vadd.f32 %v3762_v7, %v1532_v61 }
 0x13c   : > { %2371 = vst.msk [vmem:[%s3420_s10 + $0xa0] sm:$0xf] %vm2330_vm1, %v2828_v0  ;;  %2435 = vst.msk [vmem:[%s3420_s10 + $0x1a0] sm:$0xf] %vm2330_vm1, %v2892_v1  ;;  %v1608_v12 = vadd.f32 %v3762_v7, %v1473_v6  ;;  %v1471_v14 = vmul.f32 %v3755_v2, %v1085_v10  ;;  %v1535_v15 = vmul.f32 %v3755_v2, %v1341_v11  ;;  %v3042_v40 = vpop.f32.mrf.mxu0  ;;  %v3106_v41 = vpop.f32.mrf.mxu1 }
 0x13d   : > { %v1672_v13 = vadd.f32 %v3762_v7, %v1537_v3  ;;  %v2831_v16 = vpack.c.bf16 %v1733_v4, %v1733_v4  ;;  %v2895_v17 = vpack.c.bf16 %v1797_v5, %v1797_v5  ;;  %v1731_v18 = vmax.f32 %v1603_v8, 0.0 }
 0x13e   : > { %v1795_v19 = vmax.f32 %v1667_v9, 0.0  ;;  %v1736_v22 = vmax.f32 %v1608_v12, 0.0  ;;  %v1606_v24 = vadd.f32 %v3762_v7, %v1471_v14  ;;  %v1670_v25 = vadd.f32 %v3762_v7, %v1535_v15  ;;  %v1101_v50 = vpop.f32.mrf.mxu0  ;;  %v1357_v51 = vpop.f32.mrf.mxu1 }
 0x13f   : > { %v1800_v23 = vmax.f32 %v1672_v13, 0.0  ;;  %2374 = vst.msk [vmem:[%s3420_s10 + $0xac] sm:$0xf] %vm2330_vm1, %v2831_v16  ;;  %2438 = vst.msk [vmem:[%s3420_s10 + $0x1ac] sm:$0xf] %vm2330_vm1, %v2895_v17  ;;  %v2829_v26 = vpack.c.bf16 %v1731_v18, %v1731_v18  ;;  %v1474_v28 = vmul.f32 %v3755_v2, %v3039_v20  ;;  %v1538_v29 = vmul.f32 %v3755_v2, %v3103_v21 }
 0x140   : > { %v2893_v27 = vpack.c.bf16 %v1795_v19, %v1795_v19  ;;  %v2834_v32 = vpack.c.bf16 %v1736_v22, %v1736_v22  ;;  %v1734_v34 = vmax.f32 %v1606_v24, 0.0  ;;  %v1798_v35 = vmax.f32 %v1670_v25, 0.0  ;;  %v3043_v60 = vpop.f32.mrf.mxu0  ;;  %v3107_v61 = vpop.f32.mrf.mxu1 }
 0x141   : > { %v2898_v33 = vpack.c.bf16 %v1800_v23, %v1800_v23  ;;  %2372 = vst.msk [vmem:[%s3420_s10 + $0xa4] sm:$0xf] %vm2330_vm1, %v2829_v26  ;;  %v1609_v36 = vadd.f32 %v3762_v7, %v1474_v28  ;;  %v1673_v37 = vadd.f32 %v3762_v7, %v1538_v29  ;;  %v1472_v38 = vmul.f32 %v3755_v2, %v1088_v30 }
 0x142   : > { %2436 = vst.msk [vmem:[%s3420_s10 + $0x1a4] sm:$0xf] %vm2330_vm1, %v2893_v27  ;;  %v1536_v39 = vmul.f32 %v3755_v2, %v1344_v31  ;;  %2377 = vst.msk [vmem:[%s3420_s10 + $0xb8] sm:$0xf] %vm2330_vm1, %v2834_v32  ;;  %v2832_v42 = vpack.c.bf16 %v1734_v34, %v1734_v34  ;;  %v2896_v43 = vpack.c.bf16 %v1798_v35, %v1798_v35  ;;  %v1104_v8 = vpop.f32.mrf.mxu0  ;;  %v1360_v9 = vpop.f32.mrf.mxu1 }
 0x143   : > { %2441 = vst.msk [vmem:[%s3420_s10 + $0x1b8] sm:$0xf] %vm2330_vm1, %v2898_v33  ;;  %v1477_v44 = vmul.f32 %v3755_v2, %v3042_v40  ;;  %v1541_v45 = vmul.f32 %v3755_v2, %v3106_v41  ;;  %v1737_v46 = vmax.f32 %v1609_v36, 0.0  ;;  %v1801_v47 = vmax.f32 %v1673_v37, 0.0 }
 0x144   : > { %v1607_v48 = vadd.f32 %v3762_v7, %v1472_v38  ;;  %v1671_v49 = vadd.f32 %v3762_v7, %v1536_v39  ;;  %2375 = vst.msk [vmem:[%s3420_s10 + $0xb0] sm:$0xf] %vm2330_vm1, %v2832_v42  ;;  %2439 = vst.msk [vmem:[%s3420_s10 + $0x1b0] sm:$0xf] %vm2330_vm1, %v2896_v43  ;;  %v1475_v54 = vmul.f32 %v3755_v2, %v1101_v50  ;;  %v3046_v18 = vpop.f32.mrf.mxu0  ;;  %v3110_v19 = vpop.f32.mrf.mxu1 }
 0x145   : > { %v1612_v52 = vadd.f32 %v3762_v7, %v1477_v44  ;;  %v1676_v53 = vadd.f32 %v3762_v7, %v1541_v45  ;;  %v1539_v55 = vmul.f32 %v3755_v2, %v1357_v51  ;;  %v2835_v56 = vpack.c.bf16 %v1737_v46, %v1737_v46 }
 0x146   : > { %v2899_v57 = vpack.c.bf16 %v1801_v47, %v1801_v47  ;;  %v1735_v58 = vmax.f32 %v1607_v48, 0.0  ;;  %v1799_v59 = vmax.f32 %v1671_v49, 0.0  ;;  %v1610_v0 = vadd.f32 %v3762_v7, %v1475_v54  ;;  %v1117_v28 = vpop.f32.mrf.mxu0  ;;  %v1373_v29 = vpop.f32.mrf.mxu1 }
 0x147   : > { %v1740_v62 = vmax.f32 %v1612_v52, 0.0  ;;  %v1804_v63 = vmax.f32 %v1676_v53, 0.0  ;;  %v1674_v1 = vadd.f32 %v3762_v7, %v1539_v55  ;;  %2378 = vst.msk [vmem:[%s3420_s10 + $0xbc] sm:$0xf] %vm2330_vm1, %v2835_v56  ;;  %v1478_v4 = vmul.f32 %v3755_v2, %v3043_v60 }
 0x148   : > { %2442 = vst.msk [vmem:[%s3420_s10 + $0x1bc] sm:$0xf] %vm2330_vm1, %v2899_v57  ;;  %v2833_v6 = vpack.c.bf16 %v1735_v58, %v1735_v58  ;;  %v2897_v3 = vpack.c.bf16 %v1799_v59, %v1799_v59  ;;  %v1542_v5 = vmul.f32 %v3755_v2, %v3107_v61  ;;  %v1738_v12 = vmax.f32 %v1610_v0, 0.0  ;;  %v3047_v38 = vpop.f32.mrf.mxu0  ;;  %v3111_v39 = vpop.f32.mrf.mxu1 }
 0x149   : > { %v2838_v10 = vpack.c.bf16 %v1740_v62, %v1740_v62  ;;  %v2902_v11 = vpack.c.bf16 %v1804_v63, %v1804_v63  ;;  %v1802_v13 = vmax.f32 %v1674_v1, 0.0  ;;  %v1613_v14 = vadd.f32 %v3762_v7, %v1478_v4 }
 0x14a   : > { %2376 = vst.msk [vmem:[%s3420_s10 + $0xb4] sm:$0xf] %vm2330_vm1, %v2833_v6  ;;  %2440 = vst.msk [vmem:[%s3420_s10 + $0x1b4] sm:$0xf] %vm2330_vm1, %v2897_v3  ;;  %v1677_v15 = vadd.f32 %v3762_v7, %v1542_v5  ;;  %v1476_v16 = vmul.f32 %v3755_v2, %v1104_v8  ;;  %v1540_v17 = vmul.f32 %v3755_v2, %v1360_v9  ;;  %v1120_v48 = vpop.f32.mrf.mxu0  ;;  %v1376_v49 = vpop.f32.mrf.mxu1 }
 0x14b   : > { %2381 = vst.msk [vmem:[%s3420_s10 + $0xc8] sm:$0xf] %vm2330_vm1, %v2838_v10  ;;  %2445 = vst.msk [vmem:[%s3420_s10 + $0x1c8] sm:$0xf] %vm2330_vm1, %v2902_v11  ;;  %v2836_v20 = vpack.c.bf16 %v1738_v12, %v1738_v12  ;;  %v2900_v21 = vpack.c.bf16 %v1802_v13, %v1802_v13  ;;  %v1481_v22 = vmul.f32 %v3755_v2, %v3046_v18  ;;  %v1741_v24 = vmax.f32 %v1613_v14, 0.0 }
 0x14c   : > { %v1545_v23 = vmul.f32 %v3755_v2, %v3110_v19  ;;  %v1805_v25 = vmax.f32 %v1677_v15, 0.0  ;;  %v1611_v26 = vadd.f32 %v3762_v7, %v1476_v16  ;;  %v1675_v27 = vadd.f32 %v3762_v7, %v1540_v17  ;;  %v3050_v58 = vpop.f32.mrf.mxu0  ;;  %v3114_v59 = vpop.f32.mrf.mxu1 }
 0x14d   : > { %2379 = vst.msk [vmem:[%s3420_s10 + $0xc0] sm:$0xf] %vm2330_vm1, %v2836_v20  ;;  %2443 = vst.msk [vmem:[%s3420_s10 + $0x1c0] sm:$0xf] %vm2330_vm1, %v2900_v21  ;;  %v1616_v30 = vadd.f32 %v3762_v7, %v1481_v22  ;;  %v1479_v32 = vmul.f32 %v3755_v2, %v1117_v28  ;;  %v1543_v33 = vmul.f32 %v3755_v2, %v1373_v29 }
 0x14e   : > { %v1680_v31 = vadd.f32 %v3762_v7, %v1545_v23  ;;  %v2839_v34 = vpack.c.bf16 %v1741_v24, %v1741_v24  ;;  %v2903_v35 = vpack.c.bf16 %v1805_v25, %v1805_v25  ;;  %v1739_v36 = vmax.f32 %v1611_v26, 0.0  ;;  %v1133_v4 = vpop.f32.mrf.mxu0  ;;  %v1389_v5 = vpop.f32.mrf.mxu1 }
 0x14f   : > { %v1803_v37 = vmax.f32 %v1675_v27, 0.0  ;;  %v1744_v40 = vmax.f32 %v1616_v30, 0.0  ;;  %v1614_v42 = vadd.f32 %v3762_v7, %v1479_v32  ;;  %v1678_v43 = vadd.f32 %v3762_v7, %v1543_v33 }
 0x150   : > { %v1808_v41 = vmax.f32 %v1680_v31, 0.0  ;;  %2382 = vst.msk [vmem:[%s3420_s10 + $0xcc] sm:$0xf] %vm2330_vm1, %v2839_v34  ;;  %2446 = vst.msk [vmem:[%s3420_s10 + $0x1cc] sm:$0xf] %vm2330_vm1, %v2903_v35  ;;  %v2837_v44 = vpack.c.bf16 %v1739_v36, %v1739_v36  ;;  %v1482_v46 = vmul.f32 %v3755_v2, %v3047_v38  ;;  %v1546_v47 = vmul.f32 %v3755_v2, %v3111_v39  ;;  %v3051_v16 = vpop.f32.mrf.mxu0  ;;  %v3115_v17 = vpop.f32.mrf.mxu1 }
 0x151   : > { %v2901_v45 = vpack.c.bf16 %v1803_v37, %v1803_v37  ;;  %v2842_v50 = vpack.c.bf16 %v1744_v40, %v1744_v40  ;;  %v1742_v52 = vmax.f32 %v1614_v42, 0.0  ;;  %v1806_v53 = vmax.f32 %v1678_v43, 0.0 }
 0x152   : > { %v2906_v51 = vpack.c.bf16 %v1808_v41, %v1808_v41  ;;  %2380 = vst.msk [vmem:[%s3420_s10 + $0xc4] sm:$0xf] %vm2330_vm1, %v2837_v44  ;;  %v1617_v54 = vadd.f32 %v3762_v7, %v1482_v46  ;;  %v1681_v55 = vadd.f32 %v3762_v7, %v1546_v47  ;;  %v1480_v56 = vmul.f32 %v3755_v2, %v1120_v48  ;;  %v1136_v26 = vpop.f32.mrf.mxu0  ;;  %v1392_v27 = vpop.f32.mrf.mxu1 }
 0x153   : > { %2444 = vst.msk [vmem:[%s3420_s10 + $0x1c4] sm:$0xf] %vm2330_vm1, %v2901_v45  ;;  %v1544_v57 = vmul.f32 %v3755_v2, %v1376_v49  ;;  %2385 = vst.msk [vmem:[%s3420_s10 + $0xd8] sm:$0xf] %vm2330_vm1, %v2842_v50  ;;  %v2840_v60 = vpack.c.bf16 %v1742_v52, %v1742_v52  ;;  %v2904_v61 = vpack.c.bf16 %v1806_v53, %v1806_v53 }
 0x154   : > { %2449 = vst.msk [vmem:[%s3420_s10 + $0x1d8] sm:$0xf] %vm2330_vm1, %v2906_v51  ;;  %v1485_v62 = vmul.f32 %v3755_v2, %v3050_v58  ;;  %v1549_v63 = vmul.f32 %v3755_v2, %v3114_v59  ;;  %v1745_v0 = vmax.f32 %v1617_v54, 0.0  ;;  %v1809_v1 = vmax.f32 %v1681_v55, 0.0  ;;  %v3054_v36 = vpop.f32.mrf.mxu0  ;;  %v3118_v37 = vpop.f32.mrf.mxu1 }
 0x155   : > { %v1615_v6 = vadd.f32 %v3762_v7, %v1480_v56  ;;  %v1679_v3 = vadd.f32 %v3762_v7, %v1544_v57  ;;  %2383 = vst.msk [vmem:[%s3420_s10 + $0xd0] sm:$0xf] %vm2330_vm1, %v2840_v60  ;;  %2447 = vst.msk [vmem:[%s3420_s10 + $0x1d0] sm:$0xf] %vm2330_vm1, %v2904_v61  ;;  %v1483_v10 = vmul.f32 %v3755_v2, %v1133_v4 }
 0x156   : > { %v1620_v8 = vadd.f32 %v3762_v7, %v1485_v62  ;;  %v1684_v9 = vadd.f32 %v3762_v7, %v1549_v63  ;;  %v1547_v11 = vmul.f32 %v3755_v2, %v1389_v5  ;;  %v2843_v12 = vpack.c.bf16 %v1745_v0, %v1745_v0  ;;  %v1149_v46 = vpop.f32.mrf.mxu0  ;;  %v1405_v47 = vpop.f32.mrf.mxu1 }
 0x157   : > { %v2907_v13 = vpack.c.bf16 %v1809_v1, %v1809_v1  ;;  %v1743_v14 = vmax.f32 %v1615_v6, 0.0  ;;  %v1807_v15 = vmax.f32 %v1679_v3, 0.0  ;;  %v1618_v20 = vadd.f32 %v3762_v7, %v1483_v10 }
 0x158   : > { %v1748_v18 = vmax.f32 %v1620_v8, 0.0  ;;  %v1812_v19 = vmax.f32 %v1684_v9, 0.0  ;;  %v1682_v21 = vadd.f32 %v3762_v7, %v1547_v11  ;;  %2386 = vst.msk [vmem:[%s3420_s10 + $0xdc] sm:$0xf] %vm2330_vm1, %v2843_v12  ;;  %v1486_v24 = vmul.f32 %v3755_v2, %v3051_v16  ;;  %v3055_v56 = vpop.f32.mrf.mxu0  ;;  %v3119_v57 = vpop.f32.mrf.mxu1 }
 0x159   : > { %2450 = vst.msk [vmem:[%s3420_s10 + $0x1dc] sm:$0xf] %vm2330_vm1, %v2907_v13  ;;  %v2841_v22 = vpack.c.bf16 %v1743_v14, %v1743_v14  ;;  %v2905_v23 = vpack.c.bf16 %v1807_v15, %v1807_v15  ;;  %v1550_v25 = vmul.f32 %v3755_v2, %v3115_v17  ;;  %v1746_v30 = vmax.f32 %v1618_v20, 0.0 }
 0x15a   : > { %v2846_v28 = vpack.c.bf16 %v1748_v18, %v1748_v18  ;;  %v2910_v29 = vpack.c.bf16 %v1812_v19, %v1812_v19  ;;  %v1810_v31 = vmax.f32 %v1682_v21, 0.0  ;;  %v1621_v32 = vadd.f32 %v3762_v7, %v1486_v24  ;;  %v1152_v6 = vpop.f32.mrf.mxu0  ;;  %v1408_v3 = vpop.f32.mrf.mxu1 }
 0x15b   : > { %2384 = vst.msk [vmem:[%s3420_s10 + $0xd4] sm:$0xf] %vm2330_vm1, %v2841_v22  ;;  %2448 = vst.msk [vmem:[%s3420_s10 + $0x1d4] sm:$0xf] %vm2330_vm1, %v2905_v23  ;;  %v1685_v33 = vadd.f32 %v3762_v7, %v1550_v25  ;;  %v1484_v34 = vmul.f32 %v3755_v2, %v1136_v26  ;;  %v1548_v35 = vmul.f32 %v3755_v2, %v1392_v27 }
 0x15c   : > { %2389 = vst.msk [vmem:[%s3420_s10 + $0xe8] sm:$0xf] %vm2330_vm1, %v2846_v28  ;;  %2453 = vst.msk [vmem:[%s3420_s10 + $0x1e8] sm:$0xf] %vm2330_vm1, %v2910_v29  ;;  %v2844_v38 = vpack.c.bf16 %v1746_v30, %v1746_v30  ;;  %v2908_v39 = vpack.c.bf16 %v1810_v31, %v1810_v31  ;;  %v1489_v40 = vmul.f32 %v3755_v2, %v3054_v36  ;;  %v1749_v42 = vmax.f32 %v1621_v32, 0.0 }
 0x15d   : > { %v1553_v41 = vmul.f32 %v3755_v2, %v3118_v37  ;;  %v1813_v43 = vmax.f32 %v1685_v33, 0.0  ;;  %v1619_v44 = vadd.f32 %v3762_v7, %v1484_v34  ;;  %v1683_v45 = vadd.f32 %v3762_v7, %v1548_v35 }
 0x15e   : > { %2387 = vst.msk [vmem:[%s3420_s10 + $0xe0] sm:$0xf] %vm2330_vm1, %v2844_v38  ;;  %2451 = vst.msk [vmem:[%s3420_s10 + $0x1e0] sm:$0xf] %vm2330_vm1, %v2908_v39  ;;  %v1624_v48 = vadd.f32 %v3762_v7, %v1489_v40  ;;  %v1487_v50 = vmul.f32 %v3755_v2, %v1149_v46  ;;  %v1551_v51 = vmul.f32 %v3755_v2, %v1405_v47 }
 0x15f   : > { %v1688_v49 = vadd.f32 %v3762_v7, %v1553_v41  ;;  %v2847_v52 = vpack.c.bf16 %v1749_v42, %v1749_v42  ;;  %v2911_v53 = vpack.c.bf16 %v1813_v43, %v1813_v43  ;;  %v1747_v54 = vmax.f32 %v1619_v44, 0.0 }
 0x160   : > { %v1811_v55 = vmax.f32 %v1683_v45, 0.0  ;;  %v1752_v58 = vmax.f32 %v1624_v48, 0.0  ;;  %v1622_v60 = vadd.f32 %v3762_v7, %v1487_v50  ;;  %v1686_v61 = vadd.f32 %v3762_v7, %v1551_v51 }
 0x161   : > { %v1816_v59 = vmax.f32 %v1688_v49, 0.0  ;;  %2390 = vst.msk [vmem:[%s3420_s10 + $0xec] sm:$0xf] %vm2330_vm1, %v2847_v52  ;;  %2454 = vst.msk [vmem:[%s3420_s10 + $0x1ec] sm:$0xf] %vm2330_vm1, %v2911_v53  ;;  %v2845_v62 = vpack.c.bf16 %v1747_v54, %v1747_v54  ;;  %v1490_v0 = vmul.f32 %v3755_v2, %v3055_v56  ;;  %v1554_v1 = vmul.f32 %v3755_v2, %v3119_v57 }
 0x162   : > { %v2909_v63 = vpack.c.bf16 %v1811_v55, %v1811_v55  ;;  %v2850_v4 = vpack.c.bf16 %v1752_v58, %v1752_v58  ;;  %v1750_v8 = vmax.f32 %v1622_v60, 0.0  ;;  %v1814_v9 = vmax.f32 %v1686_v61, 0.0 }
 0x163   : > { %v2914_v5 = vpack.c.bf16 %v1816_v59, %v1816_v59  ;;  %2388 = vst.msk [vmem:[%s3420_s10 + $0xe4] sm:$0xf] %vm2330_vm1, %v2845_v62  ;;  %v1625_v10 = vadd.f32 %v3762_v7, %v1490_v0  ;;  %v1689_v11 = vadd.f32 %v3762_v7, %v1554_v1  ;;  %v1488_v12 = vmul.f32 %v3755_v2, %v1152_v6 }
 0x164   : > { %2452 = vst.msk [vmem:[%s3420_s10 + $0x1e4] sm:$0xf] %vm2330_vm1, %v2909_v63  ;;  %v1552_v13 = vmul.f32 %v3755_v2, %v1408_v3  ;;  %2393 = vst.msk [vmem:[%s3420_s10 + $0xf8] sm:$0xf] %vm2330_vm1, %v2850_v4  ;;  %v2848_v14 = vpack.c.bf16 %v1750_v8, %v1750_v8  ;;  %v2912_v15 = vpack.c.bf16 %v1814_v9, %v1814_v9 }
 0x165   : > { %2457 = vst.msk [vmem:[%s3420_s10 + $0x1f8] sm:$0xf] %vm2330_vm1, %v2914_v5  ;;  %v1753_v16 = vmax.f32 %v1625_v10, 0.0  ;;  %v1817_v17 = vmax.f32 %v1689_v11, 0.0  ;;  %v1623_v18 = vadd.f32 %v3762_v7, %v1488_v12 }
 0x166   : > { %v1687_v19 = vadd.f32 %v3762_v7, %v1552_v13  ;;  %2391 = vst.msk [vmem:[%s3420_s10 + $0xf0] sm:$0xf] %vm2330_vm1, %v2848_v14  ;;  %2455 = vst.msk [vmem:[%s3420_s10 + $0x1f0] sm:$0xf] %vm2330_vm1, %v2912_v15 }
 0x167   : > { %v2851_v2 = vpack.c.bf16 %v1753_v16, %v1753_v16  ;;  %v2915_v20 = vpack.c.bf16 %v1817_v17, %v1817_v17  ;;  %v1751_v21 = vmax.f32 %v1623_v18, 0.0 }
 0x168   : > { %v1815_v22 = vmax.f32 %v1687_v19, 0.0 }
 0x169   : > { %2394 = vst.msk [vmem:[%s3420_s10 + $0xfc] sm:$0xf] %vm2330_vm1, %v2851_v2  ;;  %2458 = vst.msk [vmem:[%s3420_s10 + $0x1fc] sm:$0xf] %vm2330_vm1, %v2915_v20  ;;  %v2849_v23 = vpack.c.bf16 %v1751_v21, %v1751_v21 }
 0x16a   : > { %v2913_v24 = vpack.c.bf16 %v1815_v22, %v1815_v22 }
 0x16b   : > { %2392 = vst.msk [vmem:[%s3420_s10 + $0xf4] sm:$0xf] %vm2330_vm1, %v2849_v23 }
 0x16c   : > { %2456 = vst.msk [vmem:[%s3420_s10 + $0x1f4] sm:$0xf] %vm2330_vm1, %v2913_v24 }
 0x16d PF: > { %s14_s15 = sadd.s32 1, %s3212_s15  }
 0x16e   : > { %p11_p4 = scmp.ge.s32.totalorder %s14_s15, 5  }
 0x170   :  { %13 = sbr.rel (!%p11_p4) target bundleno = 1 (0x1), region = 66 }

// kernel: bottleneck3d_forward.7
= control target key start
LH: loop header
LB: loop body
LE: loop exit
PB: predicated region body
PF: predicated region fallthrough
CT: control target
= control target key end

     0   :  { %10 = vsyncpa [#allocation3], 0  ;;  %s1139_s0 = inlined_call_operand.vmem [shape: bf16[384,32], index: 0, kind: input, shape index: {}]   ;;  %s1140_s1 = inlined_call_operand.vmem [shape: bf16[32,128], index: 1, kind: input, shape index: {}]   ;;  %s1141_s2 = inlined_call_operand.vmem [shape: f32[1,128], index: 2, kind: input, shape index: {}]   ;;  %s1142_s3 = inlined_call_operand.vmem [shape: f32[1,128], index: 3, kind: input, shape index: {}]   ;;  %s1143_s4 = inlined_call_operand.vmem [shape: bf16[384,128], index: 4, kind: input, shape index: {}]   ;;  %s1144_s5 = inlined_call_operand.hbm [shape: f32[384,128], index: 5, kind: output, shape index: {}]  }
   0x1   :  { %12 = vsyncpa [#allocation3 + $0x1], 0  ;;  %s911_s18 = smov 0   ;;  %s913_s19 = smov 0  }
   0x2   :  { %s915_s20 = smov 0   ;;  %s917_s21 = smov 0  }
   0x3 LB: > { %s932_s22 = sadd.s32 4294967295, %s876_s21   ;;  %s657_s23 = sadd.s32 4294967294, %s876_s21   ;;  %s876_s21 = sphi %s917_s21, %s1150_s21   ;;  %s872_s20 = sphi %s915_s20, %s1149_s20   ;;  %s868_s19 = sphi %s913_s19, %s1148_s19   ;;  %s864_s18 = sphi %s911_s18, %s1147_s18  }
   0x4   : > { %s936_s24 = sadd.s32 1, %s876_s21   ;;  %s140_s25 = sadd.s32 1, %s872_s20 }
   0x5   : > { %s137_s26 = ssub.s32 %s876_s21, %s936_s24  ;;  %p150_p0 = scmp.ne.s32.totalorder %s872_s20, %s868_s19 }
   0x6   : > { %p138_p1 = scmp.eq.s32.totalorder %s137_s26, 0  ;;  %p151_p2 = scmp.eq.s32.totalorder %s932_s22, 2 }
   0x7   : > { %p156_p3 = scmp.ne.s32.totalorder %s868_s19, %s864_s18  ;;  %p157_p4 = scmp.eq.s32.totalorder %s657_s23, 2 }
   0x8   : > { %s947_s27 = scalar_select %p138_p1, %s872_s20, %s140_s25  }
   0x9   : > { %p949_p5 = por %p151_p2, %p150_p0  ;;  %p953_p6 = por %p157_p4, %p156_p3 }
   0xa   : > { %p660_p7 = scmp.ge.s32.totalorder %s876_s21, 1  ;;  %p202_p8 = scmp.lt.s32.totalorder %s876_s21, 4 }
   0xc   : > { %p203_p9 = pnand %p660_p7, %p202_p8 }
   0xd   : > { %s662_s7 = sshll.u32 (!%p203_p9), %s932_s22, 4  ;;  %s232_s25 = sand.u32 (!%p203_p9), 1, %s868_s19  }
   0xe   : > { %206 = sbr.rel (%p203_p9) target bundleno = 258 (0x102), region = 40  ;;  %p236_p10 = scmp.lt.s32.totalorder (!%p203_p9), %s662_s7, 47 }
   0xf   : > { %s1017_s6 = sshll.u32 (!%p203_p9), %s232_s25, 7  ;;  %s691_s8 = sshll.u32 (!%p203_p9), %s932_s22, 11 }
  0x10   : > { %s1090_s12 = scalar_lea.hbm (!%p203_p9), %s1144_s5, %s691_s8  ;;  %s1099_s22 = scalar_lea.sflag (!%p203_p9), [#allocation3], %s232_s25 }
  0x11   : > { %s878_s14 = smov (!%p203_p9), [#allocation2]  }
  0x12   : > { %s820_s15 = sshll.u32 (!%p203_p9), %s878_s14, 4  ;;  %s821_s15 = int_to_ptr.vmem [resolvable:$false] %s820_s15 }
  0x13   : > { %v806_v0 = vld [vmem:[%s1140_s1 + $0x8] sm:$0xff]   ;;  %v807_v1 = vld [vmem:[%s1140_s1] sm:$0xff]   ;;  %s1152_s7 = smov (!%p236_p10, %s662_s7), 47  ;;  %vm321_vm0 = vcmask 261120  }
  0x14   : > { %741 = vmatprep.subr.bf16.mxu0 %v806_v0  ;;  %761 = vmatprep.subr.bf16.mxu1 %v806_v0  ;;  %s663_s10 = sshll.u32 %s1152_s7, 2  ;;  %v989_v14 = vld [vmem:[%s1141_s2] ss:$0 sm:$0xff]  ;;  %s1038_s7 = scalar_lea.vmem [#allocation2], %s1017_s6 }
  0x15   : > { %742 = vmatpush3.bf16.msra.mxu0 %v806_v0  ;;  %763 = vmatpush3.bf16.msra.mxu1 %v806_v0  ;;  %s239_s13 = scalar_lea.vmem %s1139_s0, %s663_s10  ;;  %s245_s16 = scalar_lea.vmem %s1143_s4, %s663_s10  ;;  %v999_v18 = vld [vmem:[%s1142_s3] ss:$0 sm:$0xff] }
  0x16   : > { %743 = vmatprep.subr.bf16.mxu0 %v807_v1  ;;  %762 = vmatprep.subr.bf16.mxu1 %v807_v1  ;;  %v808_v2 = vld [vmem:[%s239_s13] sm:$0xff]   ;;  %v810_v4 = vld [vmem:[%s239_s13 + $0x8] sm:$0xff]   ;;  %v812_v6 = vld [vmem:[%s239_s13 + $0x10] sm:$0xff]   ;;  %s583_s9 = sshll.u32 %s1038_s7, 4  ;;  %s1092_s9 = int_to_ptr.vmem [resolvable:$true] %s583_s9 }
  0x17   : > { %v809_v3 = vld [vmem:[%s239_s13 + $0x20] sm:$0xff]   ;;  %745 = vmatprep.mubr.msk.bf16.mxu0 %vm321_vm0, %v808_v2  ;;  %v811_v5 = vld [vmem:[%s239_s13 + $0x28] sm:$0xff]   ;;  %v813_v7 = vld [vmem:[%s239_s13 + $0x30] sm:$0xff]   ;;  %p823_p0 = scmp.lt.s32.totalorder %s1092_s9, %s821_s15 }
  0x18   : > { %753 = vmatprep.mubr.msk.bf16.mxu1 %vm321_vm0, %v809_v3  ;;  %v814_v8 = vld [vmem:[%s239_s13 + $0x18] sm:$0xff]   ;;  %v724_v10 = vld [vmem:[%s245_s16 + $0x8] sm:$0xff]   ;;  %v982_v12 = vld [vmem:[%s245_s16] sm:$0xff]  }
  0x19   : > { %744 = vmatpush3.bf16.msra.mxu0 %v807_v1  ;;  %764 = vmatpush3.bf16.msra.mxu1 %v807_v1  ;;  %v815_v9 = vld [vmem:[%s239_s13 + $0x38] sm:$0xff]   ;;  %v980_v11 = vld [vmem:[%s245_s16 + $0x28] sm:$0xff]   ;;  %v984_v13 = vld [vmem:[%s245_s16 + $0x20] sm:$0xff]   ;;  %v698_v19 = vunpack.c.l.bf16 %v724_v10  ;;  %v694_v21 = vunpack.c.l.bf16 %v982_v12  ;;  %v699_v27 = vunpack.c.h.bf16 %v724_v10  ;;  %v695_v29 = vunpack.c.h.bf16 %v982_v12  ;;  %s816_s13 = scalar_lea.vmem %s1092_s9, 2048 }
  0x1a   : > { %v991_v15 = vld [vmem:[%s245_s16 + $0x18] sm:$0xff]   ;;  %v714_v20 = vunpack.c.l.bf16 %v980_v11  ;;  %v710_v22 = vunpack.c.l.bf16 %v984_v13  ;;  %v1004_v23 = vld [vmem:[%s245_s16 + $0x10] sm:$0xff]   ;;  %v715_v28 = vunpack.c.h.bf16 %v980_v11  ;;  %v711_v32 = vunpack.c.h.bf16 %v984_v13  ;;  %p817_p11 = scmp.ne.s32.totalorder %s1092_s9, %s816_s13 }
  0x1b   : > { %v993_v16 = vld [vmem:[%s245_s16 + $0x38] sm:$0xff]   ;;  %v1006_v24 = vld [vmem:[%s245_s16 + $0x30] sm:$0xff]   ;;  %v706_v33 = vunpack.c.l.bf16 %v991_v15  ;;  %v702_v38 = vunpack.c.l.bf16 %v1004_v23  ;;  %v707_v43 = vunpack.c.h.bf16 %v991_v15  ;;  %v703_v49 = vunpack.c.h.bf16 %v1004_v23  ;;  %s822_s16 = scalar_lea.vmem %s821_s15, 4096 }
  0x1c   : > { %746 = vmatmul.mubr.msk.bf16.vlgmr.msra.gmra.mxu0 %vm321_vm0, %v810_v4  ;;  %754 = vmatmul.mubr.msk.bf16.vlgmr.msra.gmra.mxu1 %vm321_vm0, %v811_v5  ;;  %v722_v34 = vunpack.c.l.bf16 %v993_v16  ;;  %v718_v39 = vunpack.c.l.bf16 %v1006_v24  ;;  %v723_v44 = vunpack.c.h.bf16 %v993_v16  ;;  %v719_v54 = vunpack.c.h.bf16 %v1006_v24  ;;  %p818_p12 = pnand %p817_p11, %p949_p5  ;;  %p824_p1 = scmp.lt.s32.totalorder %s822_s16, %s816_s13 }
  0x1d   : > { %749 = vmatprep.mubr.msk.bf16.mxu0 %vm321_vm0, %v812_v6  ;;  %757 = vmatprep.mubr.msk.bf16.mxu1 %vm321_vm0, %v813_v7 }
  0x1e   : > { %p819_p13 = pneg %p818_p12  ;;  %p825_p2 = por %p824_p1, %p823_p0 }
  0x20   : > { %p826_p3 = pnand %p825_p2, %p819_p13 }
  0x24   : > { %750 = vmatmul.mubr.msk.bf16.gmra.mxu0 %vm321_vm0, %v814_v8  ;;  %758 = vmatmul.mubr.msk.bf16.gmra.mxu1 %vm321_vm0, %v815_v9 }
  0xdc   : > { %v747_v17 = vpop.f32.mrf.mxu0  ;;  %v755_v26 = vpop.f32.mrf.mxu1 }
  0xdd   : > { %v452_v25 = vmul.f32 %v747_v17, %v989_v14  ;;  %v460_v30 = vmul.f32 %v755_v26, %v989_v14 }
  0xde   : > { %v380_v31 = vpop.f32.mrf.mxu0  ;;  %v412_v37 = vpop.f32.mrf.mxu1 }
  0xdf   : > { %v475_v35 = vadd.f32 %v999_v18, %v452_v25  ;;  %v450_v36 = vmul.f32 %v989_v14, %v380_v31  ;;  %v483_v40 = vadd.f32 %v999_v18, %v460_v30  ;;  %v458_v41 = vmul.f32 %v989_v14, %v412_v37 }
  0xe0   : > { %v748_v42 = vpop.f32.mrf.mxu0  ;;  %v756_v48 = vpop.f32.mrf.mxu1 }
  0xe1   : > { %v523_v45 = vadd.f32 %v698_v19, %v475_v35  ;;  %v473_v46 = vadd.f32 %v999_v18, %v450_v36  ;;  %v453_v47 = vmul.f32 %v748_v42, %v989_v14  ;;  %v531_v50 = vadd.f32 %v714_v20, %v483_v40 }
  0xe2   : > { %v481_v51 = vadd.f32 %v999_v18, %v458_v41  ;;  %v461_v52 = vmul.f32 %v756_v48, %v989_v14  ;;  %v383_v53 = vpop.f32.mrf.mxu0  ;;  %v415_v59 = vpop.f32.mrf.mxu1 }
  0xe3   : > { %v539_v55 = vmax.f32 %v523_v45, 0.0  ;;  %v521_v56 = vadd.f32 %v694_v21, %v473_v46  ;;  %v476_v57 = vadd.f32 %v999_v18, %v453_v47  ;;  %v451_v58 = vmul.f32 %v989_v14, %v383_v53 }
  0xe4   : > { %v547_v60 = vmax.f32 %v531_v50, 0.0  ;;  %v529_v61 = vadd.f32 %v710_v22, %v481_v51  ;;  %v484_v62 = vadd.f32 %v999_v18, %v461_v52  ;;  %v459_v63 = vmul.f32 %v989_v14, %v415_v59  ;;  %v751_v0 = vpop.f32.mrf.mxu0  ;;  %v759_v5 = vpop.f32.mrf.mxu1 }
  0xe5   : > { %555 = vst [vmem:[%s1038_s7 + $0x10] sm:$0xff] %v539_v55  ;;  %v537_v1 = vmax.f32 %v521_v56, 0.0  ;;  %v524_v2 = vadd.f32 %v699_v27, %v476_v57  ;;  %v474_v3 = vadd.f32 %v999_v18, %v451_v58  ;;  %v456_v4 = vmul.f32 %v751_v0, %v989_v14 }
  0xe6   : > { %563 = vst [vmem:[%s1038_s7 + $0x50] sm:$0xff] %v547_v60  ;;  %v545_v6 = vmax.f32 %v529_v61, 0.0  ;;  %v532_v7 = vadd.f32 %v715_v28, %v484_v62  ;;  %v482_v8 = vadd.f32 %v999_v18, %v459_v63  ;;  %v464_v9 = vmul.f32 %v759_v5, %v989_v14  ;;  %v396_v10 = vpop.f32.mrf.mxu0  ;;  %v428_v19 = vpop.f32.mrf.mxu1 }
  0xe7   : > { %553 = vst [vmem:[%s1038_s7] sm:$0xff] %v537_v1  ;;  %v540_v11 = vmax.f32 %v524_v2, 0.0  ;;  %v522_v12 = vadd.f32 %v695_v29, %v474_v3  ;;  %v479_v13 = vadd.f32 %v999_v18, %v456_v4  ;;  %v454_v17 = vmul.f32 %v989_v14, %v396_v10 }
  0xe8   : > { %561 = vst [vmem:[%s1038_s7 + $0x40] sm:$0xff] %v545_v6  ;;  %v548_v20 = vmax.f32 %v532_v7, 0.0  ;;  %v530_v21 = vadd.f32 %v711_v32, %v482_v8  ;;  %v487_v22 = vadd.f32 %v999_v18, %v464_v9  ;;  %v462_v25 = vmul.f32 %v989_v14, %v428_v19  ;;  %v752_v26 = vpop.f32.mrf.mxu0  ;;  %v760_v31 = vpop.f32.mrf.mxu1 }
  0xe9   : > { %556 = vst [vmem:[%s1038_s7 + $0x18] sm:$0xff] %v540_v11  ;;  %v538_v27 = vmax.f32 %v522_v12, 0.0  ;;  %v527_v28 = vadd.f32 %v706_v33, %v479_v13  ;;  %v477_v29 = vadd.f32 %v999_v18, %v454_v17  ;;  %v457_v30 = vmul.f32 %v752_v26, %v989_v14 }
  0xea   : > { %564 = vst [vmem:[%s1038_s7 + $0x58] sm:$0xff] %v548_v20  ;;  %v546_v35 = vmax.f32 %v530_v21, 0.0  ;;  %v535_v32 = vadd.f32 %v722_v34, %v487_v22  ;;  %v485_v36 = vadd.f32 %v999_v18, %v462_v25  ;;  %v465_v37 = vmul.f32 %v760_v31, %v989_v14  ;;  %v399_v40 = vpop.f32.mrf.mxu0  ;;  %v431_v46 = vpop.f32.mrf.mxu1 }
  0xeb   : > { %554 = vst [vmem:[%s1038_s7 + $0x8] sm:$0xff] %v538_v27  ;;  %v543_v33 = vmax.f32 %v527_v28, 0.0  ;;  %v525_v41 = vadd.f32 %v702_v38, %v477_v29  ;;  %v480_v42 = vadd.f32 %v999_v18, %v457_v30  ;;  %v455_v45 = vmul.f32 %v989_v14, %v399_v40 }
  0xec   : > { %562 = vst [vmem:[%s1038_s7 + $0x48] sm:$0xff] %v546_v35  ;;  %v551_v34 = vmax.f32 %v535_v32, 0.0  ;;  %v533_v47 = vadd.f32 %v718_v39, %v485_v36  ;;  %v488_v48 = vadd.f32 %v999_v18, %v465_v37  ;;  %v463_v50 = vmul.f32 %v989_v14, %v431_v46 }
  0xed   : > { %559 = vst [vmem:[%s1038_s7 + $0x30] sm:$0xff] %v543_v33  ;;  %v541_v38 = vmax.f32 %v525_v41, 0.0  ;;  %v528_v51 = vadd.f32 %v707_v43, %v480_v42  ;;  %v478_v52 = vadd.f32 %v999_v18, %v455_v45 }
  0xee   : > { %567 = vst [vmem:[%s1038_s7 + $0x70] sm:$0xff] %v551_v34  ;;  %v549_v53 = vmax.f32 %v533_v47, 0.0  ;;  %v536_v55 = vadd.f32 %v723_v44, %v488_v48  ;;  %v486_v39 = vadd.f32 %v999_v18, %v463_v50 }
  0xef   : > { %557 = vst [vmem:[%s1038_s7 + $0x20] sm:$0xff] %v541_v38  ;;  %v544_v14 = vmax.f32 %v528_v51, 0.0  ;;  %v526_v15 = vadd.f32 %v703_v49, %v478_v52 }
  0xf0   : > { %565 = vst [vmem:[%s1038_s7 + $0x60] sm:$0xff] %v549_v53  ;;  %v552_v43 = vmax.f32 %v536_v55, 0.0  ;;  %v534_v56 = vadd.f32 %v719_v54, %v486_v39 }
  0xf1   : > { %560 = vst [vmem:[%s1038_s7 + $0x38] sm:$0xff] %v544_v14  ;;  %v542_v16 = vmax.f32 %v526_v15, 0.0 }
  0xf2   : > { %568 = vst [vmem:[%s1038_s7 + $0x78] sm:$0xff] %v552_v43  ;;  %v550_v18 = vmax.f32 %v534_v56, 0.0 }
  0xf3   : > { %558 = vst [vmem:[%s1038_s7 + $0x28] sm:$0xff] %v542_v16 }
  0xf4   : > { %566 = vst [vmem:[%s1038_s7 + $0x68] sm:$0xff] %v550_v18 }
  0xf5   : > { %829 = shalt.err (!%p826_p3)
}
  0xf6   : > { %s830_s17 = scalar_lea.hbm %s1090_s12, 2048  ;;  %s834_s26 = scalar_lea.hbm %s1144_s5, 6144 }
  0xf7   : > { %p831_p4 = scmp.ne.s32.totalorder %s1090_s12, %s830_s17  ;;  %p835_p9 = scmp.lt.s32.totalorder %s1090_s12, %s1144_s5 }
  0xf8   : > { %p836_p10 = scmp.lt.s32.totalorder %s834_s26, %s830_s17 }
  0xf9   : > { %p832_p7 = pnand %p831_p4, %p949_p5 }
  0xfa   : > { %p837_p11 = por %p836_p10, %p835_p9 }
  0xfb   : > { %p833_p8 = pneg %p832_p7 }
  0xfd   : > { %p838_p12 = pnand %p837_p11, %p833_p8 }
  0xff   : > { %841 = shalt.err (!%p838_p12)
}
 0x100   : > { %s879_s7 = smov 128   ;;  %s880_s8 = smov 8  }
 0x101   : > { %765 = dma.vmem_to_hbm [thread:$0]  (%p949_p5), %s1092_s9, 2048, %s1090_s12, %s1099_s22, %s879_s7, %s879_s7, %s880_s8  }
 0x102 PF: > { %p771_p13 = scmp.ge.s32.totalorder %s876_s21, 2  ;;  %s598_s10 = sand.u32 1, %s864_s18  }
 0x103   : > { %s599_s11 = scalar_lea.sflag [#allocation3], %s598_s10 }
 0x104   : > { %p768_p0 = pnand %p771_p13, %p953_p6 }
 0x106   : > { %p769_p1 = pneg %p768_p0 }
 0x108   : > { %859 = dma.done.wait (%p769_p1), %s599_s11, 2048  }
 0x109   : > { %861 = vsyncadd (%p769_p1), %s599_s11, 4294965248  ;;  %p15_p2 = scmp.ge.s32.totalorder %s936_s24, 5   ;;  %s1147_s18 = smov %s868_s19 }
 0x10a   : > { %s1148_s19 = smov %s872_s20  ;;  %s1149_s20 = smov %s947_s27 }
 0x10b   : > { %s1150_s21 = smov %s936_s24  ;;  %17 = sbr.rel (!%p15_p2) target bundleno = 3 (0x3), region = 78 }
 0x110   :  { %604 = vsyncpa [#allocation3], 1 }
 0x111   :  { %606 = vsyncpa [#allocation3 + $0x1], 1 }

// kernel: bottleneck3d_forward.5
= control target key start
LH: loop header
LB: loop body
LE: loop exit
PB: predicated region body
PF: predicated region fallthrough
CT: control target
= control target key end

     0   :  { %s2594_s15 = smov 0   ;;  %s2596_s16 = smov 0   ;;  %s2960_s0 = inlined_call_operand.vmem [shape: bf16[2,8,36,9,32], index: 0, kind: input, shape index: {}]   ;;  %s2961_s1 = inlined_call_operand.vmem [shape: bf16[3,9,32,32], index: 1, kind: input, shape index: {}]   ;;  %s2962_s2 = inlined_call_operand.vmem [shape: f32[1,32], index: 2, kind: input, shape index: {}]   ;;  %s2963_s3 = inlined_call_operand.vmem [shape: f32[1,32], index: 3, kind: input, shape index: {}]   ;;  %s2964_s4 = inlined_call_operand.vmem [shape: bf16[2,3,64,32], index: 4, kind: output, shape index: {}]  }
   0x1   :  { %s2598_s17 = smov 0   ;;  %s2600_s18 = smov 0  }
   0x2   :  { %s2602_s19 = smov 0   ;;  %s2604_s20 = smov 0  }
   0x3   :  { %s2606_s21 = smov 0  }
   0x4 LB: > { %s26_s22 = sadd.s32 1, %s2554_s18  ;;  %s29_s23 = sadd.s32 1, %s2558_s19  ;;  %s2566_s21 = sphi %s2606_s21, %s14_s21   ;;  %s2562_s20 = sphi %s2604_s20, %s2974_s20   ;;  %s2558_s19 = sphi %s2602_s19, %s2973_s19   ;;  %s2554_s18 = sphi %s2600_s18, %s2972_s18   ;;  %s2550_s17 = sphi %s2598_s17, %s2971_s17   ;;  %s2546_s16 = sphi %s2596_s16, %s2970_s16   ;;  %s2542_s15 = sphi %s2594_s15, %s2969_s15  }
   0x5   : > { %p27_p0 = scmp.ge.s32.totalorder %s26_s22, 3  ;;  %p2021_p1 = scmp.ge.s32.totalorder %s2566_s21, 1 }
   0x6   : > { %p207_p2 = scmp.lt.s32.totalorder %s2566_s21, 19  ;;  %s33_s24 = sadd.s32 1, %s2562_s20 }
   0x7   : > { %s2976_s22 = smov (%p27_p0, %s26_s22), 0  ;;  %s2978_s23 = smov (!%p27_p0, %s29_s23), %s2558_s19 }
   0x8   : > { %p208_p3 = pnand %p2021_p1, %p207_p2  ;;  %p31_p4 = scmp.ge.s32.totalorder %s2978_s23, 3 }
   0x9   : > { %s2022_s25 = sshll.u32 (!%p208_p3), %s2546_s16, 1  ;;  %p250_p6 = scmp.lt.s32.totalorder (!%p208_p3), %s2550_s17, 1 }
   0xa   : > { %s2980_s23 = smov (%p31_p4, %s2978_s23), 0  ;;  %s2982_s24 = smov (!%p31_p4, %s33_s24), %s2562_s20 }
   0xb   : > { %p35_p5 = scmp.ge.s32.totalorder %s2982_s24, 2  ;;  %211 = sbr.rel (%p208_p3) target bundleno = 327 (0x147), region = 36 }
   0xc   : > { %s249_s26 = sadd.s32 (!%p208_p3), %s2542_s15, %s2022_s25  ;;  %p261_p7 = scmp.lt.s32.totalorder (!%p208_p3), %s2542_s15, 2 }
   0xd   : > { %s2984_s24 = smov (%p35_p5, %s2982_s24), 0  ;;  %p252_p8 = scmp.lt.s32.totalorder (!%p208_p3), %s249_s26, 7 }
   0xe   : > { %2965 = sst [smem:[#allocation3_spill]] %s2984_s24  ;;  %p268_p9 = scmp.lt.s32.totalorder (!%p208_p3), %s2546_s16, 2 }
   0xf   : > { %p2027_p10 = scmp.ne.s32.totalorder (!%p208_p3), %s2542_s15, 0 }
  0x10   : > { %s2986_s17 = smov (!%p250_p6, %s2550_s17), 1  ;;  %s2988_s26 = smov (!%p252_p8, %s249_s26), 7 }
  0x11   : > { %s2410_s27 = smul.u32 576, %s2986_s17  ;;  %s2990_s16 = smov (!%p268_p9, %s2546_s16), 2 }
  0x12   : > { %s262_s28 = scalar_select %p261_p7, %s2542_s15, 2 }
  0x13   : > { %s2409_s29 = smul.u32 72, %s2988_s26  ;;  %s2025_s14 = sshll.u32 %s2990_s16, 3 }
  0x14   : > { %s2411_s30 = smul.u32 144, %s262_s28 }
  0x15   : > { %s256_s5 = sadd.s32 %s2410_s27, %s2409_s29  ;;  %s2412_s13 = smul.u32 24, %s2986_s17 }
  0x16   : > { %s2023_s6 = sshll.u32 %s256_s5, 2  ;;  %s2648_s9 = scalar_lea.vmem %s2961_s1, %s2411_s30 }
  0x17   : > { %s2653_s12 = scalar_lea.vmem %s2960_s0, %s2023_s6  ;;  %s272_s25 = sadd.s32 %s2412_s13, %s2025_s14 }
  0x18   : > { %s2026_s24 = sshll.u32 %s272_s25, 2  ;;  %279 = sbr.rel (%p2027_p10) target bundleno = 34 (0x22), region = 40 }
  0x19   : > { %s2659_s27 = scalar_lea.vmem %s2964_s4, %s2026_s24 }
  0x1d   : > { %vm280_vm0 = vcmask 261120   ;;  %v2568_v0 = vmov 0.0  }
  0x1e   : > { %281 = vst.msk [vmem:[#allocation2] sm:$0xff] %vm280_vm0, %v2568_v0  ;;  %282 = vst.msk [vmem:[#allocation2 + $0x8] sm:$0xff] %vm280_vm0, %v2568_v0 }
  0x1f   : > { %283 = vst.msk [vmem:[#allocation2 + $0x10] sm:$0xff] %vm280_vm0, %v2568_v0  ;;  %284 = vst.msk [vmem:[#allocation2 + $0x18] sm:$0xff] %vm280_vm0, %v2568_v0 }
  0x20   : > { %285 = vst.msk [vmem:[#allocation2 + $0x20] sm:$0xff] %vm280_vm0, %v2568_v0  ;;  %286 = vst.msk [vmem:[#allocation2 + $0x28] sm:$0xff] %vm280_vm0, %v2568_v0 }
  0x21   : > { %287 = vst.msk [vmem:[#allocation2 + $0x30] sm:$0xff] %vm280_vm0, %v2568_v0  ;;  %288 = vst.msk [vmem:[#allocation2 + $0x38] sm:$0xff] %vm280_vm0, %v2568_v0 }
  0x22 PF: > { %v2470_v1 = vld [vmem:[%s2648_s9 + $0x8] sm:$0xff]   ;;  %v2471_v2 = vld [vmem:[%s2648_s9] sm:$0xff]   ;;  %vm341_vm1 = vcmask 261120   ;;  %v2474_v5 = vld [vmem:[%s2653_s12 + $0x10] ss:$8 sps:$4 sm:$0xff]   ;;  %p2222_p11 = scmp.ne.s32.totalorder %s2542_s15, 2 }
  0x23   : > { %2297 = vmatprep.subr.bf16.mxu0 %v2470_v1  ;;  %2405 = vmatprep.subr.bf16.mxu1 %v2470_v1  ;;  %v2472_v3 = vld [vmem:[%s2653_s12] ss:$8 sps:$4 sm:$0xff]   ;;  %v2475_v6 = vld [vmem:[%s2653_s12 + $0x30] ss:$8 sps:$4 sm:$0xff]   ;;  %v559_v13 = vld [vmem:[%s2653_s12 + $0x4] sm:$0x1] }
  0x24   : > { %2298 = vmatpush3.bf16.msra.mxu0 %v2470_v1  ;;  %2407 = vmatpush3.bf16.msra.mxu1 %v2470_v1  ;;  %v2473_v4 = vld [vmem:[%s2653_s12 + $0x20] ss:$8 sps:$4 sm:$0xff]   ;;  %v2476_v7 = vld [vmem:[%s2648_s9 + $0x18] sm:$0xff]   ;;  %v2478_v9 = vld [vmem:[%s2648_s9 + $0x10] sm:$0xff]   ;;  %vm574_vm2 = vsmask.f32 3328 }
  0x25   : > { %2299 = vmatprep.subr.bf16.mxu0 %v2471_v2  ;;  %2406 = vmatprep.subr.bf16.mxu1 %v2471_v2  ;;  %v2477_v8 = vld [vmem:[%s2648_s9 + $0x28] sm:$0xff]   ;;  %v2479_v10 = vld [vmem:[%s2648_s9 + $0x20] sm:$0xff]   ;;  %vm575_vm3 = vsmask.f32 7440  ;;  %v587_v18 = vshll.u32 %v559_v13, 16  ;;  %v2482_v37 = vld [vmem:[%s2648_s9 + $0x38] sm:$0xff]  }
  0x26   : > { %2301 = vmatprep.mubr.msk.bf16.mxu0 %vm341_vm1, %v2472_v3  ;;  %2305 = vmatprep.mubr.msk.bf16.mxu1 %vm341_vm1, %v2473_v4  ;;  %v2480_v11 = vld [vmem:[%s2653_s12 + $0x48] ss:$8 sps:$4 sm:$0xff]   ;;  %v558_v12 = vld [vmem:[%s2653_s12] sm:$0xf]  ;;  %v561_v15 = vld [vmem:[%s2653_s12 + $0xc] sm:$0x1] }
  0x27   : > { %v560_v14 = vld [vmem:[%s2653_s12 + $0x8] sm:$0xf]  ;;  %v578_v16 = vshrl.u32 %v558_v12, 16  ;;  %v581_v17 = vshll.u32 %v558_v12, 16  ;;  %v601_v21 = vshll.u32 %v561_v15, 16  ;;  %v589_v25 = vrot.slane %v587_v18, 5  ;;  %vm2690_vm4 = vmor %vm574_vm2, %vm575_vm3 }
  0x28   : > { %2300 = vmatpush3.bf16.msra.mxu0 %v2471_v2  ;;  %2408 = vmatpush3.bf16.msra.mxu1 %v2471_v2  ;;  %v592_v19 = vshrl.u32 %v560_v14, 16  ;;  %v595_v20 = vshll.u32 %v560_v14, 16  ;;  %v2481_v22 = vld [vmem:[%s2653_s12 + $0x58] ss:$8 sps:$4 sm:$0xff]   ;;  %v562_v27 = vld [vmem:[%s2653_s12 + $0x10] sm:$0xf] }
  0x29   : > { %2309 = vmatprep.subr.bf16.mxu1 %v2476_v7  ;;  %2321 = vmatprep.subr.bf16.mxu0 %v2477_v8  ;;  %v580_v23 = vrot.slane %v578_v16, 4  ;;  %v583_v24 = vrot.slane %v581_v17, 5  ;;  %v603_v29 = vrot.slane %v601_v21, 5  ;;  %v563_v30 = vld [vmem:[%s2653_s12 + $0x14] sm:$0x1]  ;;  %v606_v34 = vshrl.u32 %v562_v27, 16 }
  0x2a   : > { %v594_v26 = vrot.slane %v592_v19, 4  ;;  %v597_v28 = vrot.slane %v595_v20, 5  ;;  %v564_v31 = vld [vmem:[%s2653_s12 + $0x18] sm:$0xf]  ;;  %v565_v33 = vld [vmem:[%s2653_s12 + $0x1c] sm:$0x1] }
  0x2b   : > { %2302 = vmatmul.mubr.msk.bf16.vlgmr.msra.gmra.mxu0 %vm341_vm1, %v2474_v5  ;;  %2306 = vmatmul.mubr.msk.bf16.vlgmr.msra.gmra.mxu1 %vm341_vm1, %v2475_v6  ;;  %v584_v32 = vor.u32 %v583_v24, %v580_v23  ;;  %v609_v35 = vshll.u32 %v562_v27, 16  ;;  %v615_v36 = vshll.u32 %v563_v30, 16  ;;  %v620_v40 = vshrl.u32 %v564_v31, 16  ;;  %v2483_v43 = vld [vmem:[%s2648_s9 + $0x48] sm:$0xff]   ;;  %v566_v57 = vld [vmem:[%s2653_s12 + $0x20] sm:$0xf] }
  0x2c   : > { %2310 = vmatpush3.bf16.msra.mxu1 %v2476_v7  ;;  %2322 = vmatpush3.bf16.msra.mxu0 %v2477_v8  ;;  %v598_v39 = vor.u32 %v597_v28, %v594_v26  ;;  %v623_v41 = vshll.u32 %v564_v31, 16  ;;  %v629_v42 = vshll.u32 %v565_v33, 16  ;;  %v608_v45 = vrot.slane %v606_v34, 4  ;;  %v2484_v56 = vld [vmem:[%s2653_s12 + $0x68] ss:$8 sps:$4 sm:$0xff]   ;;  %v2487_v14 = vld [vmem:[%s2648_s9 + $0x40] sm:$0xff]  }
  0x2d   : > { %2311 = vmatprep.subr.bf16.mxu1 %v2478_v9  ;;  %2323 = vmatprep.subr.bf16.mxu0 %v2479_v10  ;;  %v585_v44 = vrot.slane %v584_v32, 4  ;;  %v611_v46 = vrot.slane %v609_v35, 5  ;;  %v617_v47 = vrot.slane %v615_v36, 5  ;;  %v622_v49 = vrot.slane %v620_v40, 4  ;;  %v567_v58 = vld [vmem:[%s2653_s12 + $0x24] sm:$0x1] }
  0x2e   : > { %2313 = vmatprep.mubr.msk.bf16.mxu1 %vm341_vm1, %v2480_v11  ;;  %v599_v48 = vrot.slane %v598_v39, 4  ;;  %v625_v50 = vrot.slane %v623_v41, 5  ;;  %v631_v51 = vrot.slane %v629_v42, 5  ;;  %v568_v61 = vld [vmem:[%s2653_s12 + $0x28] sm:$0xf]  ;;  %v634_v63 = vshrl.u32 %v566_v57, 16 }
  0x2f   : > { %v590_v52 = vsel %vm2690_vm4, %v585_v44, %v589_v25  ;;  %v612_v53 = vor.u32 %v611_v46, %v608_v45  ;;  %v569_v62 = vld [vmem:[%s2653_s12 + $0x2c] sm:$0x1]  ;;  %v637_v1 = vshll.u32 %v566_v57, 16  ;;  %v643_v2 = vshll.u32 %v567_v58, 16  ;;  %v2486_v8 = vld [vmem:[%s2648_s9 + $0x30] sm:$0xff]  }
  0x30   : > { %2312 = vmatpush3.bf16.msra.mxu1 %v2478_v9  ;;  %2324 = vmatpush3.bf16.msra.mxu0 %v2479_v10  ;;  %v604_v54 = vsel %vm2690_vm4, %v599_v48, %v603_v29  ;;  %v626_v55 = vor.u32 %v625_v50, %v622_v49  ;;  %v648_v3 = vshrl.u32 %v568_v61, 16  ;;  %v636_v5 = vrot.slane %v634_v63, 4  ;;  %v2485_v13 = vld [vmem:[%s2653_s12 + $0x78] ss:$8 sps:$4 sm:$0xff]   ;;  %v570_v18 = vld [vmem:[%s2653_s12 + $0x30] sm:$0xf] }
  0x31   : > { %2333 = vmatprep.subr.bf16.mxu1 %v2482_v37  ;;  %2345 = vmatprep.subr.bf16.mxu0 %v2483_v43  ;;  %v2064_v59 = vcombine.low %v590_v52, %v604_v54  ;;  %v613_v60 = vrot.slane %v612_v53, 4  ;;  %v651_v6 = vshll.u32 %v568_v61, 16  ;;  %v657_v7 = vshll.u32 %v569_v62, 16  ;;  %v571_v19 = vld [vmem:[%s2653_s12 + $0x34] sm:$0x1]  ;;  %v2492_v29 = vld [vmem:[%s2648_s9 + $0x58] sm:$0xff]  }
  0x32   : > { %v627_v0 = vrot.slane %v626_v55, 4  ;;  %v639_v10 = vrot.slane %v637_v1, 5  ;;  %v645_v11 = vrot.slane %v643_v2, 5  ;;  %v650_v12 = vrot.slane %v648_v3, 4  ;;  %v572_v21 = vld [vmem:[%s2653_s12 + $0x38] sm:$0xf] }
  0x33   : > { %2314 = vmatmul.mubr.msk.bf16.vlgmr.msra.gmra.mxu1 %vm341_vm1, %v2481_v22  ;;  %2325 = vmatprep.mubr.msk.bf16.mxu0 %vm341_vm1, %v2064_v59  ;;  %v618_v4 = vsel %vm2690_vm4, %v613_v60, %v617_v47  ;;  %v653_v16 = vrot.slane %v651_v6, 5  ;;  %v659_v17 = vrot.slane %v657_v7, 5  ;;  %v573_v22 = vld [vmem:[%s2653_s12 + $0x3c] sm:$0x1]  ;;  %v662_v23 = vshrl.u32 %v570_v18, 16  ;;  %v2493_v42 = vld [vmem:[%s2648_s9 + $0x68] sm:$0xff]  }
  0x34   : > { %2334 = vmatpush3.bf16.msra.mxu1 %v2482_v37  ;;  %2317 = vmatprep.mubr.msk.bf16.mxu1 %vm341_vm1, %v2484_v56  ;;  %v632_v9 = vsel %vm2690_vm4, %v627_v0, %v631_v51  ;;  %v640_v20 = vor.u32 %v639_v10, %v636_v5  ;;  %v665_v24 = vshll.u32 %v570_v18, 16  ;;  %v671_v26 = vshll.u32 %v571_v19, 16  ;;  %v2488_v45 = vld [vmem:[%s2653_s12 + $0x90] ss:$8 sps:$4 sm:$0xff]   ;;  %v2490_v51 = vld [vmem:[%s2653_s12 + $0xa0] ss:$8 sps:$4 sm:$0xff]  }
  0x35   : > { %v2065_v15 = vcombine.low %v618_v4, %v632_v9  ;;  %2335 = vmatprep.subr.bf16.mxu1 %v2486_v8  ;;  %v654_v25 = vor.u32 %v653_v16, %v650_v12  ;;  %v676_v27 = vshrl.u32 %v572_v21, 16  ;;  %v679_v28 = vshll.u32 %v572_v21, 16  ;;  %v2498_v49 = vld [vmem:[%s2648_s9 + $0x50] sm:$0xff]   ;;  %v2489_v53 = vld [vmem:[%s2653_s12 + $0xd8] ss:$8 sps:$4 sm:$0xff]  }
  0x36   : > { %v641_v30 = vrot.slane %v640_v20, 4  ;;  %v664_v31 = vrot.slane %v662_v23, 4  ;;  %v667_v32 = vrot.slane %v665_v24, 5  ;;  %v685_v33 = vshll.u32 %v573_v22, 16  ;;  %v2494_v55 = vld [vmem:[%s2653_s12 + $0xb0] ss:$8 sps:$4 sm:$0xff]  }
  0x37   : > { %2326 = vmatmul.mubr.msk.bf16.vlgmr.msra.gmra.mxu0 %vm341_vm1, %v2065_v15  ;;  %v655_v34 = vrot.slane %v654_v25, 4  ;;  %v673_v35 = vrot.slane %v671_v26, 5  ;;  %v678_v36 = vrot.slane %v676_v27, 4  ;;  %v681_v37 = vrot.slane %v679_v28, 5  ;;  %v2491_v56 = vld [vmem:[%s2653_s12 + $0xe8] ss:$8 sps:$4 sm:$0xff]  }
  0x38   : > { %2336 = vmatpush3.bf16.msra.mxu1 %v2486_v8  ;;  %2346 = vmatpush3.bf16.msra.mxu0 %v2483_v43  ;;  %v646_v39 = vsel %vm2690_vm4, %v641_v30, %v645_v11  ;;  %v668_v40 = vor.u32 %v667_v32, %v664_v31  ;;  %v687_v41 = vrot.slane %v685_v33, 5  ;;  %v2496_v57 = vld [vmem:[%s2653_s12 + $0xc0] ss:$8 sps:$4 sm:$0xff]   ;;  %v2118_v60 = vld [vmem:[%s2653_s12 + $0x90] sm:$0xf]  ;;  %v2502_v24 = vld [vmem:[%s2648_s9 + $0x78] sm:$0xff]  }
  0x39   : > { %2347 = vmatprep.subr.bf16.mxu0 %v2487_v14  ;;  %2357 = vmatprep.subr.bf16.mxu1 %v2492_v29  ;;  %v660_v43 = vsel %vm2690_vm4, %v655_v34, %v659_v17  ;;  %v682_v44 = vor.u32 %v681_v37, %v678_v36  ;;  %v2495_v58 = vld [vmem:[%s2653_s12 + $0xf8] ss:$8 sps:$4 sm:$0xff]   ;;  %v2119_v61 = vld [vmem:[%s2653_s12 + $0x94] sm:$0x1]  ;;  %v2121_v63 = vld [vmem:[%s2653_s12 + $0x9c] sm:$0x1] }
  0x3a   : > { %v2066_v46 = vcombine.low %v646_v39, %v660_v43  ;;  %v669_v47 = vrot.slane %v668_v40, 4  ;;  %v2499_v59 = vld [vmem:[%s2648_s9 + $0x60] sm:$0xff]   ;;  %v2120_v62 = vld [vmem:[%s2653_s12 + $0x98] sm:$0xf]  ;;  %v1082_v0 = vshrl.u32 %v2118_v60, 16  ;;  %v1085_v1 = vshll.u32 %v2118_v60, 16 }
  0x3b   : > { %2318 = vmatmul.mubr.msk.bf16.gmra.mxu1 %vm341_vm1, %v2485_v13  ;;  %v683_v48 = vrot.slane %v682_v44, 4  ;;  %v1091_v2 = vshll.u32 %v2119_v61, 16  ;;  %v1096_v3 = vshrl.u32 %v2120_v62, 16  ;;  %v1099_v4 = vshll.u32 %v2120_v62, 16  ;;  %v2122_v12 = vld [vmem:[%s2653_s12 + $0xa0] sm:$0xf] }
  0x3c   : > { %2348 = vmatpush3.bf16.msra.mxu0 %v2487_v14  ;;  %2337 = vmatprep.mubr.msk.bf16.mxu1 %vm341_vm1, %v2488_v45  ;;  %v674_v50 = vsel %vm2690_vm4, %v669_v47, %v673_v35  ;;  %v1105_v5 = vshll.u32 %v2121_v63, 16  ;;  %v1084_v6 = vrot.slane %v1082_v0, 4  ;;  %v1087_v7 = vrot.slane %v1085_v1, 5  ;;  %v2123_v13 = vld [vmem:[%s2653_s12 + $0xa4] sm:$0x1]  ;;  %v2503_v37 = vld [vmem:[%s2648_s9 + $0x88] sm:$0xff]  }
  0x3d   : > { %2369 = vmatprep.subr.bf16.mxu0 %v2493_v42  ;;  %2329 = vmatprep.mubr.msk.bf16.mxu0 %vm341_vm1, %v2066_v46  ;;  %v688_v52 = vsel %vm2690_vm4, %v683_v48, %v687_v41  ;;  %v1093_v8 = vrot.slane %v1091_v2, 5  ;;  %v1098_v9 = vrot.slane %v1096_v3, 4  ;;  %v1101_v10 = vrot.slane %v1099_v4, 5  ;;  %v2124_v15 = vld [vmem:[%s2653_s12 + $0xa8] sm:$0xf]  ;;  %v2506_v61 = vld [vmem:[%s2648_s9 + $0x70] sm:$0xff]  }
  0x3e   : > { %v2067_v54 = vcombine.low %v674_v50, %v688_v52  ;;  %v1107_v11 = vrot.slane %v1105_v5, 5  ;;  %v1088_v14 = vor.u32 %v1087_v7, %v1084_v6  ;;  %v2125_v16 = vld [vmem:[%s2653_s12 + $0xac] sm:$0x1]  ;;  %v1110_v17 = vshrl.u32 %v2122_v12, 16  ;;  %v2497_v19 = vld [vmem:[%s2653_s12 + $0x108] ss:$8 sps:$4 sm:$0xff]  }
  0x3f   : > { %v1113_v18 = vshll.u32 %v2122_v12, 16  ;;  %v1102_v20 = vor.u32 %v1101_v10, %v1098_v9  ;;  %v1119_v21 = vshll.u32 %v2123_v13, 16  ;;  %v1124_v22 = vshrl.u32 %v2124_v15, 16  ;;  %v2500_v30 = vld [vmem:[%s2653_s12 + $0x8] ss:$8 sps:$4 sm:$0xff]  }
  0x40   : > { %2330 = vmatmul.mubr.msk.bf16.gmra.mxu0 %vm341_vm1, %v2067_v54  ;;  %v1127_v23 = vshll.u32 %v2124_v15, 16  ;;  %v1089_v25 = vrot.slane %v1088_v14, 4  ;;  %v1112_v26 = vrot.slane %v1110_v17, 4  ;;  %v1133_v28 = vshll.u32 %v2125_v16, 16  ;;  %v2126_v41 = vld [vmem:[%s2653_s12 + $0xb0] sm:$0xf] }
  0x41   : > { %2349 = vmatprep.mubr.msk.bf16.mxu0 %vm341_vm1, %v2489_v53  ;;  %v1115_v27 = vrot.slane %v1113_v18, 5  ;;  %v1121_v31 = vrot.slane %v1119_v21, 5  ;;  %v1126_v32 = vrot.slane %v1124_v22, 4  ;;  %v2127_v44 = vld [vmem:[%s2653_s12 + $0xb4] sm:$0x1]  ;;  %v1138_v46 = vshrl.u32 %v2126_v41, 16 }
  0x42   : > { %v1129_v33 = vrot.slane %v1127_v23, 5  ;;  %v1094_v34 = vsel %vm2690_vm4, %v1089_v25, %v1093_v8  ;;  %v1135_v36 = vrot.slane %v1133_v28, 5  ;;  %v2128_v45 = vld [vmem:[%s2653_s12 + $0xb8] sm:$0xf]  ;;  %v2129_v48 = vld [vmem:[%s2653_s12 + $0xbc] sm:$0x1] }
  0x43   : > { %2338 = vmatmul.mubr.msk.bf16.vlgmr.msra.gmra.mxu1 %vm341_vm1, %v2490_v51  ;;  %v1116_v35 = vor.u32 %v1115_v27, %v1112_v26  ;;  %v1147_v50 = vshll.u32 %v2127_v44, 16  ;;  %v1152_v51 = vshrl.u32 %v2128_v45, 16  ;;  %v1140_v53 = vrot.slane %v1138_v46, 4  ;;  %v2504_v1 = vld [vmem:[%s2653_s12 + $0x28] ss:$8 sps:$4 sm:$0xff]  }
  0x44   : > { %2358 = vmatpush3.bf16.msra.mxu1 %v2492_v29  ;;  %2341 = vmatprep.mubr.msk.bf16.mxu1 %vm341_vm1, %v2494_v55  ;;  %v1103_v29 = vrot.slane %v1102_v20, 4  ;;  %v1130_v40 = vor.u32 %v1129_v33, %v1126_v32  ;;  %v1155_v54 = vshll.u32 %v2128_v45, 16  ;;  %v1161_v55 = vshll.u32 %v2129_v48, 16  ;;  %v2130_v2 = vld [vmem:[%s2653_s12 + $0xc0] sm:$0xf] }
  0x45   : > { %2359 = vmatprep.subr.bf16.mxu1 %v2498_v49  ;;  %v1117_v43 = vrot.slane %v1116_v35, 4  ;;  %v1154_v60 = vrot.slane %v1152_v51, 4  ;;  %v2131_v4 = vld [vmem:[%s2653_s12 + $0xc4] sm:$0x1]  ;;  %v2132_v5 = vld [vmem:[%s2653_s12 + $0xc8] sm:$0xf] }
  0x46   : > { %v1108_v39 = vsel %vm2690_vm4, %v1103_v29, %v1107_v11  ;;  %v1131_v47 = vrot.slane %v1130_v40, 4  ;;  %v1157_v63 = vrot.slane %v1155_v54, 5  ;;  %v1163_v0 = vrot.slane %v1161_v55, 5  ;;  %v2133_v6 = vld [vmem:[%s2653_s12 + $0xcc] sm:$0x1]  ;;  %v2507_v11 = vld [vmem:[%s2648_s9 + $0x80] sm:$0xff]  }
  0x47   : > { %v1122_v52 = vsel %vm2690_vm4, %v1117_v43, %v1121_v31  ;;  %v1166_v8 = vshrl.u32 %v2130_v2, 16  ;;  %v1169_v9 = vshll.u32 %v2130_v2, 16  ;;  %v1175_v10 = vshll.u32 %v2131_v4, 16  ;;  %v2505_v28 = vld [vmem:[%s2653_s12 + $0x38] ss:$8 sps:$4 sm:$0xff]  }
  0x48   : > { %2360 = vmatpush3.bf16.msra.mxu1 %v2498_v49  ;;  %2350 = vmatmul.mubr.msk.bf16.vlgmr.msra.gmra.mxu0 %vm341_vm1, %v2491_v56  ;;  %v1141_v49 = vshll.u32 %v2126_v41, 16  ;;  %v1136_v56 = vsel %vm2690_vm4, %v1131_v47, %v1135_v36  ;;  %v1158_v7 = vor.u32 %v1157_v63, %v1154_v60  ;;  %v1180_v13 = vshrl.u32 %v2132_v5, 16  ;;  %v2193_v31 = vld [vmem:[%s2653_s12 + $0xc] sm:$0x1]  ;;  %v2508_v33 = vld [vmem:[%s2653_s12 + $0x50] ss:$8 sps:$4 sm:$0xff]  }
  0x49   : > { %2370 = vmatpush3.bf16.msra.mxu0 %v2493_v42  ;;  %2353 = vmatprep.mubr.msk.bf16.mxu0 %vm341_vm1, %v2495_v58  ;;  %v2138_v42 = vcombine.low %v1094_v34, %v1108_v39  ;;  %v2139_v62 = vcombine.low %v1122_v52, %v1136_v56  ;;  %v1183_v14 = vshll.u32 %v2132_v5, 16  ;;  %v1189_v15 = vshll.u32 %v2133_v6, 16  ;;  %v2194_v34 = vld [vmem:[%s2653_s12 + $0x10] sm:$0xf]  ;;  %v2195_v35 = vld [vmem:[%s2653_s12 + $0x14] sm:$0x1] }
  0x4a   : > { %2371 = vmatprep.subr.bf16.mxu0 %v2499_v59  ;;  %2381 = vmatprep.subr.bf16.mxu1 %v2502_v24  ;;  %v1143_v58 = vrot.slane %v1141_v49, 5  ;;  %v1159_v16 = vrot.slane %v1158_v7, 4  ;;  %v1168_v17 = vrot.slane %v1166_v8, 4  ;;  %v1171_v18 = vrot.slane %v1169_v9, 5  ;;  %v2196_v52 = vld [vmem:[%s2653_s12 + $0x18] sm:$0xf] }
  0x4b   : > { %2342 = vmatmul.mubr.msk.bf16.gmra.mxu1 %vm341_vm1, %v2496_v57  ;;  %v2501_v57 = vld [vmem:[%s2653_s12 + $0x18] ss:$8 sps:$4 sm:$0xff]   ;;  %v1177_v20 = vrot.slane %v1175_v10, 5  ;;  %v1182_v21 = vrot.slane %v1180_v13, 4  ;;  %v1185_v22 = vrot.slane %v1183_v14, 5  ;;  %v1191_v27 = vrot.slane %v1189_v15, 5 }
  0x4c   : > { %2361 = vmatprep.mubr.msk.bf16.mxu1 %vm341_vm1, %v2138_v42  ;;  %v1144_v3 = vor.u32 %v1143_v58, %v1140_v53  ;;  %v1164_v23 = vsel %vm2690_vm4, %v1159_v16, %v1163_v0  ;;  %v1595_v40 = vshll.u32 %v2193_v31, 16  ;;  %v1600_v41 = vshrl.u32 %v2194_v34, 16  ;;  %v2197_v53 = vld [vmem:[%s2653_s12 + $0x1c] sm:$0x1]  ;;  %v2198_v55 = vld [vmem:[%s2653_s12 + $0x20] sm:$0xf] }
  0x4d   : > { %2372 = vmatpush3.bf16.msra.mxu0 %v2499_v59  ;;  %v1149_v59 = vrot.slane %v1147_v50, 5  ;;  %v1186_v26 = vor.u32 %v1185_v22, %v1182_v21  ;;  %v1603_v44 = vshll.u32 %v2194_v34, 16  ;;  %v1609_v45 = vshll.u32 %v2195_v35, 16  ;;  %v2199_v56 = vld [vmem:[%s2653_s12 + $0x24] sm:$0x1] }
  0x4e   : > { %2393 = vmatprep.subr.bf16.mxu0 %v2503_v37  ;;  %v1145_v12 = vrot.slane %v1144_v3, 4  ;;  %v1597_v48 = vrot.slane %v1595_v40, 5  ;;  %v1602_v49 = vrot.slane %v1600_v41, 4  ;;  %v1617_v58 = vshll.u32 %v2196_v52, 16  ;;  %v2509_v0 = vld [vmem:[%s2653_s12 + $0x60] ss:$8 sps:$4 sm:$0xff]  }
  0x4f   : > { %v1187_v32 = vrot.slane %v1186_v26, 4  ;;  %v1605_v50 = vrot.slane %v1603_v44, 5  ;;  %v1611_v51 = vrot.slane %v1609_v45, 5  ;;  %v1623_v60 = vshll.u32 %v2197_v53, 16  ;;  %v2510_v7 = vld [vmem:[%s2653_s12 + $0x70] ss:$8 sps:$4 sm:$0xff]  }
  0x50   : > { %2354 = vmatmul.mubr.msk.bf16.gmra.mxu0 %vm341_vm1, %v2497_v19  ;;  %v1150_v19 = vsel %vm2690_vm4, %v1145_v12, %v1149_v59  ;;  %v1619_v2 = vrot.slane %v1617_v58, 5  ;;  %v1637_v3 = vshll.u32 %v2199_v56, 16  ;;  %v2200_v12 = vld [vmem:[%s2653_s12 + $0x28] sm:$0xf]  ;;  %v2201_v13 = vld [vmem:[%s2653_s12 + $0x2c] sm:$0x1] }
  0x51   : > { %2373 = vmatprep.mubr.msk.bf16.mxu0 %vm341_vm1, %v2500_v30  ;;  %v2140_v25 = vcombine.low %v1150_v19, %v1164_v23  ;;  %v2192_v30 = vld [vmem:[%s2653_s12 + $0x8] sm:$0xf]  ;;  %v1192_v42 = vsel %vm2690_vm4, %v1187_v32, %v1191_v27  ;;  %v1606_v59 = vor.u32 %v1605_v50, %v1602_v49  ;;  %v1625_v10 = vrot.slane %v1623_v60, 5  ;;  %v2202_v16 = vld [vmem:[%s2653_s12 + $0x30] sm:$0xf] }
  0x52   : > { %v1586_v36 = vshrl.u32 %v2192_v30, 16  ;;  %v1589_v39 = vshll.u32 %v2192_v30, 16  ;;  %v1645_v19 = vshll.u32 %v2200_v12, 16  ;;  %v1651_v22 = vshll.u32 %v2201_v13, 16  ;;  %v2204_v35 = vld [vmem:[%s2653_s12 + $0x38] sm:$0xf] }
  0x53   : > { %2362 = vmatmul.mubr.msk.bf16.vlgmr.msra.gmra.mxu1 %vm341_vm1, %v2139_v62  ;;  %v1631_v62 = vshll.u32 %v2198_v55, 16  ;;  %v1607_v4 = vrot.slane %v1606_v59, 4  ;;  %v1656_v23 = vshrl.u32 %v2202_v16, 16  ;;  %v1659_v27 = vshll.u32 %v2202_v16, 16  ;;  %v2206_v40 = vld [vmem:[%s2653_s12 + $0x40] sm:$0xf] }
  0x54   : > { %2382 = vmatpush3.bf16.msra.mxu1 %v2502_v24  ;;  %v1172_v24 = vor.u32 %v1171_v18, %v1168_v17  ;;  %2365 = vmatprep.mubr.msk.bf16.mxu1 %vm341_vm1, %v2140_v25  ;;  %v1588_v43 = vrot.slane %v1586_v36, 4  ;;  %v1591_v47 = vrot.slane %v1589_v39, 5  ;;  %v2203_v17 = vld [vmem:[%s2653_s12 + $0x34] sm:$0x1]  ;;  %v1642_v18 = vshrl.u32 %v2200_v12, 16 }
  0x55   : > { %2383 = vmatprep.subr.bf16.mxu1 %v2506_v61  ;;  %v1633_v6 = vrot.slane %v1631_v62, 5  ;;  %v1612_v14 = vsel %vm2690_vm4, %v1607_v4, %v1611_v51  ;;  %v1647_v26 = vrot.slane %v1645_v19, 5  ;;  %v1665_v30 = vshll.u32 %v2203_v17, 16  ;;  %v2205_v36 = vld [vmem:[%s2653_s12 + $0x3c] sm:$0x1] }
  0x56   : > { %v1173_v29 = vrot.slane %v1172_v24, 4  ;;  %v1592_v54 = vor.u32 %v1591_v47, %v1588_v43  ;;  %v1644_v25 = vrot.slane %v1642_v18, 4  ;;  %v1661_v34 = vrot.slane %v1659_v27, 5  ;;  %v2207_v41 = vld [vmem:[%s2653_s12 + $0x44] sm:$0x1] }
  0x57   : > { %v1667_v39 = vrot.slane %v1665_v30, 5  ;;  %v1673_v45 = vshll.u32 %v2204_v35, 16  ;;  %v2511_v47 = vld [vmem:[%s2653_s12 + $0x80] ss:$8 sps:$4 sm:$0xff]   ;;  %v1684_v49 = vshrl.u32 %v2206_v40, 16  ;;  %v1687_v50 = vshll.u32 %v2206_v40, 16 }
  0x58   : > { %2374 = vmatmul.mubr.msk.bf16.vlgmr.msra.gmra.mxu0 %vm341_vm1, %v2501_v57  ;;  %2384 = vmatpush3.bf16.msra.mxu1 %v2506_v61  ;;  %v1614_v57 = vshrl.u32 %v2196_v52, 16  ;;  %v1628_v61 = vshrl.u32 %v2198_v55, 16  ;;  %v1593_v63 = vrot.slane %v1592_v54, 4  ;;  %v1648_v32 = vor.u32 %v1647_v26, %v1644_v25 }
  0x59   : > { %2394 = vmatpush3.bf16.msra.mxu0 %v2503_v37  ;;  %2377 = vmatprep.mubr.msk.bf16.mxu0 %vm341_vm1, %v2504_v1  ;;  %v1178_v37 = vsel %vm2690_vm4, %v1173_v29, %v1177_v20  ;;  %v1658_v29 = vrot.slane %v1656_v23, 4  ;;  %v1693_v51 = vshll.u32 %v2207_v41, 16  ;;  %v1675_v54 = vrot.slane %v1673_v45, 5 }
  0x5a   : > { %2395 = vmatprep.subr.bf16.mxu0 %v2507_v11  ;;  %v2141_v46 = vcombine.low %v1178_v37, %v1192_v42  ;;  %v1616_v1 = vrot.slane %v1614_v57, 4  ;;  %v1630_v5 = vrot.slane %v1628_v61, 4  ;;  %v1598_v8 = vsel %vm2690_vm4, %v1593_v63, %v1597_v48 }
  0x5b   : > { %v2212_v20 = vcombine.low %v1598_v8, %v1612_v14  ;;  %v1670_v42 = vshrl.u32 %v2204_v35, 16  ;;  %v1649_v43 = vrot.slane %v1648_v32, 4  ;;  %v1662_v44 = vor.u32 %v1661_v34, %v1658_v29 }
  0x5c   : > { %2366 = vmatmul.mubr.msk.bf16.gmra.mxu1 %vm341_vm1, %v2141_v46  ;;  %v1620_v9 = vor.u32 %v1619_v2, %v1616_v1  ;;  %v1634_v15 = vor.u32 %v1633_v6, %v1630_v5  ;;  %v1679_v46 = vshll.u32 %v2205_v36, 16  ;;  %v1686_v55 = vrot.slane %v1684_v49, 4 }
  0x5d   : > { %2396 = vmatpush3.bf16.msra.mxu0 %v2507_v11  ;;  %2385 = vmatprep.mubr.msk.bf16.mxu1 %vm341_vm1, %v2508_v33  ;;  %v1639_v11 = vrot.slane %v1637_v3, 5  ;;  %v1653_v33 = vrot.slane %v1651_v22, 5  ;;  %v1672_v48 = vrot.slane %v1670_v42, 4  ;;  %v1663_v53 = vrot.slane %v1662_v44, 4  ;;  %v291_v42 = vld [vmem:[#allocation2 + $0x10] sm:$0xff]  ;;  %v289_v44 = vld [vmem:[#allocation2] sm:$0xff] }
  0x5e   : > { %v1621_v21 = vrot.slane %v1620_v9, 4  ;;  %v1635_v24 = vrot.slane %v1634_v15, 4  ;;  %v1689_v56 = vrot.slane %v1687_v50, 5  ;;  %v1681_v59 = vrot.slane %v1679_v46, 5 }
  0x5f   : > { %v1654_v52 = vsel %vm2690_vm4, %v1649_v43, %v1653_v33  ;;  %v1668_v57 = vsel %vm2690_vm4, %v1663_v53, %v1667_v39  ;;  %v1676_v58 = vor.u32 %v1675_v54, %v1672_v48  ;;  %v1695_v62 = vrot.slane %v1693_v51, 5  ;;  %v292_v48 = vld [vmem:[#allocation2 + $0x18] sm:$0xff]  ;;  %v290_v53 = vld [vmem:[#allocation2 + $0x8] sm:$0xff] }
  0x60   : > { %2378 = vmatmul.mubr.msk.bf16.gmra.mxu0 %vm341_vm1, %v2505_v28  ;;  %v1626_v28 = vsel %vm2690_vm4, %v1621_v21, %v1625_v10  ;;  %v1640_v31 = vsel %vm2690_vm4, %v1635_v24, %v1639_v11  ;;  %v2214_v60 = vcombine.low %v1654_v52, %v1668_v57  ;;  %v1690_v61 = vor.u32 %v1689_v56, %v1686_v55 }
  0x61   : > { %2397 = vmatprep.mubr.msk.bf16.mxu0 %vm341_vm1, %v2212_v20  ;;  %v2213_v37 = vcombine.low %v1626_v28, %v1640_v31  ;;  %v1677_v63 = vrot.slane %v1676_v58, 4 }
  0x63   : > { %v1682_v1 = vsel %vm2690_vm4, %v1677_v63, %v1681_v59  ;;  %v295_v63 = vld [vmem:[#allocation2 + $0x30] sm:$0xff] }
  0x64   : > { %2386 = vmatmul.mubr.msk.bf16.vlgmr.msra.gmra.mxu1 %vm341_vm1, %v2509_v0  ;;  %v1691_v0 = vrot.slane %v1690_v61, 4 }
  0x65   : > { %2389 = vmatprep.mubr.msk.bf16.mxu1 %vm341_vm1, %v2510_v7 }
  0x66   : > { %v1696_v2 = vsel %vm2690_vm4, %v1691_v0, %v1695_v62 }
  0x67   : > { %v2215_v3 = vcombine.low %v1682_v1, %v1696_v2 }
  0x68   : > { %2398 = vmatmul.mubr.msk.bf16.vlgmr.msra.gmra.mxu0 %vm341_vm1, %v2213_v37 }
  0x69   : > { %2401 = vmatprep.mubr.msk.bf16.mxu0 %vm341_vm1, %v2214_v60 }
  0x6c   : > { %2390 = vmatmul.mubr.msk.bf16.gmra.mxu1 %vm341_vm1, %v2511_v47 }
  0x70   : > { %2402 = vmatmul.mubr.msk.bf16.gmra.mxu0 %vm341_vm1, %v2215_v3 }
  0xeb   : > { %v2842_v4 = vpop.f32.mrf.mxu1  ;;  %v2303_v6 = vpop.f32.mrf.mxu0 }
  0xec   : > { %v421_v46 = vadd.f32 %v2303_v6, %v291_v42  ;;  %v293_v6 = vld [vmem:[#allocation2 + $0x20] sm:$0xff] }
  0xed   : > { %v2844_v5 = vpop.f32.mrf.mxu1  ;;  %v388_v9 = vpop.f32.mrf.mxu0 }
  0xee   : > { %v419_v50 = vadd.f32 %v388_v9, %v289_v44  ;;  %v425_v44 = vadd.f32 %v2842_v4, %v295_v63 }
  0xef   : > { %v2846_v7 = vpop.f32.mrf.mxu1  ;;  %v2304_v12 = vpop.f32.mrf.mxu0 }
  0xf0   : > { %v422_v55 = vadd.f32 %v2304_v12, %v292_v48  ;;  %v423_v48 = vadd.f32 %v2844_v5, %v293_v6 }
  0xf1   : > { %v2848_v8 = vpop.f32.mrf.mxu1  ;;  %v391_v38 = vpop.f32.mrf.mxu0 }
  0xf2   : > { %v420_v58 = vadd.f32 %v391_v38, %v290_v53 }
  0xf3   : > { %v2315_v10 = vpop.f32.mrf.mxu1 }
  0xf4   : > { %v552_v51 = vadd.f32 %v2315_v10, %v421_v46 }
  0xf5   : > { %v519_v11 = vpop.f32.mrf.mxu1 }
  0xf6   : > { %v550_v56 = vadd.f32 %v519_v11, %v419_v50  ;;  %v296_v11 = vld [vmem:[#allocation2 + $0x38] sm:$0xff] }
  0xf7   : > { %v2316_v13 = vpop.f32.mrf.mxu1  ;;  %v2327_v16 = vpop.f32.mrf.mxu0 }
  0xf8   : > { %v797_v59 = vadd.f32 %v2327_v16, %v552_v51  ;;  %v553_v60 = vadd.f32 %v2316_v13, %v422_v55  ;;  %v426_v51 = vadd.f32 %v2846_v7, %v296_v11 }
  0xf9   : > { %v522_v14 = vpop.f32.mrf.mxu1  ;;  %v764_v18 = vpop.f32.mrf.mxu0 }
  0xfa   : > { %v795_v0 = vadd.f32 %v764_v18, %v550_v56  ;;  %v551_v1 = vadd.f32 %v522_v14, %v420_v58 }
  0xfb   : > { %v2850_v15 = vpop.f32.mrf.mxu1  ;;  %v2328_v20 = vpop.f32.mrf.mxu0 }
  0xfc   : > { %v798_v42 = vadd.f32 %v2328_v20, %v553_v60  ;;  %v556_v14 = vadd.f32 %v2850_v15, %v425_v44 }
  0xfd   : > { %v2852_v17 = vpop.f32.mrf.mxu1  ;;  %v767_v22 = vpop.f32.mrf.mxu0 }
  0xfe   : > { %v796_v46 = vadd.f32 %v767_v22, %v551_v1  ;;  %v554_v4 = vadd.f32 %v2852_v17, %v423_v48 }
  0xff   : > { %v2854_v19 = vpop.f32.mrf.mxu1 }
 0x100   : > { %v2858_v24 = vpop.f32.mrf.mxu0  ;;  %v557_v5 = vadd.f32 %v2854_v19, %v426_v51 }
 0x101   : > { %v2856_v21 = vpop.f32.mrf.mxu1  ;;  %v801_v56 = vadd.f32 %v2858_v24, %v556_v14 }
 0x102   : > { %v2860_v26 = vpop.f32.mrf.mxu0 }
 0x103   : > { %v2339_v23 = vpop.f32.mrf.mxu1 }
 0x104   : > { %v2862_v28 = vpop.f32.mrf.mxu0  ;;  %v928_v2 = vadd.f32 %v2339_v23, %v797_v59  ;;  %v294_v23 = vld [vmem:[#allocation2 + $0x28] sm:$0xff] }
 0x105   : > { %v895_v25 = vpop.f32.mrf.mxu1 }
 0x106   : > { %v2864_v30 = vpop.f32.mrf.mxu0  ;;  %v926_v9 = vadd.f32 %v895_v25, %v795_v0 }
 0x107   : > { %v2340_v27 = vpop.f32.mrf.mxu1 }
 0x108   : > { %v2351_v32 = vpop.f32.mrf.mxu0  ;;  %v929_v16 = vadd.f32 %v2340_v27, %v798_v42  ;;  %v424_v27 = vadd.f32 %v2848_v8, %v294_v23  ;;  %v802_v8 = vadd.f32 %v2862_v28, %v557_v5 }
 0x109   : > { %v898_v29 = vpop.f32.mrf.mxu1  ;;  %v1059_v38 = vadd.f32 %v2351_v32, %v928_v2 }
 0x10a   : > { %v1026_v34 = vpop.f32.mrf.mxu0  ;;  %v927_v20 = vadd.f32 %v898_v29, %v796_v46  ;;  %v799_v29 = vadd.f32 %v2860_v26, %v554_v4  ;;  %v555_v7 = vadd.f32 %v2856_v21, %v424_v27 }
 0x10b   : > { %v2866_v31 = vpop.f32.mrf.mxu1  ;;  %v1057_v50 = vadd.f32 %v1026_v34, %v926_v9 }
 0x10c   : > { %v2352_v35 = vpop.f32.mrf.mxu0  ;;  %v932_v17 = vadd.f32 %v2866_v31, %v801_v56 }
 0x10d   : > { %v2868_v33 = vpop.f32.mrf.mxu1  ;;  %v1060_v22 = vadd.f32 %v2352_v35, %v929_v16 }
 0x10e   : > { %v1029_v37 = vpop.f32.mrf.mxu0  ;;  %v930_v24 = vadd.f32 %v2868_v33, %v799_v29 }
 0x10f   : > { %v2870_v36 = vpop.f32.mrf.mxu1  ;;  %v1058_v58 = vadd.f32 %v1029_v37, %v927_v20 }
 0x110   : > { %v2872_v39 = vpop.f32.mrf.mxu0  ;;  %v933_v21 = vadd.f32 %v2870_v36, %v802_v8 }
 0x111   : > { %v2874_v40 = vpop.f32.mrf.mxu1  ;;  %v1063_v26 = vadd.f32 %v2872_v39, %v932_v17 }
 0x112   : > { %v2876_v41 = vpop.f32.mrf.mxu0 }
 0x113   : > { %v2363_v45 = vpop.f32.mrf.mxu1 }
 0x114   : > { %v2878_v43 = vpop.f32.mrf.mxu0  ;;  %v1301_v25 = vadd.f32 %v2363_v45, %v1059_v38 }
 0x115   : > { %v1268_v49 = vpop.f32.mrf.mxu1  ;;  %v1064_v39 = vadd.f32 %v2878_v43, %v933_v21 }
 0x116   : > { %v2880_v47 = vpop.f32.mrf.mxu0  ;;  %v1299_v32 = vadd.f32 %v1268_v49, %v1057_v50 }
 0x117   : > { %v2364_v54 = vpop.f32.mrf.mxu1 }
 0x118   : > { %v2375_v52 = vpop.f32.mrf.mxu0  ;;  %v1302_v34 = vadd.f32 %v2364_v54, %v1060_v22 }
 0x119   : > { %v1271_v62 = vpop.f32.mrf.mxu1  ;;  %v1432_v59 = vadd.f32 %v2375_v52, %v1301_v25  ;;  %v800_v52 = vadd.f32 %v2864_v30, %v555_v7 }
 0x11a   : > { %v1399_v57 = vpop.f32.mrf.mxu0  ;;  %v1300_v49 = vadd.f32 %v1271_v62, %v1058_v58  ;;  %v1061_v62 = vadd.f32 %v2876_v41, %v930_v24 }
 0x11b   : > { %v1430_v35 = vadd.f32 %v1399_v57, %v1299_v32  ;;  %v931_v28 = vadd.f32 %v2874_v40, %v800_v52 }
 0x11c   : > { %v2376_v61 = vpop.f32.mrf.mxu0  ;;  %v2367_v12 = vpop.f32.mrf.mxu1 }
 0x11d   : > { %v1433_v0 = vadd.f32 %v2376_v61, %v1302_v34  ;;  %v1305_v6 = vadd.f32 %v2367_v12, %v1063_v26  ;;  %v1062_v11 = vadd.f32 %v2880_v47, %v931_v28 }
 0x11e   : > { %v1402_v3 = vpop.f32.mrf.mxu0  ;;  %v1284_v18 = vpop.f32.mrf.mxu1 }
 0x11f   : > { %v1431_v1 = vadd.f32 %v1402_v3, %v1300_v49  ;;  %v1303_v9 = vadd.f32 %v1284_v18, %v1061_v62 }
 0x120   : > { %v2882_v10 = vpop.f32.mrf.mxu0  ;;  %v2368_v53 = vpop.f32.mrf.mxu1 }
 0x121   : > { %v1436_v41 = vadd.f32 %v2882_v10, %v1305_v6  ;;  %v1306_v40 = vadd.f32 %v2368_v53, %v1064_v39 }
 0x122   : > { %v2885_v13 = vpop.f32.mrf.mxu0  ;;  %v1287_v15 = vpop.f32.mrf.mxu1 }
 0x123   : > { %v1434_v16 = vadd.f32 %v2885_v13, %v1303_v9  ;;  %v1304_v48 = vadd.f32 %v1287_v15, %v1062_v11 }
 0x124   : > { %v2380_v55 = vpop.f32.mrf.mxu0  ;;  %v2387_v60 = vpop.f32.mrf.mxu1 }
 0x125   : > { %v1563_v63 = vadd.f32 %v2387_v60, %v1432_v59  ;;  %v1437_v18 = vadd.f32 %v2380_v55, %v1306_v40 }
 0x126   : > { %v1418_v45 = vpop.f32.mrf.mxu0  ;;  %v1530_v19 = vpop.f32.mrf.mxu1 }
 0x127   : > { %v1561_v37 = vadd.f32 %v1530_v19, %v1430_v35  ;;  %v1435_v47 = vadd.f32 %v1418_v45, %v1304_v48 }
 0x128   : > { %v2399_v54 = vpop.f32.mrf.mxu0  ;;  %v2388_v31 = vpop.f32.mrf.mxu1 }
 0x129   : > { %v1805_v2 = vadd.f32 %v2399_v54, %v1563_v63  ;;  %v1564_v57 = vadd.f32 %v2388_v31, %v1433_v0 }
 0x12a   : > { %v1772_v33 = vpop.f32.mrf.mxu0  ;;  %v1533_v42 = vpop.f32.mrf.mxu1 }
 0x12b   : > { %1813 = vst.msk [vmem:[#allocation2 + $0x10] sm:$0xff] %vm341_vm1, %v1805_v2  ;;  %v1803_v61 = vadd.f32 %v1772_v33, %v1561_v37  ;;  %v1562_v30 = vadd.f32 %v1533_v42, %v1431_v1 }
 0x12c   : > { %v2400_v36 = vpop.f32.mrf.mxu0  ;;  %v2391_v44 = vpop.f32.mrf.mxu1 }
 0x12d   : > { %1811 = vst.msk [vmem:[#allocation2] sm:$0xff] %vm341_vm1, %v1803_v61  ;;  %v1806_v3 = vadd.f32 %v2400_v36, %v1564_v57  ;;  %v1567_v43 = vadd.f32 %v2391_v44, %v1436_v41 }
 0x12e   : > { %v1775_v12 = vpop.f32.mrf.mxu0  ;;  %v1546_v46 = vpop.f32.mrf.mxu1 }
 0x12f   : > { %1814 = vst.msk [vmem:[#allocation2 + $0x18] sm:$0xff] %vm341_vm1, %v1806_v3  ;;  %v1804_v38 = vadd.f32 %v1775_v12, %v1562_v30  ;;  %v1565_v23 = vadd.f32 %v1546_v46, %v1434_v16 }
 0x130   : > { %v2392_v14 = vpop.f32.mrf.mxu1  ;;  %v2403_v50 = vpop.f32.mrf.mxu0 }
 0x131   : > { %1812 = vst.msk [vmem:[#allocation2 + $0x8] sm:$0xff] %vm341_vm1, %v1804_v38  ;;  %v1809_v25 = vadd.f32 %v2403_v50, %v1567_v43  ;;  %v1568_v10 = vadd.f32 %v2392_v14, %v1437_v18 }
 0x132   : > { %v1549_v20 = vpop.f32.mrf.mxu1  ;;  %v1788_v51 = vpop.f32.mrf.mxu0 }
 0x133   : > { %1817 = vst.msk [vmem:[#allocation2 + $0x30] sm:$0xff] %vm341_vm1, %v1809_v25  ;;  %v1807_v4 = vadd.f32 %v1788_v51, %v1565_v23  ;;  %v1566_v53 = vadd.f32 %v1549_v20, %v1435_v47 }
 0x134   : > { %v2404_v22 = vpop.f32.mrf.mxu0 }
 0x135   : > { %1815 = vst.msk [vmem:[#allocation2 + $0x20] sm:$0xff] %vm341_vm1, %v1807_v4  ;;  %v1810_v13 = vadd.f32 %v2404_v22, %v1568_v10  ;;  %1822 = sbr.rel (%p2222_p11) target bundleno = 327 (0x147), region = 44 }
 0x136   : > { %v1791_v32 = vpop.f32.mrf.mxu0 }
 0x137   : > { %1818 = vst.msk [vmem:[#allocation2 + $0x38] sm:$0xff] %vm341_vm1, %v1810_v13  ;;  %v1808_v27 = vadd.f32 %v1791_v32, %v1566_v53 }
 0x139   : > { %1816 = vst.msk [vmem:[#allocation2 + $0x28] sm:$0xff] %vm341_vm1, %v1808_v27 }
 0x13a   : > { %v2223_v55 = vld [vmem:[%s2962_s2] ss:$0 sm:$0xff]  ;;  %vm1893_vm5 = vcmask 257024  }
 0x13b   : > { %v2224_v56 = vld [vmem:[%s2963_s3] ss:$0 sm:$0xff]  ;;  %v1830_v5 = vmul.f32 %v2223_v55, %v1803_v61  ;;  %v1831_v15 = vmul.f32 %v2223_v55, %v1804_v38  ;;  %v1832_v58 = vmul.f32 %v2223_v55, %v1805_v2  ;;  %v1833_v59 = vmul.f32 %v2223_v55, %v1806_v3 }
 0x13c   : > { %v1834_v34 = vmul.f32 %v2223_v55, %v1807_v4  ;;  %v1835_v29 = vmul.f32 %v2223_v55, %v1808_v27  ;;  %v1836_v7 = vmul.f32 %v2223_v55, %v1809_v25  ;;  %v1837_v17 = vmul.f32 %v2223_v55, %v1810_v13 }
 0x13d   : > { %v1845_v45 = vadd.f32 %v2224_v56, %v1830_v5  ;;  %v1846_v60 = vadd.f32 %v2224_v56, %v1831_v15  ;;  %v1847_v35 = vadd.f32 %v2224_v56, %v1832_v58  ;;  %v1848_v49 = vadd.f32 %v2224_v56, %v1833_v59 }
 0x13e   : > { %v1849_v63 = vadd.f32 %v2224_v56, %v1834_v34  ;;  %v1850_v8 = vadd.f32 %v2224_v56, %v1835_v29  ;;  %v1851_v24 = vadd.f32 %v2224_v56, %v1836_v7  ;;  %v1852_v19 = vadd.f32 %v2224_v56, %v1837_v17 }
 0x13f   : > { %v1853_v0 = vmax.f32 %v1845_v45, 0.0  ;;  %v1854_v37 = vmax.f32 %v1846_v60, 0.0  ;;  %v1855_v52 = vmax.f32 %v1847_v35, 0.0  ;;  %v1856_v26 = vmax.f32 %v1848_v49, 0.0 }
 0x140   : > { %v1857_v21 = vmax.f32 %v1849_v63, 0.0  ;;  %v1858_v54 = vmax.f32 %v1850_v8, 0.0  ;;  %v1859_v31 = vmax.f32 %v1851_v24, 0.0  ;;  %v1860_v1 = vmax.f32 %v1852_v19, 0.0 }
 0x141   : > { %v2235_v2 = vpack.c.bf16 %v1853_v0, %v1853_v0  ;;  %v2236_v57 = vpack.c.bf16 %v1854_v37, %v1854_v37  ;;  %v2237_v62 = vpack.c.bf16 %v1855_v52, %v1855_v52  ;;  %v2238_v28 = vpack.c.bf16 %v1856_v26, %v1856_v26 }
 0x142   : > { %v2239_v6 = vpack.c.bf16 %v1857_v21, %v1857_v21  ;;  %v2240_v33 = vpack.c.bf16 %v1858_v54, %v1858_v54  ;;  %v2241_v42 = vpack.c.bf16 %v1859_v31, %v1859_v31  ;;  %v2242_v61 = vpack.c.bf16 %v1860_v1, %v1860_v1 }
 0x143   : > { %1894 = vst.msk [vmem:[%s2659_s27] sm:$0xf] %vm1893_vm5, %v2235_v2  ;;  %1895 = vst.msk [vmem:[%s2659_s27 + $0x4] sm:$0xf] %vm1893_vm5, %v2236_v57 }
 0x144   : > { %1896 = vst.msk [vmem:[%s2659_s27 + $0x8] sm:$0xf] %vm1893_vm5, %v2237_v62  ;;  %1897 = vst.msk [vmem:[%s2659_s27 + $0xc] sm:$0xf] %vm1893_vm5, %v2238_v28 }
 0x145   : > { %1898 = vst.msk [vmem:[%s2659_s27 + $0x10] sm:$0xf] %vm1893_vm5, %v2239_v6  ;;  %1899 = vst.msk [vmem:[%s2659_s27 + $0x14] sm:$0xf] %vm1893_vm5, %v2240_v33 }
 0x146   : > { %1900 = vst.msk [vmem:[%s2659_s27 + $0x18] sm:$0xf] %vm1893_vm5, %v2241_v42  ;;  %1901 = vst.msk [vmem:[%s2659_s27 + $0x1c] sm:$0xf] %vm1893_vm5, %v2242_v61 }
 0x147 PF: > { %s14_s21 = sadd.s32 1, %s2566_s21   ;;  %s2968_s30 = sld [smem:[#allocation3_spill]] }
 0x148   : > { %p11_p12 = scmp.ge.s32.totalorder %s14_s21, 20   ;;  %s2969_s15 = smov %s2554_s18 }
 0x149   : > { %s2970_s16 = smov %s2558_s19  ;;  %s2971_s17 = smov %s2562_s20 }
 0x14a   : > { %s2972_s18 = smov %s2976_s22  ;;  %s2973_s19 = smov %s2980_s23 }
 0x14b   :  { %13 = sbr.rel (!%p11_p12) target bundleno = 4 (0x4), region = 90 }
 0x14d   : > { %s2974_s20 = smov %s2968_s30 }

// kernel: bottleneck3d_forward.6
= control target key start
LH: loop header
LB: loop body
LE: loop exit
PB: predicated region body
PF: predicated region fallthrough
CT: control target
= control target key end

     0   :  { %s803_s15 = smov 0   ;;  %s863_s0 = inlined_call_operand.vmem [shape: bf16[384,64], index: 0, kind: input, shape index: {}]   ;;  %s864_s1 = inlined_call_operand.vmem [shape: bf16[64,128], index: 1, kind: input, shape index: {}]   ;;  %s865_s2 = inlined_call_operand.vmem [shape: f32[1,128], index: 2, kind: input, shape index: {}]   ;;  %s866_s3 = inlined_call_operand.vmem [shape: f32[1,128], index: 3, kind: input, shape index: {}]   ;;  %s867_s4 = inlined_call_operand.vmem [shape: bf16[384,128], index: 4, kind: output, shape index: {}]  }
   0x1 LB: > { %s594_s16 = sadd.s32 4294967295, %s776_s15   ;;  %p598_p0 = scmp.ge.s32.totalorder %s776_s15, 1  ;;  %s776_s15 = sphi %s803_s15, %s14_s15  }
   0x2   : > { %p163_p1 = scmp.lt.s32.totalorder %s776_s15, 4 }
   0x4   : > { %p164_p2 = pnand %p598_p0, %p163_p1 }
   0x5   : > { %s599_s19 = sshll.u32 (!%p164_p2), %s594_s16, 4 }
   0x6   : > { %167 = sbr.rel (%p164_p2) target bundleno = 242 (0xf2), region = 36  ;;  %p190_p3 = scmp.lt.s32.totalorder (!%p164_p2), %s599_s19, 47 }
   0xb   : > { %v758_v0 = vld [vmem:[%s864_s1 + $0x18] sm:$0xff]   ;;  %v759_v1 = vld [vmem:[%s864_s1 + $0x10] sm:$0xff]   ;;  %s869_s19 = smov (!%p190_p3, %s599_s19), 47  ;;  %v760_v2 = vld [vmem:[%s864_s1 + $0x8] sm:$0xff]   ;;  %vm290_vm0 = vcmask 523264  }
   0xc   : > { %718 = vmatprep.subr.bf16.mxu0 %v758_v0  ;;  %742 = vmatprep.subr.bf16.mxu1 %v758_v0  ;;  %s600_s24 = sshll.u32 %s869_s19, 2  ;;  %v761_v3 = vld [vmem:[%s864_s1] sm:$0xff]  }
   0xd   : > { %719 = vmatpush3.bf16.msra.mxu0 %v758_v0  ;;  %746 = vmatpush3.bf16.msra.mxu1 %v758_v0  ;;  %s193_s29 = scalar_lea.vmem %s863_s0, %s600_s24  ;;  %v623_v12 = vld [vmem:[%s865_s2] ss:$0 sm:$0xff]  ;;  %s850_s10 = scalar_lea.vmem %s867_s4, %s600_s24 }
   0xe   : > { %720 = vmatprep.subr.bf16.mxu0 %v759_v1  ;;  %743 = vmatprep.subr.bf16.mxu1 %v759_v1  ;;  %v762_v4 = vld [vmem:[%s193_s29] sm:$0xff]   ;;  %v764_v6 = vld [vmem:[%s193_s29 + $0x8] sm:$0xff]   ;;  %v766_v8 = vld [vmem:[%s193_s29 + $0x10] sm:$0xff]  }
   0xf   : > { %v763_v5 = vld [vmem:[%s193_s29 + $0x20] sm:$0xff]   ;;  %726 = vmatprep.mubr.msk.bf16.mxu0 %vm290_vm0, %v762_v4  ;;  %v765_v7 = vld [vmem:[%s193_s29 + $0x28] sm:$0xff]   ;;  %v767_v9 = vld [vmem:[%s193_s29 + $0x30] sm:$0xff]  }
  0x10   : > { %734 = vmatprep.mubr.msk.bf16.mxu1 %vm290_vm0, %v763_v5  ;;  %v768_v10 = vld [vmem:[%s193_s29 + $0x18] sm:$0xff]   ;;  %v624_v19 = vld [vmem:[%s866_s3] ss:$0 sm:$0xff] }
  0x11   : > { %721 = vmatpush3.bf16.msra.mxu0 %v759_v1  ;;  %747 = vmatpush3.bf16.msra.mxu1 %v759_v1  ;;  %v769_v11 = vld [vmem:[%s193_s29 + $0x38] sm:$0xff]  }
  0x12   : > { %722 = vmatprep.subr.bf16.mxu0 %v760_v2  ;;  %744 = vmatprep.subr.bf16.mxu1 %v760_v2 }
  0x15   : > { %723 = vmatpush3.bf16.msra.mxu0 %v760_v2  ;;  %748 = vmatpush3.bf16.msra.mxu1 %v760_v2 }
  0x16   : > { %724 = vmatprep.subr.bf16.mxu0 %v761_v3  ;;  %745 = vmatprep.subr.bf16.mxu1 %v761_v3 }
  0x19   : > { %725 = vmatpush3.bf16.msra.mxu0 %v761_v3  ;;  %749 = vmatpush3.bf16.msra.mxu1 %v761_v3 }
  0x1c   : > { %727 = vmatmul.mubr.msk.bf16.vlgmr.msra.gmra.mxu0 %vm290_vm0, %v764_v6  ;;  %735 = vmatmul.mubr.msk.bf16.vlgmr.msra.gmra.mxu1 %vm290_vm0, %v765_v7 }
  0x1d   : > { %730 = vmatprep.mubr.msk.bf16.mxu0 %vm290_vm0, %v766_v8  ;;  %738 = vmatprep.mubr.msk.bf16.mxu1 %vm290_vm0, %v767_v9 }
  0x24   : > { %731 = vmatmul.mubr.msk.bf16.gmra.mxu0 %vm290_vm0, %v768_v10  ;;  %739 = vmatmul.mubr.msk.bf16.gmra.mxu1 %vm290_vm0, %v769_v11 }
  0xdc   : > { %v728_v13 = vpop.f32.mrf.mxu0  ;;  %v736_v14 = vpop.f32.mrf.mxu1 }
  0xdd   : > { %v421_v15 = vmul.f32 %v728_v13, %v623_v12  ;;  %v429_v16 = vmul.f32 %v736_v14, %v623_v12 }
  0xde   : > { %v349_v17 = vpop.f32.mrf.mxu0  ;;  %v381_v18 = vpop.f32.mrf.mxu1 }
  0xdf   : > { %v419_v20 = vmul.f32 %v623_v12, %v349_v17  ;;  %v427_v21 = vmul.f32 %v623_v12, %v381_v18  ;;  %v444_v26 = vadd.f32 %v624_v19, %v421_v15  ;;  %v452_v27 = vadd.f32 %v624_v19, %v429_v16 }
  0xe0   : > { %v729_v22 = vpop.f32.mrf.mxu0  ;;  %v737_v23 = vpop.f32.mrf.mxu1 }
  0xe1   : > { %v422_v24 = vmul.f32 %v729_v22, %v623_v12  ;;  %v430_v25 = vmul.f32 %v737_v23, %v623_v12  ;;  %v442_v34 = vadd.f32 %v624_v19, %v419_v20  ;;  %v450_v35 = vadd.f32 %v624_v19, %v427_v21 }
  0xe2   : > { %v352_v28 = vpop.f32.mrf.mxu0  ;;  %v384_v29 = vpop.f32.mrf.mxu1 }
  0xe3   : > { %v445_v30 = vadd.f32 %v624_v19, %v422_v24  ;;  %v453_v31 = vadd.f32 %v624_v19, %v430_v25  ;;  %v420_v32 = vmul.f32 %v623_v12, %v352_v28  ;;  %v428_v33 = vmul.f32 %v623_v12, %v384_v29 }
  0xe4   : > { %v732_v36 = vpop.f32.mrf.mxu0  ;;  %v740_v37 = vpop.f32.mrf.mxu1 }
  0xe5   : > { %v667_v38 = vpack.c.bf16 %v445_v30, %v444_v26  ;;  %v687_v39 = vpack.c.bf16 %v453_v31, %v452_v27  ;;  %v443_v40 = vadd.f32 %v624_v19, %v420_v32  ;;  %v451_v41 = vadd.f32 %v624_v19, %v428_v33 }
  0xe6   : > { %v425_v42 = vmul.f32 %v732_v36, %v623_v12  ;;  %v433_v43 = vmul.f32 %v740_v37, %v623_v12  ;;  %v365_v44 = vpop.f32.mrf.mxu0  ;;  %v397_v45 = vpop.f32.mrf.mxu1 }
  0xe7   : > { %699 = vst [vmem:[%s850_s10 + $0x8] sm:$0xff] %v667_v38   ;;  %703 = vst [vmem:[%s850_s10 + $0x28] sm:$0xff] %v687_v39   ;;  %v662_v46 = vpack.c.bf16 %v443_v40, %v442_v34  ;;  %v682_v47 = vpack.c.bf16 %v451_v41, %v450_v35  ;;  %v423_v48 = vmul.f32 %v623_v12, %v365_v44 }
  0xe8   : > { %v431_v49 = vmul.f32 %v623_v12, %v397_v45  ;;  %v733_v50 = vpop.f32.mrf.mxu0  ;;  %v741_v51 = vpop.f32.mrf.mxu1  ;;  %v448_v54 = vadd.f32 %v624_v19, %v425_v42  ;;  %v456_v55 = vadd.f32 %v624_v19, %v433_v43 }
  0xe9   : > { %663 = vst [vmem:[%s850_s10] sm:$0xff] %v662_v46   ;;  %702 = vst [vmem:[%s850_s10 + $0x20] sm:$0xff] %v682_v47   ;;  %v426_v52 = vmul.f32 %v733_v50, %v623_v12  ;;  %v434_v53 = vmul.f32 %v741_v51, %v623_v12  ;;  %v446_v62 = vadd.f32 %v624_v19, %v423_v48 }
  0xea   : > { %v368_v56 = vpop.f32.mrf.mxu0  ;;  %v400_v57 = vpop.f32.mrf.mxu1  ;;  %v454_v63 = vadd.f32 %v624_v19, %v431_v49 }
  0xeb   : > { %v449_v58 = vadd.f32 %v624_v19, %v426_v52  ;;  %v457_v59 = vadd.f32 %v624_v19, %v434_v53  ;;  %v424_v60 = vmul.f32 %v623_v12, %v368_v56  ;;  %v432_v61 = vmul.f32 %v623_v12, %v400_v57 }
  0xed   : > { %v677_v0 = vpack.c.bf16 %v449_v58, %v448_v54  ;;  %v697_v1 = vpack.c.bf16 %v457_v59, %v456_v55  ;;  %v447_v2 = vadd.f32 %v624_v19, %v424_v60  ;;  %v455_v3 = vadd.f32 %v624_v19, %v432_v61 }
  0xef   : > { %701 = vst [vmem:[%s850_s10 + $0x18] sm:$0xff] %v677_v0   ;;  %705 = vst [vmem:[%s850_s10 + $0x38] sm:$0xff] %v697_v1   ;;  %v672_v4 = vpack.c.bf16 %v447_v2, %v446_v62  ;;  %v692_v5 = vpack.c.bf16 %v455_v3, %v454_v63 }
  0xf1   : > { %700 = vst [vmem:[%s850_s10 + $0x10] sm:$0xff] %v672_v4   ;;  %704 = vst [vmem:[%s850_s10 + $0x30] sm:$0xff] %v692_v5  }
  0xf2 PF: > { %s14_s15 = sadd.s32 1, %s776_s15  }
  0xf3   : > { %p11_p4 = scmp.ge.s32.totalorder %s14_s15, 5  }
  0xf5   :  { %13 = sbr.rel (!%p11_p4) target bundleno = 1 (0x1), region = 66 }

</bundles_post_ra>
